<compile_context>
chip_gen: v7x
topology: tpu7x:2x2x1
jax: 0.10.0
libtpu: 0.0.40
codegen_flags: <defaults>
</compile_context>

<pallas_src>
import functools

import jax
import jax.numpy as jnp
from jax.experimental import pallas as pl
from jax.experimental.pallas import tpu as pltpu


def _bottleneck_kernel(*refs, stride, mode):
    """Fused bottleneck for one NHWC image tile.

    mode:
      "identity"     -> no projection; residual is x itself (no shortcut matmul at all).
      "fused_proj"   -> stride==1 projection; conv1 and shortcut fused into one matmul.
      "strided_proj" -> stride>1 projection; shortcut uses the strided x subsample.
    """
    if mode == "identity":
        (x_ref, w1_ref, s1_ref, b1_ref, w2_ref, s2_ref, b2_ref,
         w3_ref, s3_ref, b3_ref, out_ref, pad_ref, col_ref) = refs
        wsc_ref = ssc_ref = bsc_ref = None
    elif mode == "fused_proj":
        (x_ref, w1_ref, s1_ref, b1_ref, w2_ref, s2_ref, b2_ref,
         w3_ref, s3_ref, b3_ref, ssc_ref, bsc_ref, out_ref, pad_ref, col_ref) = refs
        wsc_ref = None
    else:  # "strided_proj"
        (x_ref, w1_ref, s1_ref, b1_ref, w2_ref, s2_ref, b2_ref,
         w3_ref, s3_ref, b3_ref, wsc_ref, ssc_ref, bsc_ref,
         out_ref, pad_ref, col_ref) = refs

    _, H, W, Cin = x_ref.shape
    P = s1_ref.shape[-1]
    _, Ho, Wo, Pout = out_ref.shape
    Hp, Wp, _ = pad_ref.shape

    x_f32 = x_ref[0].astype(jnp.float32)                       # (H, W, Cin)
    x2d = x_f32.reshape(H * W, Cin).astype(jnp.bfloat16)       # bf16 MXU operand

    # ---- conv1 (1x1, no bias) [+ fused projection shortcut] ----
    if mode == "fused_proj":
        # one matmul against concat([w1, wsc]) -- shared LHS, single MXU launch.
        fused = jnp.dot(x2d, w1_ref[...], preferred_element_type=jnp.float32)
        o1 = fused[:, :P]
        sc = fused[:, P:] * ssc_ref[...] + bsc_ref[...]
    else:
        o1 = jnp.dot(x2d, w1_ref[...], preferred_element_type=jnp.float32)
        if mode == "identity":
            sc = x_f32.reshape(H * W, Pout)                    # exact identity residual
        else:  # strided projection shortcut
            xs = x_ref[0, pl.ds(0, Ho, stride), pl.ds(0, Wo, stride), :]
            xs = xs.reshape(Ho * Wo, Cin).astype(jnp.bfloat16)
            sc = jnp.dot(xs, wsc_ref[...], preferred_element_type=jnp.float32)
            sc = sc * ssc_ref[...] + bsc_ref[...]

    o1 = jnp.maximum(o1 * s1_ref[...] + b1_ref[...], 0.0)      # (H*W, P), f32

    # ---- conv2 (3x3, pad=1, stride) + bn2 + relu, as ONE im2col matmul (K = 9*P) ----
    # Zero only the 1-wide halo ring (not the whole buffer), then write the interior.
    pad_ref[0:1, :, :] = jnp.zeros((1, Wp, P), jnp.float32)
    pad_ref[1 + H:Hp, :, :] = jnp.zeros((Hp - H - 1, Wp, P), jnp.float32)
    pad_ref[:, 0:1, :] = jnp.zeros((Hp, 1, P), jnp.float32)
    pad_ref[:, 1 + W:Wp, :] = jnp.zeros((Hp, Wp - W - 1, P), jnp.float32)
    pad_ref[1:1 + H, 1:1 + W, :] = o1.reshape(H, W, P)

    for dy in range(3):
        for dx in range(3):
            if stride == 1:
                tap = pad_ref[dy:dy + Ho, dx:dx + Wo, :]
            else:
                tap = pad_ref[pl.ds(dy, Ho, stride), pl.ds(dx, Wo, stride), :]
            j = dy * 3 + dx
            col_ref[:, j * P:(j + 1) * P] = tap.reshape(Ho * Wo, P)

    im2col = col_ref[...].astype(jnp.bfloat16)                 # (Ho*Wo, 9P)
    o2 = jnp.dot(im2col, w2_ref[...], preferred_element_type=jnp.float32)
    o2 = jnp.maximum(o2 * s2_ref[...] + b2_ref[...], 0.0)      # (Ho*Wo, P), f32

    # ---- conv3 (1x1) + bn3, residual add, relu ----
    o3 = jnp.dot(o2.astype(jnp.bfloat16), w3_ref[...],
                 preferred_element_type=jnp.float32)
    o3 = o3 * s3_ref[...] + b3_ref[...]
    out = jnp.maximum(o3 + sc, 0.0)
    out_ref[0] = out.reshape(Ho, Wo, Pout).astype(out_ref.dtype)


def resnet_bottleneck(x_nchw, params, *, stride=1):
    """Fused bottleneck block. PyTorch NCHW at the boundary, NHWC inside."""
    # TODO(synk): keep the surrounding model NHWC end-to-end to drop these two transposes.
    x = jnp.transpose(x_nchw, (0, 2, 3, 1))
    N, H, W, Cin = x.shape
    P = params["w1"].shape[1]
    Pout = params["w3"].shape[1]
    Ho = (H - 1) // stride + 1
    Wo = (W - 1) // stride + 1
    Hp, Wp = stride * Ho + 2, stride * Wo + 2

    bf16 = jnp.bfloat16
    w2f = params["w2"].reshape(9 * P, P).astype(bf16)          # (3,3,Cin,Cout) -> (9P, P)
    w3b = params["w3"].astype(bf16)

    has_proj = "wsc" in params
    if not has_proj:
        mode = "identity"
        weights = [params["w1"].astype(bf16), params["s1"], params["b1"],
                   w2f, params["s2"], params["b2"], w3b, params["s3"], params["b3"]]
    elif stride == 1:
        mode = "fused_proj"  # conv1 + projection shortcut share the LHS -> one matmul
        w1sc = jnp.concatenate([params["w1"], params["wsc"]], axis=1).astype(bf16)
        weights = [w1sc, params["s1"], params["b1"],
                   w2f, params["s2"], params["b2"], w3b, params["s3"], params["b3"],
                   params["ssc"], params["bsc"]]
    else:
        mode = "strided_proj"
        weights = [params["w1"].astype(bf16), params["s1"], params["b1"],
                   w2f, params["s2"], params["b2"], w3b, params["s3"], params["b3"],
                   params["wsc"].astype(bf16), params["ssc"], params["bsc"]]

    full = lambda a: pl.BlockSpec(a.shape, lambda n: (0,) * a.ndim)
    in_specs = ([pl.BlockSpec((1, H, W, Cin), lambda n: (n, 0, 0, 0))]
                + [full(a) for a in weights])

    flops_per_img = (2 * H * W * Cin * P + 2 * Ho * Wo * 9 * P * P
                     + 2 * Ho * Wo * P * Pout)
    if has_proj:
        flops_per_img += 2 * Ho * Wo * Cin * Pout
    bytes_accessed = int(x.size * x.dtype.itemsize + N * Ho * Wo * Pout * 4
                         + sum(int(a.size) * a.dtype.itemsize for a in weights))

    out_nhwc = pl.pallas_call(
        functools.partial(_bottleneck_kernel, stride=stride, mode=mode),
        out_shape=jax.ShapeDtypeStruct((N, Ho, Wo, Pout), jnp.float32),
        grid_spec=pltpu.PrefetchScalarGridSpec(
            num_scalar_prefetch=0,
            grid=(N,),
            in_specs=in_specs,
            out_specs=pl.BlockSpec((1, Ho, Wo, Pout), lambda n: (n, 0, 0, 0)),
            scratch_shapes=[pltpu.VMEM((Hp, Wp, P), jnp.float32),        # padded o1
                            pltpu.VMEM((Ho * Wo, 9 * P), jnp.float32)],  # im2col tile
        ),
        # Images are independent: "parallel" lets v7x split the batch across its 2 TCs.
        compiler_params=pltpu.CompilerParams(dimension_semantics=("parallel",)),
        cost_estimate=pl.CostEstimate(flops=int(N * flops_per_img),
                                      transcendentals=0,
                                      bytes_accessed=bytes_accessed),
    )(x, *weights)

    return jnp.transpose(out_nhwc, (0, 3, 1, 2))               # NHWC -> NCHW


def init_params(key, in_planes, planes, stride, expansion=1):
    """Deterministic synthetic parameters; BN folded to per-channel scale/bias (eval mode).
    No shortcut params are created for the identity case (it is skipped in-kernel)."""
    eps = 1e-5
    pout = expansion * planes
    keys = jax.random.split(key, 20)
    ki = iter(range(20))

    def bn(c):
        gamma = jax.random.uniform(keys[next(ki)], (c,), minval=0.5, maxval=1.5)
        beta = 0.1 * jax.random.normal(keys[next(ki)], (c,))
        mean = 0.1 * jax.random.normal(keys[next(ki)], (c,))
        var = jax.random.uniform(keys[next(ki)], (c,), minval=0.5, maxval=1.5)
        scale = gamma / jnp.sqrt(var + eps)
        bias = beta - mean * scale
        return (scale.reshape(1, c).astype(jnp.float32),
                bias.reshape(1, c).astype(jnp.float32))

    w1 = 0.3 * jax.random.normal(keys[next(ki)], (in_planes, planes), dtype=jnp.float32)
    s1, b1 = bn(planes)
    w2 = 0.2 * jax.random.normal(keys[next(ki)], (3, 3, planes, planes), dtype=jnp.float32)
    s2, b2 = bn(planes)
    w3 = 0.3 * jax.random.normal(keys[next(ki)], (planes, pout), dtype=jnp.float32)
    s3, b3 = bn(pout)

    p = dict(w1=w1, s1=s1, b1=b1, w2=w2, s2=s2, b2=b2, w3=w3, s3=s3, b3=b3)
    if stride != 1 or in_planes != pout:
        p["wsc"] = 0.3 * jax.random.normal(keys[next(ki)], (in_planes, pout),
                                           dtype=jnp.float32)
        p["ssc"], p["bsc"] = bn(pout)
    return p


def ref_forward(x_nchw, p, *, stride):
    """Pure-JAX reference of the PyTorch forward (inference-mode BN). Conv operands are
    cast to bf16 with f32 accumulation to match the kernel's MXU precision."""
    x = jnp.transpose(x_nchw, (0, 2, 3, 1)).astype(jnp.float32)
    dn = ("NHWC", "HWIO", "NHWC")

    def conv(v, w, s, pad):
        return jax.lax.conv_general_dilated(
            v.astype(jnp.bfloat16), w.astype(jnp.bfloat16), (s, s), pad,
            dimension_numbers=dn, preferred_element_type=jnp.float32)

    o = conv(x, p["w1"][None, None], 1, "VALID")
    o = jnp.maximum(o * p["s1"] + p["b1"], 0.0)
    o = conv(o, p["w2"], stride, ((1, 1), (1, 1)))
    o = jnp.maximum(o * p["s2"] + p["b2"], 0.0)
    o = conv(o, p["w3"][None, None], 1, "VALID")
    o = o * p["s3"] + p["b3"]
    if "wsc" in p:
        sc = conv(x, p["wsc"][None, None], stride, "VALID") * p["ssc"] + p["bsc"]
    else:
        sc = x if stride == 1 else x[:, ::stride, ::stride, :]
    out = jnp.maximum(o + sc, 0.0)
    return jnp.transpose(out, (0, 3, 1, 2))


if __name__ == "__main__":
    N, in_planes, planes, H, W, stride = 2, 4, 8, 16, 16, 1

    key = jax.random.PRNGKey(0)
    kx, kp = jax.random.split(key)
    x = jax.random.normal(kx, (N, in_planes, H, W), dtype=jnp.float32)
    params = init_params(kp, in_planes, planes, stride)

    out = jax.block_until_ready(resnet_bottleneck(x, params, stride=stride))
    ref = jax.block_until_ready(ref_forward(x, params, stride=stride))

    assert out.shape == ref.shape, (out.shape, ref.shape)
    if not jnp.allclose(out, ref, atol=3e-3, rtol=3e-3):
        raise AssertionError("Pallas kernel mismatch vs JAX reference, max abs err = "
                             f"{float(jnp.max(jnp.abs(out - ref)))}")
    print("KERNEL_OK")
</pallas_src>

<mosaic_0001>
module attributes {stable_mosaic.version = 11 : i64} {
  func.func @_bottleneck_kernel(%arg0: i32, %arg1: memref<1x16x16x4xf32, #tpu.memory_space<vmem>>, %arg2: memref<4x16xbf16, #tpu.memory_space<vmem>>, %arg3: memref<1x8xf32, #tpu.memory_space<vmem>>, %arg4: memref<1x8xf32, #tpu.memory_space<vmem>>, %arg5: memref<72x8xbf16, #tpu.memory_space<vmem>>, %arg6: memref<1x8xf32, #tpu.memory_space<vmem>>, %arg7: memref<1x8xf32, #tpu.memory_space<vmem>>, %arg8: memref<8x8xbf16, #tpu.memory_space<vmem>>, %arg9: memref<1x8xf32, #tpu.memory_space<vmem>>, %arg10: memref<1x8xf32, #tpu.memory_space<vmem>>, %arg11: memref<1x8xf32, #tpu.memory_space<vmem>>, %arg12: memref<1x8xf32, #tpu.memory_space<vmem>>, %arg13: memref<1x16x16x8xf32, #tpu.memory_space<vmem>>, %arg14: memref<18x18x8xf32, #tpu.memory_space<vmem>>, %arg15: memref<256x72xf32, #tpu.memory_space<vmem>>) attributes {dimension_semantics = [#tpu.dimension_semantics<parallel>], iteration_bounds = array<i64: 2>, scalar_prefetch = 0 : i64, scratch_operands = 2 : i64, tpu.core_type = #tpu.core_type<tc>, window_params = [{transform_indices = @transform_0, window_bounds = array<i64: 1, 16, 16, 4>}, {pipeline_mode = #tpu.pipeline_mode<synchronous>, transform_indices = @transform_1, window_bounds = array<i64: 4, 16>}, {pipeline_mode = #tpu.pipeline_mode<synchronous>, transform_indices = @transform_2, window_bounds = array<i64: 1, 8>}, {pipeline_mode = #tpu.pipeline_mode<synchronous>, transform_indices = @transform_3, window_bounds = array<i64: 1, 8>}, {pipeline_mode = #tpu.pipeline_mode<synchronous>, transform_indices = @transform_4, window_bounds = array<i64: 72, 8>}, {pipeline_mode = #tpu.pipeline_mode<synchronous>, transform_indices = @transform_5, window_bounds = array<i64: 1, 8>}, {pipeline_mode = #tpu.pipeline_mode<synchronous>, transform_indices = @transform_6, window_bounds = array<i64: 1, 8>}, {pipeline_mode = #tpu.pipeline_mode<synchronous>, transform_indices = @transform_7, window_bounds = array<i64: 8, 8>}, {pipeline_mode = #tpu.pipeline_mode<synchronous>, transform_indices = @transform_8, window_bounds = array<i64: 1, 8>}, {pipeline_mode = #tpu.pipeline_mode<synchronous>, transform_indices = @transform_9, window_bounds = array<i64: 1, 8>}, {pipeline_mode = #tpu.pipeline_mode<synchronous>, transform_indices = @transform_10, window_bounds = array<i64: 1, 8>}, {pipeline_mode = #tpu.pipeline_mode<synchronous>, transform_indices = @transform_11, window_bounds = array<i64: 1, 8>}, {transform_indices = @transform_12, window_bounds = array<i64: 1, 16, 16, 8>}]} {
    %c0 = arith.constant 0 : index
    %c0_0 = arith.constant 0 : index
    %c0_1 = arith.constant 0 : index
    %c0_2 = arith.constant 0 : index
    %0 = vector.load %arg1[%c0, %c0_0, %c0_1, %c0_2] : memref<1x16x16x4xf32, #tpu.memory_space<vmem>>, vector<1x16x16x4xf32>
    %1 = vector.shape_cast %0 : vector<1x16x16x4xf32> to vector<16x16x4xf32>
    %2 = vector.shape_cast %1 : vector<16x16x4xf32> to vector<256x4xf32>
    %3 = arith.truncf %2 : vector<256x4xf32> to vector<256x4xbf16>
    %c0_3 = arith.constant 0 : index
    %c0_4 = arith.constant 0 : index
    %4 = vector.load %arg2[%c0_3, %c0_4] : memref<4x16xbf16, #tpu.memory_space<vmem>>, vector<4x16xbf16>
    %cst = arith.constant dense<0.000000e+00> : vector<256x16xf32>
    %5 = tpu.matmul %3, %4, %cst {dimension_numbers = #tpu.dot_dimension_numbers<[1], [0], [0], [1], [0, 0, 1, 1], [], []>} : vector<256x4xbf16>, vector<4x16xbf16>, vector<256x16xf32> -> vector<256x16xf32>
    %6 = vector.extract_strided_slice %5 {offsets = [0, 0], sizes = [256, 8], strides = [1, 1]} : vector<256x16xf32> to vector<256x8xf32>
    %7 = vector.extract_strided_slice %5 {offsets = [0, 8], sizes = [256, 8], strides = [1, 1]} : vector<256x16xf32> to vector<256x8xf32>
    %c0_5 = arith.constant 0 : index
    %c0_6 = arith.constant 0 : index
    %8 = vector.load %arg11[%c0_5, %c0_6] : memref<1x8xf32, #tpu.memory_space<vmem>>, vector<1x8xf32>
    %9 = vector.broadcast %8 : vector<1x8xf32> to vector<256x8xf32>
    %10 = arith.mulf %7, %9 : vector<256x8xf32>
    %c0_7 = arith.constant 0 : index
    %c0_8 = arith.constant 0 : index
    %11 = vector.load %arg12[%c0_7, %c0_8] : memref<1x8xf32, #tpu.memory_space<vmem>>, vector<1x8xf32>
    %12 = vector.broadcast %11 : vector<1x8xf32> to vector<256x8xf32>
    %13 = arith.addf %10, %12 : vector<256x8xf32>
    %c0_9 = arith.constant 0 : index
    %c0_10 = arith.constant 0 : index
    %14 = vector.load %arg3[%c0_9, %c0_10] : memref<1x8xf32, #tpu.memory_space<vmem>>, vector<1x8xf32>
    %15 = vector.broadcast %14 : vector<1x8xf32> to vector<256x8xf32>
    %16 = arith.mulf %6, %15 : vector<256x8xf32>
    %c0_11 = arith.constant 0 : index
    %c0_12 = arith.constant 0 : index
    %17 = vector.load %arg4[%c0_11, %c0_12] : memref<1x8xf32, #tpu.memory_space<vmem>>, vector<1x8xf32>
    %18 = vector.broadcast %17 : vector<1x8xf32> to vector<256x8xf32>
    %19 = arith.addf %16, %18 : vector<256x8xf32>
    %cst_13 = arith.constant 0.000000e+00 : f32
    %20 = vector.broadcast %cst_13 : f32 to vector<256x8xf32>
    %21 = arith.maximumf %19, %20 : vector<256x8xf32>
    %cst_14 = arith.constant 0.000000e+00 : f32
    %22 = vector.broadcast %cst_14 : f32 to vector<1x18x8xf32>
    %c0_15 = arith.constant 0 : index
    %c0_16 = arith.constant 0 : index
    %c0_17 = arith.constant 0 : index
    %23 = vector.load %arg14[%c0_15, %c0_16, %c0_17] : memref<18x18x8xf32, #tpu.memory_space<vmem>>, vector<1x18x8xf32>
    tpu.vector_store %arg14[%c0_15, %c0_16, %c0_17], %22 {strides = array<i32>} : memref<18x18x8xf32, #tpu.memory_space<vmem>>, vector<1x18x8xf32>,
    %cst_18 = arith.constant 0.000000e+00 : f32
    %24 = vector.broadcast %cst_18 : f32 to vector<1x18x8xf32>
    %c17 = arith.constant 17 : index
    %c0_19 = arith.constant 0 : index
    %c0_20 = arith.constant 0 : index
    %25 = vector.load %arg14[%c17, %c0_19, %c0_20] : memref<18x18x8xf32, #tpu.memory_space<vmem>>, vector<1x18x8xf32>
    tpu.vector_store %arg14[%c17, %c0_19, %c0_20], %24 {strides = array<i32>} : memref<18x18x8xf32, #tpu.memory_space<vmem>>, vector<1x18x8xf32>,
    %cst_21 = arith.constant 0.000000e+00 : f32
    %26 = vector.broadcast %cst_21 : f32 to vector<18x1x8xf32>
    %c0_22 = arith.constant 0 : index
    %c0_23 = arith.constant 0 : index
    %c0_24 = arith.constant 0 : index
    %27 = vector.load %arg14[%c0_22, %c0_23, %c0_24] : memref<18x18x8xf32, #tpu.memory_space<vmem>>, vector<18x1x8xf32>
    tpu.vector_store %arg14[%c0_22, %c0_23, %c0_24], %26 {strides = array<i32>} : memref<18x18x8xf32, #tpu.memory_space<vmem>>, vector<18x1x8xf32>,
    %cst_25 = arith.constant 0.000000e+00 : f32
    %28 = vector.broadcast %cst_25 : f32 to vector<18x1x8xf32>
    %c0_26 = arith.constant 0 : index
    %c17_27 = arith.constant 17 : index
    %c0_28 = arith.constant 0 : index
    %29 = vector.load %arg14[%c0_26, %c17_27, %c0_28] : memref<18x18x8xf32, #tpu.memory_space<vmem>>, vector<18x1x8xf32>
    tpu.vector_store %arg14[%c0_26, %c17_27, %c0_28], %28 {strides = array<i32>} : memref<18x18x8xf32, #tpu.memory_space<vmem>>, vector<18x1x8xf32>,
    %30 = vector.shape_cast %21 : vector<256x8xf32> to vector<16x16x8xf32>
    %c1 = arith.constant 1 : index
    %c1_29 = arith.constant 1 : index
    %c0_30 = arith.constant 0 : index
    %31 = vector.load %arg14[%c1, %c1_29, %c0_30] : memref<18x18x8xf32, #tpu.memory_space<vmem>>, vector<16x16x8xf32>
    tpu.vector_store %arg14[%c1, %c1_29, %c0_30], %30 {strides = array<i32>} : memref<18x18x8xf32, #tpu.memory_space<vmem>>, vector<16x16x8xf32>,
    %c0_31 = arith.constant 0 : index
    %c0_32 = arith.constant 0 : index
    %c0_33 = arith.constant 0 : index
    %32 = vector.load %arg14[%c0_31, %c0_32, %c0_33] : memref<18x18x8xf32, #tpu.memory_space<vmem>>, vector<16x16x8xf32>
    %33 = vector.shape_cast %32 : vector<16x16x8xf32> to vector<256x8xf32>
    %c0_34 = arith.constant 0 : index
    %c0_35 = arith.constant 0 : index
    %34 = vector.load %arg15[%c0_34, %c0_35] : memref<256x72xf32, #tpu.memory_space<vmem>>, vector<256x8xf32>
    tpu.vector_store %arg15[%c0_34, %c0_35], %33 {strides = array<i32>} : memref<256x72xf32, #tpu.memory_space<vmem>>, vector<256x8xf32>,
    %c0_36 = arith.constant 0 : index
    %c1_37 = arith.constant 1 : index
    %c0_38 = arith.constant 0 : index
    %35 = vector.load %arg14[%c0_36, %c1_37, %c0_38] : memref<18x18x8xf32, #tpu.memory_space<vmem>>, vector<16x16x8xf32>
    %36 = vector.shape_cast %35 : vector<16x16x8xf32> to vector<256x8xf32>
    %c0_39 = arith.constant 0 : index
    %c8 = arith.constant 8 : index
    %37 = vector.load %arg15[%c0_39, %c8] : memref<256x72xf32, #tpu.memory_space<vmem>>, vector<256x8xf32>
    tpu.vector_store %arg15[%c0_39, %c8], %36 {strides = array<i32>} : memref<256x72xf32, #tpu.memory_space<vmem>>, vector<256x8xf32>,
    %c0_40 = arith.constant 0 : index
    %c2 = arith.constant 2 : index
    %c0_41 = arith.constant 0 : index
    %38 = vector.load %arg14[%c0_40, %c2, %c0_41] : memref<18x18x8xf32, #tpu.memory_space<vmem>>, vector<16x16x8xf32>
    %39 = vector.shape_cast %38 : vector<16x16x8xf32> to vector<256x8xf32>
    %c0_42 = arith.constant 0 : index
    %c16 = arith.constant 16 : index
    %40 = vector.load %arg15[%c0_42, %c16] : memref<256x72xf32, #tpu.memory_space<vmem>>, vector<256x8xf32>
    tpu.vector_store %arg15[%c0_42, %c16], %39 {strides = array<i32>} : memref<256x72xf32, #tpu.memory_space<vmem>>, vector<256x8xf32>,
    %c1_43 = arith.constant 1 : index
    %c0_44 = arith.constant 0 : index
    %c0_45 = arith.constant 0 : index
    %41 = vector.load %arg14[%c1_43, %c0_44, %c0_45] : memref<18x18x8xf32, #tpu.memory_space<vmem>>, vector<16x16x8xf32>
    %42 = vector.shape_cast %41 : vector<16x16x8xf32> to vector<256x8xf32>
    %c0_46 = arith.constant 0 : index
    %c24 = arith.constant 24 : index
    %43 = vector.load %arg15[%c0_46, %c24] : memref<256x72xf32, #tpu.memory_space<vmem>>, vector<256x8xf32>
    tpu.vector_store %arg15[%c0_46, %c24], %42 {strides = array<i32>} : memref<256x72xf32, #tpu.memory_space<vmem>>, vector<256x8xf32>,
    %c1_47 = arith.constant 1 : index
    %c1_48 = arith.constant 1 : index
    %c0_49 = arith.constant 0 : index
    %44 = vector.load %arg14[%c1_47, %c1_48, %c0_49] : memref<18x18x8xf32, #tpu.memory_space<vmem>>, vector<16x16x8xf32>
    %45 = vector.shape_cast %44 : vector<16x16x8xf32> to vector<256x8xf32>
    %c0_50 = arith.constant 0 : index
    %c32 = arith.constant 32 : index
    %46 = vector.load %arg15[%c0_50, %c32] : memref<256x72xf32, #tpu.memory_space<vmem>>, vector<256x8xf32>
    tpu.vector_store %arg15[%c0_50, %c32], %45 {strides = array<i32>} : memref<256x72xf32, #tpu.memory_space<vmem>>, vector<256x8xf32>,
    %c1_51 = arith.constant 1 : index
    %c2_52 = arith.constant 2 : index
    %c0_53 = arith.constant 0 : index
    %47 = vector.load %arg14[%c1_51, %c2_52, %c0_53] : memref<18x18x8xf32, #tpu.memory_space<vmem>>, vector<16x16x8xf32>
    %48 = vector.shape_cast %47 : vector<16x16x8xf32> to vector<256x8xf32>
    %c0_54 = arith.constant 0 : index
    %c40 = arith.constant 40 : index
    %49 = vector.load %arg15[%c0_54, %c40] : memref<256x72xf32, #tpu.memory_space<vmem>>, vector<256x8xf32>
    tpu.vector_store %arg15[%c0_54, %c40], %48 {strides = array<i32>} : memref<256x72xf32, #tpu.memory_space<vmem>>, vector<256x8xf32>,
    %c2_55 = arith.constant 2 : index
    %c0_56 = arith.constant 0 : index
    %c0_57 = arith.constant 0 : index
    %50 = vector.load %arg14[%c2_55, %c0_56, %c0_57] : memref<18x18x8xf32, #tpu.memory_space<vmem>>, vector<16x16x8xf32>
    %51 = vector.shape_cast %50 : vector<16x16x8xf32> to vector<256x8xf32>
    %c0_58 = arith.constant 0 : index
    %c48 = arith.constant 48 : index
    %52 = vector.load %arg15[%c0_58, %c48] : memref<256x72xf32, #tpu.memory_space<vmem>>, vector<256x8xf32>
    tpu.vector_store %arg15[%c0_58, %c48], %51 {strides = array<i32>} : memref<256x72xf32, #tpu.memory_space<vmem>>, vector<256x8xf32>,
    %c2_59 = arith.constant 2 : index
    %c1_60 = arith.constant 1 : index
    %c0_61 = arith.constant 0 : index
    %53 = vector.load %arg14[%c2_59, %c1_60, %c0_61] : memref<18x18x8xf32, #tpu.memory_space<vmem>>, vector<16x16x8xf32>
    %54 = vector.shape_cast %53 : vector<16x16x8xf32> to vector<256x8xf32>
    %c0_62 = arith.constant 0 : index
    %c56 = arith.constant 56 : index
    %55 = vector.load %arg15[%c0_62, %c56] : memref<256x72xf32, #tpu.memory_space<vmem>>, vector<256x8xf32>
    tpu.vector_store %arg15[%c0_62, %c56], %54 {strides = array<i32>} : memref<256x72xf32, #tpu.memory_space<vmem>>, vector<256x8xf32>,
    %c2_63 = arith.constant 2 : index
    %c2_64 = arith.constant 2 : index
    %c0_65 = arith.constant 0 : index
    %56 = vector.load %arg14[%c2_63, %c2_64, %c0_65] : memref<18x18x8xf32, #tpu.memory_space<vmem>>, vector<16x16x8xf32>
    %57 = vector.shape_cast %56 : vector<16x16x8xf32> to vector<256x8xf32>
    %c0_66 = arith.constant 0 : index
    %c64 = arith.constant 64 : index
    %58 = vector.load %arg15[%c0_66, %c64] : memref<256x72xf32, #tpu.memory_space<vmem>>, vector<256x8xf32>
    tpu.vector_store %arg15[%c0_66, %c64], %57 {strides = array<i32>} : memref<256x72xf32, #tpu.memory_space<vmem>>, vector<256x8xf32>,
    %c0_67 = arith.constant 0 : index
    %c0_68 = arith.constant 0 : index
    %59 = vector.load %arg15[%c0_67, %c0_68] : memref<256x72xf32, #tpu.memory_space<vmem>>, vector<256x72xf32>
    %60 = arith.truncf %59 : vector<256x72xf32> to vector<256x72xbf16>
    %c0_69 = arith.constant 0 : index
    %c0_70 = arith.constant 0 : index
    %61 = vector.load %arg5[%c0_69, %c0_70] : memref<72x8xbf16, #tpu.memory_space<vmem>>, vector<72x8xbf16>
    %cst_71 = arith.constant dense<0.000000e+00> : vector<256x8xf32>
    %62 = tpu.matmul %60, %61, %cst_71 {dimension_numbers = #tpu.dot_dimension_numbers<[1], [0], [0], [1], [0, 0, 1, 1], [], []>} : vector<256x72xbf16>, vector<72x8xbf16>, vector<256x8xf32> -> vector<256x8xf32>
    %c0_72 = arith.constant 0 : index
    %c0_73 = arith.constant 0 : index
    %63 = vector.load %arg6[%c0_72, %c0_73] : memref<1x8xf32, #tpu.memory_space<vmem>>, vector<1x8xf32>
    %64 = vector.broadcast %63 : vector<1x8xf32> to vector<256x8xf32>
    %65 = arith.mulf %62, %64 : vector<256x8xf32>
    %c0_74 = arith.constant 0 : index
    %c0_75 = arith.constant 0 : index
    %66 = vector.load %arg7[%c0_74, %c0_75] : memref<1x8xf32, #tpu.memory_space<vmem>>, vector<1x8xf32>
    %67 = vector.broadcast %66 : vector<1x8xf32> to vector<256x8xf32>
    %68 = arith.addf %65, %67 : vector<256x8xf32>
    %cst_76 = arith.constant 0.000000e+00 : f32
    %69 = vector.broadcast %cst_76 : f32 to vector<256x8xf32>
    %70 = arith.maximumf %68, %69 : vector<256x8xf32>
    %71 = arith.truncf %70 : vector<256x8xf32> to vector<256x8xbf16>
    %c0_77 = arith.constant 0 : index
    %c0_78 = arith.constant 0 : index
    %72 = vector.load %arg8[%c0_77, %c0_78] : memref<8x8xbf16, #tpu.memory_space<vmem>>, vector<8x8xbf16>
    %cst_79 = arith.constant dense<0.000000e+00> : vector<256x8xf32>
    %73 = tpu.matmul %71, %72, %cst_79 {dimension_numbers = #tpu.dot_dimension_numbers<[1], [0], [0], [1], [0, 0, 1, 1], [], []>} : vector<256x8xbf16>, vector<8x8xbf16>, vector<256x8xf32> -> vector<256x8xf32>
    %c0_80 = arith.constant 0 : index
    %c0_81 = arith.constant 0 : index
    %74 = vector.load %arg9[%c0_80, %c0_81] : memref<1x8xf32, #tpu.memory_space<vmem>>, vector<1x8xf32>
    %75 = vector.broadcast %74 : vector<1x8xf32> to vector<256x8xf32>
    %76 = arith.mulf %73, %75 : vector<256x8xf32>
    %c0_82 = arith.constant 0 : index
    %c0_83 = arith.constant 0 : index
    %77 = vector.load %arg10[%c0_82, %c0_83] : memref<1x8xf32, #tpu.memory_space<vmem>>, vector<1x8xf32>
    %78 = vector.broadcast %77 : vector<1x8xf32> to vector<256x8xf32>
    %79 = arith.addf %76, %78 : vector<256x8xf32>
    %80 = arith.addf %79, %13 : vector<256x8xf32>
    %cst_84 = arith.constant 0.000000e+00 : f32
    %81 = vector.broadcast %cst_84 : f32 to vector<256x8xf32>
    %82 = arith.maximumf %80, %81 : vector<256x8xf32>
    %83 = vector.shape_cast %82 : vector<256x8xf32> to vector<16x16x8xf32>
    %c0_85 = arith.constant 0 : index
    %c0_86 = arith.constant 0 : index
    %c0_87 = arith.constant 0 : index
    %c0_88 = arith.constant 0 : index
    %84 = vector.load %arg13[%c0_85, %c0_86, %c0_87, %c0_88] : memref<1x16x16x8xf32, #tpu.memory_space<vmem>>, vector<1x16x16x8xf32>
    %85 = vector.shape_cast %84 : vector<1x16x16x8xf32> to vector<16x16x8xf32>
    %86 = vector.shape_cast %83 : vector<16x16x8xf32> to vector<1x16x16x8xf32>
    tpu.vector_store %arg13[%c0_85, %c0_86, %c0_87, %c0_88], %86 {strides = array<i32>} : memref<1x16x16x8xf32, #tpu.memory_space<vmem>>, vector<1x16x16x8xf32>,
    return
  }
  func.func @transform_0(%arg0: i32) -> (i32, i32, i32, i32) {
    %c0_i32 = arith.constant 0 : i32
    %c0_i32_0 = arith.constant 0 : i32
    %c0_i32_1 = arith.constant 0 : i32
    %c0_i32_2 = arith.constant 0 : i32
    return %arg0, %c0_i32, %c0_i32_0, %c0_i32_1 : i32, i32, i32, i32
  }
  func.func @transform_1(%arg0: i32) -> (i32, i32) {
    %c0_i32 = arith.constant 0 : i32
    %c0_i32_0 = arith.constant 0 : i32
    %c0_i32_1 = arith.constant 0 : i32
    return %c0_i32, %c0_i32_0 : i32, i32
  }
  func.func @transform_2(%arg0: i32) -> (i32, i32) {
    %c0_i32 = arith.constant 0 : i32
    %c0_i32_0 = arith.constant 0 : i32
    %c0_i32_1 = arith.constant 0 : i32
    return %c0_i32, %c0_i32_0 : i32, i32
  }
  func.func @transform_3(%arg0: i32) -> (i32, i32) {
    %c0_i32 = arith.constant 0 : i32
    %c0_i32_0 = arith.constant 0 : i32
    %c0_i32_1 = arith.constant 0 : i32
    return %c0_i32, %c0_i32_0 : i32, i32
  }
  func.func @transform_4(%arg0: i32) -> (i32, i32) {
    %c0_i32 = arith.constant 0 : i32
    %c0_i32_0 = arith.constant 0 : i32
    %c0_i32_1 = arith.constant 0 : i32
    return %c0_i32, %c0_i32_0 : i32, i32
  }
  func.func @transform_5(%arg0: i32) -> (i32, i32) {
    %c0_i32 = arith.constant 0 : i32
    %c0_i32_0 = arith.constant 0 : i32
    %c0_i32_1 = arith.constant 0 : i32
    return %c0_i32, %c0_i32_0 : i32, i32
  }
  func.func @transform_6(%arg0: i32) -> (i32, i32) {
    %c0_i32 = arith.constant 0 : i32
    %c0_i32_0 = arith.constant 0 : i32
    %c0_i32_1 = arith.constant 0 : i32
    return %c0_i32, %c0_i32_0 : i32, i32
  }
  func.func @transform_7(%arg0: i32) -> (i32, i32) {
    %c0_i32 = arith.constant 0 : i32
    %c0_i32_0 = arith.constant 0 : i32
    %c0_i32_1 = arith.constant 0 : i32
    return %c0_i32, %c0_i32_0 : i32, i32
  }
  func.func @transform_8(%arg0: i32) -> (i32, i32) {
    %c0_i32 = arith.constant 0 : i32
    %c0_i32_0 = arith.constant 0 : i32
    %c0_i32_1 = arith.constant 0 : i32
    return %c0_i32, %c0_i32_0 : i32, i32
  }
  func.func @transform_9(%arg0: i32) -> (i32, i32) {
    %c0_i32 = arith.constant 0 : i32
    %c0_i32_0 = arith.constant 0 : i32
    %c0_i32_1 = arith.constant 0 : i32
    return %c0_i32, %c0_i32_0 : i32, i32
  }
  func.func @transform_10(%arg0: i32) -> (i32, i32) {
    %c0_i32 = arith.constant 0 : i32
    %c0_i32_0 = arith.constant 0 : i32
    %c0_i32_1 = arith.constant 0 : i32
    return %c0_i32, %c0_i32_0 : i32, i32
  }
  func.func @transform_11(%arg0: i32) -> (i32, i32) {
    %c0_i32 = arith.constant 0 : i32
    %c0_i32_0 = arith.constant 0 : i32
    %c0_i32_1 = arith.constant 0 : i32
    return %c0_i32, %c0_i32_0 : i32, i32
  }
  func.func @transform_12(%arg0: i32) -> (i32, i32, i32, i32) {
    %c0_i32 = arith.constant 0 : i32
    %c0_i32_0 = arith.constant 0 : i32
    %c0_i32_1 = arith.constant 0 : i32
    %c0_i32_2 = arith.constant 0 : i32
    return %arg0, %c0_i32, %c0_i32_0, %c0_i32_1 : i32, i32, i32, i32
  }
}

</mosaic_0001>

<bundles_post_ra>
// kernel: tpu_custom_call.1
= control target key start
LH: loop header
LB: loop body
LE: loop exit
PB: predicated region body
PF: predicated region fallthrough
CT: control target
= control target key end

     0   :  { %s3907_s21 = smov 0   ;;  %s5568_s0 = inlined_call_operand.vmem [shape: f32[2,16,16,4], index: 0, kind: input, shape index: {}]   ;;  %s5569_s1 = inlined_call_operand.vmem [shape: bf16[4,16], index: 1, kind: input, shape index: {}]   ;;  %s5570_s2 = inlined_call_operand.vmem [shape: f32[1,8], index: 2, kind: input, shape index: {}]   ;;  %s5571_s3 = inlined_call_operand.vmem [shape: f32[1,8], index: 3, kind: input, shape index: {}]   ;;  %s5572_s4 = inlined_call_operand.vmem [shape: bf16[72,8], index: 4, kind: input, shape index: {}]   ;;  %s5573_s5 = inlined_call_operand.vmem [shape: f32[1,8], index: 5, kind: input, shape index: {}]   ;;  %s5574_s6 = inlined_call_operand.vmem [shape: f32[1,8], index: 6, kind: input, shape index: {}]   ;;  %s5575_s7 = inlined_call_operand.vmem [shape: bf16[8,8], index: 7, kind: input, shape index: {}]   ;;  %s5576_s8 = inlined_call_operand.vmem [shape: f32[1,8], index: 8, kind: input, shape index: {}]   ;;  %s5577_s9 = inlined_call_operand.vmem [shape: f32[1,8], index: 9, kind: input, shape index: {}]   ;;  %s5578_s10 = inlined_call_operand.vmem [shape: f32[1,8], index: 10, kind: input, shape index: {}]   ;;  %s5579_s11 = inlined_call_operand.vmem [shape: f32[1,8], index: 11, kind: input, shape index: {}]   ;;  %s5580_s12 = inlined_call_operand.vmem [shape: f32[2,16,16,8], index: 12, kind: output, shape index: {}]  }
   0x1 LB: > { %s3552_s22 = sadd.s32 4294967295, %s3830_s21   ;;  %p3556_p0 = scmp.ge.s32.totalorder %s3830_s21, 1  ;;  %s3830_s21 = sphi %s3907_s21, %s22_s21  }
   0x2   : > { %p362_p1 = scmp.lt.s32.totalorder %s3830_s21, 3 }
   0x4   : > { %p363_p2 = pnand %p3556_p0, %p362_p1 }
   0x6   : > { %366 = sbr.rel (%p363_p2) target bundleno = 1330 (0x532), region = 68 }
   0xd   : > { %v463_v0 = vld [vmem:[%s5569_s1] sm:$0x3]  ;;  %vm513_vm0 = vcmask 1041408   ;;  %p404_p3 = scmp.lt.s32.totalorder %s3552_s22, 1  ;;  %vm464_vm1 = vcmask 31744   ;;  %vm870_vm2 = vcmask 64512  }
   0xe   : > { %3793 = vmatprep.subr.msk.bf16.mxu0 %vm513_vm0, %v463_v0  ;;  %v515_v1 = vsel %vm513_vm0, %v463_v0, 0  ;;  %3794 = vmatprep.subr.msk.bf16.mxu1 %vm513_vm0, %v463_v0  ;;  %v3832_v32 = vmov 0.0   ;;  %vm873_vm3 = vcmask 58368   ;;  %vm879_vm4 = vcmask 57344   ;;  %s3833_s29 = smov 8   ;;  %s3834_s30 = smov 16  }
   0xf   : > { %3682 = vmatpush3.bf16.msra.mxu0 %v515_v1  ;;  %s5609_s22 = smov (!%p404_p3, %s3552_s22), 1  ;;  %3792 = vmatpush3.bf16.msra.mxu1 %v515_v1  ;;  %871 = vst.msk [vmem:[#allocation2] sm:$0xff] %vm870_vm2, %v3832_v32  ;;  %872 = vst.msk [vmem:[#allocation2 + $0x8] sm:$0xff] %vm870_vm2, %v3832_v32  ;;  %vm1173_vm5 = vcmask 130112   ;;  %vm1366_vm6 = vcmask 195712   ;;  %s3835_s17 = smov 24  }
  0x10   : > { %s3624_s25 = sshll.u32 %s5609_s22, 8  ;;  %876 = vst.msk [vmem:[#allocation2 + $0x198] sm:$0xff] %vm870_vm2, %v3832_v32  ;;  %877 = vst.msk [vmem:[#allocation2 + $0x1a0] sm:$0xff] %vm870_vm2, %v3832_v32  ;;  %v4015_v48 = vld [vmem:[%s5570_s2] ss:$0 sm:$0xff]  ;;  %s3836_s18 = smov 32  }
  0x11   : > { %s3926_s28 = scalar_lea.vmem %s5568_s0, %s3624_s25  ;;  %874 = vst.msk [vmem:[#allocation2 + $0x10] sm:$0x3] %vm873_vm3, %v3832_v32  ;;  %878 = vst.msk [vmem:[#allocation2 + $0x1a8] sm:$0x3] %vm873_vm3, %v3832_v32  ;;  %v4024_v51 = vld [vmem:[%s5571_s3] ss:$0 sm:$0xff] }
  0x12   : > { %v415_v2 = vld [vmem:[%s3926_s28] sm:$0xff]  ;;  %v416_v3 = vld [vmem:[%s3926_s28 + $0x8] sm:$0xff]  ;;  %v417_v4 = vld [vmem:[%s3926_s28 + $0x10] sm:$0xff]  ;;  %880 = vst.msk [vmem:[#allocation2] sm:$0x1] %vm879_vm4, %v3832_v32  ;;  %s3837_s19 = smov 48  }
  0x13   : > { %v447_v5 = vpack.c.bf16 %v416_v3, %v415_v2  ;;  %v418_v6 = vld [vmem:[%s3926_s28 + $0x18] sm:$0xff]  ;;  %v431_v7 = vld [vmem:[%s3926_s28 + $0x80] sm:$0xff]  ;;  %v432_v8 = vld [vmem:[%s3926_s28 + $0x88] sm:$0xff]  ;;  %881 = vst.msk [vmem:[#allocation2 + $0x18] sm:$0x1] %vm879_vm4, %v3832_v32  ;;  %s3838_s20 = smov 56  }
  0x14   : > { %v448_v9 = vpack.c.bf16 %v418_v6, %v417_v4  ;;  %v455_v10 = vpack.c.bf16 %v432_v8, %v431_v7  ;;  %v433_v11 = vld [vmem:[%s3926_s28 + $0x90] sm:$0xff]  ;;  %v434_v12 = vld [vmem:[%s3926_s28 + $0x98] sm:$0xff]  ;;  %v419_v13 = vld [vmem:[%s3926_s28 + $0x20] sm:$0xff]  ;;  %882 = vst.msk [vmem:[#allocation2 + $0x30] sm:$0x1] %vm879_vm4, %v3832_v32  ;;  %s3839_s23 = smov 40  }
  0x15   : > { %3683 = vmatprep.mubr.msk.bf16.mxu0 %vm464_vm1, %v447_v5  ;;  %v456_v14 = vpack.c.bf16 %v434_v12, %v433_v11  ;;  %v420_v15 = vld [vmem:[%s3926_s28 + $0x28] sm:$0xff]  ;;  %v421_v17 = vld [vmem:[%s3926_s28 + $0x30] sm:$0xff]  ;;  %v422_v18 = vld [vmem:[%s3926_s28 + $0x38] sm:$0xff]  ;;  %883 = vst.msk [vmem:[#allocation2 + $0x48] sm:$0x1] %vm879_vm4, %v3832_v32  ;;  %s3840_s24 = smov 64  }
  0x16   : > { %3684 = vmatmul.mubr.msk.bf16.vlgmr.msra.gmra.mrb[0].mxu0 %vm464_vm1, %v448_v9  ;;  %3699 = vmatprep.mubr.msk.bf16.mxu1 %vm464_vm1, %v455_v10  ;;  %v449_v16 = vpack.c.bf16 %v420_v15, %v419_v13  ;;  %v423_v19 = vld [vmem:[%s3926_s28 + $0x40] sm:$0xff]  ;;  %v424_v20 = vld [vmem:[%s3926_s28 + $0x48] sm:$0xff]  ;;  %v450_v21 = vpack.c.bf16 %v422_v18, %v421_v17  ;;  %v425_v23 = vld [vmem:[%s3926_s28 + $0x50] sm:$0xff]  ;;  %884 = vst.msk [vmem:[#allocation2 + $0x60] sm:$0x1] %vm879_vm4, %v3832_v32  ;;  %vm2691_vm7 = vcmask 1043456  }
  0x17   : > { %3700 = vmatmul.mubr.msk.bf16.vlgmr.msra.gmra.mrb[0].mxu1 %vm464_vm1, %v456_v14  ;;  %v451_v22 = vpack.c.bf16 %v424_v20, %v423_v19  ;;  %v426_v24 = vld [vmem:[%s3926_s28 + $0x58] sm:$0xff]  ;;  %v427_v25 = vld [vmem:[%s3926_s28 + $0x60] sm:$0xff]  ;;  %v428_v26 = vld [vmem:[%s3926_s28 + $0x68] sm:$0xff]  ;;  %885 = vst.msk [vmem:[#allocation2 + $0x78] sm:$0x1] %vm879_vm4, %v3832_v32  ;;  %vm1559_vm8 = vcmask 261312  }
  0x18   : > { %3687 = vmatprep.mubr.msk.bf16.mxu0 %vm464_vm1, %v449_v16  ;;  %v452_v27 = vpack.c.bf16 %v426_v24, %v425_v23  ;;  %v453_v28 = vpack.c.bf16 %v428_v26, %v427_v25  ;;  %v429_v29 = vld [vmem:[%s3926_s28 + $0x70] sm:$0xff]  ;;  %v430_v30 = vld [vmem:[%s3926_s28 + $0x78] sm:$0xff]  ;;  %v1013_v33 = vld [vmem:[#allocation2 + $0x1] sm:$0xff]  ;;  %886 = vst.msk [vmem:[#allocation2 + $0x90] sm:$0x1] %vm879_vm4, %v3832_v32  ;;  %vm1752_vm9 = vcmask 326912  }
  0x19   : > { %v454_v31 = vpack.c.bf16 %v430_v30, %v429_v29  ;;  %1077 = vrot.lane.b32.xlu0 %v1013_v33, %s3833_s29  ;;  %887 = vst.msk [vmem:[#allocation2 + $0xa8] sm:$0x1] %vm879_vm4, %v3832_v32  ;;  %888 = vst.msk [vmem:[#allocation2 + $0xc0] sm:$0x1] %vm879_vm4, %v3832_v32  ;;  %v1014_v34 = vld [vmem:[#allocation2 + $0x9] sm:$0xff]  ;;  %v435_v37 = vld [vmem:[%s3926_s28 + $0xa0] sm:$0xff] }
  0x1a   : > { %889 = vst.msk [vmem:[#allocation2 + $0xd8] sm:$0x1] %vm879_vm4, %v3832_v32  ;;  %890 = vst.msk [vmem:[#allocation2 + $0xf0] sm:$0x1] %vm879_vm4, %v3832_v32  ;;  %v1206_v35 = vld [vmem:[#allocation2 + $0x2] sm:$0xff]  ;;  %v437_v40 = vld [vmem:[%s3926_s28 + $0xb0] sm:$0xff] }
  0x1b   : > { %891 = vst.msk [vmem:[#allocation2 + $0x108] sm:$0x1] %vm879_vm4, %v3832_v32  ;;  %892 = vst.msk [vmem:[#allocation2 + $0x120] sm:$0x1] %vm879_vm4, %v3832_v32  ;;  %v436_v38 = vld [vmem:[%s3926_s28 + $0xa8] sm:$0xff]  ;;  %v438_v41 = vld [vmem:[%s3926_s28 + $0xb8] sm:$0xff] }
  0x1c   : > { %893 = vst.msk [vmem:[#allocation2 + $0x138] sm:$0x1] %vm879_vm4, %v3832_v32  ;;  %894 = vst.msk [vmem:[#allocation2 + $0x150] sm:$0x1] %vm879_vm4, %v3832_v32  ;;  %v457_v39 = vpack.c.bf16 %v436_v38, %v435_v37  ;;  %v458_v42 = vpack.c.bf16 %v438_v41, %v437_v40  ;;  %v949_v43 = vld [vmem:[#allocation2] sm:$0xff]  ;;  %v950_v45 = vld [vmem:[#allocation2 + $0x8] sm:$0xff] }
  0x1d   : > { %895 = vst.msk [vmem:[#allocation2 + $0x168] sm:$0x1] %vm879_vm4, %v3832_v32  ;;  %896 = vst.msk [vmem:[#allocation2 + $0x180] sm:$0x1] %vm879_vm4, %v3832_v32  ;;  %1079 = vrot.lane.b32.xlu0 %v1014_v34, %s3833_s29  ;;  %v439_v24 = vld [vmem:[%s3926_s28 + $0xc0] sm:$0xff]  ;;  %v440_v25 = vld [vmem:[%s3926_s28 + $0xc8] sm:$0xff] }
  0x1e   : > { %3688 = vmatmul.mubr.msk.bf16.gmra.mrb[4].mxu0 %vm464_vm1, %v450_v21  ;;  %899 = vst.msk [vmem:[#allocation2 + $0x29] sm:$0x1] %vm879_vm4, %v3832_v32  ;;  %900 = vst.msk [vmem:[#allocation2 + $0x41] sm:$0x1] %vm879_vm4, %v3832_v32  ;;  %3703 = vmatprep.mubr.msk.bf16.mxu1 %vm464_vm1, %v457_v39  ;;  %v459_v29 = vpack.c.bf16 %v440_v25, %v439_v24  ;;  %v441_v30 = vld [vmem:[%s3926_s28 + $0xd0] sm:$0xff]  ;;  %vm1945_vm10 = vcmask 392512  }
  0x1f   : > { %3691 = vmatprep.mubr.msk.bf16.mxu0 %vm464_vm1, %v451_v22  ;;  %901 = vst.msk [vmem:[#allocation2 + $0x59] sm:$0x1] %vm879_vm4, %v3832_v32  ;;  %902 = vst.msk [vmem:[#allocation2 + $0x71] sm:$0x1] %vm879_vm4, %v3832_v32  ;;  %3704 = vmatmul.mubr.msk.bf16.gmra.mrb[4].mxu1 %vm464_vm1, %v458_v42  ;;  %vm2139_vm11 = vcmask 458112   ;;  %vm2332_vm12 = vcmask 523712  }
  0x20   : > { %903 = vst.msk [vmem:[#allocation2 + $0x89] sm:$0x1] %vm879_vm4, %v3832_v32  ;;  %904 = vst.msk [vmem:[#allocation2 + $0xa1] sm:$0x1] %vm879_vm4, %v3832_v32  ;;  %3707 = vmatprep.mubr.msk.bf16.mxu1 %vm464_vm1, %v459_v29  ;;  %vm2525_vm13 = vcmask 589312   ;;  %vm2642_vm14 = vcmask 588800  }
  0x21   : > { %905 = vst.msk [vmem:[#allocation2 + $0xb9] sm:$0x1] %vm879_vm4, %v3832_v32  ;;  %906 = vst.msk [vmem:[#allocation2 + $0xd1] sm:$0x1] %vm879_vm4, %v3832_v32  ;;  %1270 = vrot.lane.b32.xlu0 %v1206_v35, %s3834_s30 }
  0x22   : > { %907 = vst.msk [vmem:[#allocation2 + $0xe9] sm:$0x1] %vm879_vm4, %v3832_v32  ;;  %908 = vst.msk [vmem:[#allocation2 + $0x101] sm:$0x1] %vm879_vm4, %v3832_v32 }
  0x23   : > { %909 = vst.msk [vmem:[#allocation2 + $0x119] sm:$0x1] %vm879_vm4, %v3832_v32  ;;  %910 = vst.msk [vmem:[#allocation2 + $0x131] sm:$0x1] %vm879_vm4, %v3832_v32 }
  0x24   : > { %911 = vst.msk [vmem:[#allocation2 + $0x149] sm:$0x1] %vm879_vm4, %v3832_v32  ;;  %912 = vst.msk [vmem:[#allocation2 + $0x161] sm:$0x1] %vm879_vm4, %v3832_v32 }
  0x25   : > { %913 = vst.msk [vmem:[#allocation2 + $0x179] sm:$0x1] %vm879_vm4, %v3832_v32  ;;  %914 = vst.msk [vmem:[#allocation2 + $0x191] sm:$0x1] %vm879_vm4, %v3832_v32 }
  0x26   : > { %3692 = vmatmul.mubr.msk.bf16.gmra.mrb[8].mxu0 %vm464_vm1, %v452_v27  ;;  %897 = vst.msk [vmem:[#allocation2 + $0x198] sm:$0x1] %vm879_vm4, %v3832_v32  ;;  %898 = vst.msk [vmem:[#allocation2 + $0x11] sm:$0x1] %vm879_vm4, %v3832_v32 }
  0x27   : > { %3695 = vmatprep.mubr.msk.bf16.mxu0 %vm464_vm1, %v453_v28  ;;  %915 = vst.msk [vmem:[#allocation2 + $0x1a9] sm:$0x1] %vm879_vm4, %v3832_v32 }
  0x28   : > { %981 = vst.msk [vmem:[#allocation3] sm:$0xff] %vm870_vm2, %v949_v43  ;;  %982 = vst.msk [vmem:[#allocation3 + $0x8] sm:$0xff] %vm870_vm2, %v950_v45 }
  0x2d   : > { %v1207_v36 = vld [vmem:[#allocation2 + $0xa] sm:$0xff] }
  0x2e   : > { %3696 = vmatmul.mubr.msk.bf16.gmra.mrb[12].mxu0 %vm464_vm1, %v454_v31  ;;  %1272 = vrot.lane.b32.xlu1 %v1207_v36, %s3834_s30  ;;  %v442_v31 = vld [vmem:[%s3926_s28 + $0xd8] sm:$0xff] }
  0x2f   : > { %v460_v34 = vpack.c.bf16 %v442_v31, %v441_v30 }
  0x31   : > { %3708 = vmatmul.mubr.msk.bf16.gmra.mrb[8].mxu1 %vm464_vm1, %v460_v34 }
  0x8b   : > { %v1078_v44 = vpop.permute.xlu0 %1077 }
  0x8c   : > { %1174 = vst.msk [vmem:[#allocation3] sm:$0xff] %vm1173_vm5, %v1078_v44 }
  0x8f   : > { %v1080_v46 = vpop.permute.xlu0 %1079 }
  0x90   : > { %1175 = vst.msk [vmem:[#allocation3 + $0x8] sm:$0xff] %vm1173_vm5, %v1080_v46 }
  0x93   : > { %v1271_v47 = vpop.permute.xlu0 %1270 }
  0x94   : > { %1367 = vst.msk [vmem:[#allocation3] sm:$0xff] %vm1366_vm6, %v1271_v47 }
  0xa0   : > { %v1273_v49 = vpop.permute.xlu1 %1272 }
  0xa1   : > { %1368 = vst.msk [vmem:[#allocation3 + $0x8] sm:$0xff] %vm1366_vm6, %v1273_v49 }
  0xe9   : > { %v4019_v50 = vpop.f32.mrb[0].mxu0 }
  0xea   : > { %v769_v52 = vmul.f32 %v4019_v50, %v4015_v48  ;;  %v4028_v53 = vpop.f32.mrb[1].mxu0  ;;  %v4030_v54 = vpop.f32.mrb[0].mxu1 }
  0xeb   : > { %v767_v55 = vmul.f32 %v4015_v48, %v4028_v53  ;;  %v4034_v56 = vpop.f32.mrb[2].mxu0  ;;  %v785_v57 = vmul.f32 %v4030_v54, %v4015_v48  ;;  %v4038_v58 = vpop.f32.mrb[1].mxu1 }
  0xec   : > { %v808_v59 = vadd.f32 %v4024_v51, %v769_v52  ;;  %v770_v60 = vmul.f32 %v4034_v56, %v4015_v48  ;;  %v4043_v61 = vpop.f32.mrb[3].mxu0  ;;  %v783_v62 = vmul.f32 %v4015_v48, %v4038_v58  ;;  %v4047_v63 = vpop.f32.mrb[2].mxu1 }
  0xed   : > { %v806_v0 = vadd.f32 %v4024_v51, %v767_v55  ;;  %v768_v1 = vmul.f32 %v4015_v48, %v4043_v61  ;;  %v824_v2 = vadd.f32 %v4024_v51, %v785_v57  ;;  %v786_v3 = vmul.f32 %v4047_v63, %v4015_v48  ;;  %v4055_v4 = vpop.f32.mrb[3].mxu1 }
  0xee   : > { %v840_v5 = vmax.f32 %v808_v59, 0.0  ;;  %v809_v6 = vadd.f32 %v4024_v51, %v770_v60  ;;  %v822_v7 = vadd.f32 %v4024_v51, %v783_v62  ;;  %v784_v8 = vmul.f32 %v4015_v48, %v4055_v4 }
  0xef   : > { %v838_v9 = vmax.f32 %v806_v0, 0.0  ;;  %v807_v10 = vadd.f32 %v4024_v51, %v768_v1  ;;  %v856_v11 = vmax.f32 %v824_v2, 0.0  ;;  %v825_v12 = vadd.f32 %v4024_v51, %v786_v3 }
  0xf0   : > { %919 = vst.msk [vmem:[#allocation2 + $0x31] sm:$0xff] %vm870_vm2, %v840_v5  ;;  %v841_v13 = vmax.f32 %v809_v6, 0.0  ;;  %v854_v14 = vmax.f32 %v822_v7, 0.0  ;;  %v823_v15 = vadd.f32 %v4024_v51, %v784_v8 }
  0xf1   : > { %917 = vst.msk [vmem:[#allocation2 + $0x19] sm:$0xff] %vm870_vm2, %v838_v9  ;;  %v839_v16 = vmax.f32 %v807_v10, 0.0  ;;  %935 = vst.msk [vmem:[#allocation2 + $0xf1] sm:$0xff] %vm870_vm2, %v856_v11  ;;  %v857_v17 = vmax.f32 %v825_v12, 0.0  ;;  %v4067_v18 = vpop.f32.mrb[4].mxu0 }
  0xf2   : > { %920 = vst.msk [vmem:[#allocation2 + $0x39] sm:$0xff] %vm870_vm2, %v841_v13  ;;  %933 = vst.msk [vmem:[#allocation2 + $0xd9] sm:$0xff] %vm870_vm2, %v854_v14  ;;  %v855_v19 = vmax.f32 %v823_v15, 0.0  ;;  %v773_v20 = vmul.f32 %v4067_v18, %v4015_v48  ;;  %v4073_v21 = vpop.f32.mrb[5].mxu0 }
  0xf3   : > { %918 = vst.msk [vmem:[#allocation2 + $0x21] sm:$0xff] %vm870_vm2, %v839_v16  ;;  %936 = vst.msk [vmem:[#allocation2 + $0xf9] sm:$0xff] %vm870_vm2, %v857_v17  ;;  %v771_v22 = vmul.f32 %v4015_v48, %v4073_v21  ;;  %v4079_v23 = vpop.f32.mrb[6].mxu0 }
  0xf4   : > { %934 = vst.msk [vmem:[#allocation2 + $0xe1] sm:$0xff] %vm870_vm2, %v855_v19  ;;  %v812_v26 = vadd.f32 %v4024_v51, %v773_v20  ;;  %v774_v27 = vmul.f32 %v4079_v23, %v4015_v48  ;;  %v4087_v28 = vpop.f32.mrb[7].mxu0 }
  0xf5   : > { %v810_v32 = vadd.f32 %v4024_v51, %v771_v22  ;;  %v772_v33 = vmul.f32 %v4015_v48, %v4087_v28 }
  0xf6   : > { %v844_v35 = vmax.f32 %v812_v26, 0.0  ;;  %v813_v36 = vadd.f32 %v4024_v51, %v774_v27 }
  0xf7   : > { %v1401_v37 = vld [vmem:[#allocation2 + $0x30] sm:$0xff]  ;;  %v842_v38 = vmax.f32 %v810_v32, 0.0  ;;  %v811_v39 = vadd.f32 %v4024_v51, %v772_v33 }
  0xf8   : > { %1467 = vrot.lane.b32.xlu0 %v1401_v37, %s3835_s17  ;;  %v4099_v40 = vld [vmem:[#allocation2 + $0x19] sm:$0xff]  ;;  %923 = vst.msk [vmem:[#allocation2 + $0x61] sm:$0xff] %vm870_vm2, %v844_v35  ;;  %v845_v42 = vmax.f32 %v813_v36, 0.0  ;;  %985 = vst.msk [vmem:[#allocation3 + $0x20] sm:$0xff] %vm870_vm2, %v1401_v37  ;;  %v4105_v43 = vld [vmem:[#allocation2 + $0xf0] sm:$0xff] }
  0xf9   : > { %v4101_v41 = vld [vmem:[#allocation2 + $0x18] sm:$0xff]  ;;  %1081 = vrot.lane.b32.xlu1 %v4099_v40, %s3833_s29  ;;  %921 = vst.msk [vmem:[#allocation2 + $0x49] sm:$0xff] %vm870_vm2, %v842_v38  ;;  %v843_v45 = vmax.f32 %v811_v39, 0.0  ;;  %v4110_v46 = vpop.f32.mrb[8].mxu0  ;;  %1001 = vst.msk [vmem:[#allocation3 + $0xa0] sm:$0xff] %vm870_vm2, %v4105_v43  ;;  %v443_v35 = vld [vmem:[%s3926_s28 + $0xe0] sm:$0xff] }
  0xfa   : > { %v1402_v44 = vld [vmem:[#allocation2 + $0x38] sm:$0xff]  ;;  %983 = vst.msk [vmem:[#allocation3 + $0x10] sm:$0xff] %vm870_vm2, %v4101_v41  ;;  %924 = vst.msk [vmem:[#allocation2 + $0x69] sm:$0xff] %vm870_vm2, %v845_v42  ;;  %v777_v49 = vmul.f32 %v4110_v46, %v4015_v48  ;;  %v4121_v52 = vpop.f32.mrb[9].mxu0  ;;  %v4124_v57 = vld [vmem:[#allocation2 + $0x20] sm:$0xff] }
  0xfb   : > { %v4116_v47 = vld [vmem:[#allocation2 + $0xd8] sm:$0xff]  ;;  %986 = vst.msk [vmem:[#allocation3 + $0x28] sm:$0xff] %vm870_vm2, %v1402_v44  ;;  %922 = vst.msk [vmem:[#allocation2 + $0x51] sm:$0xff] %vm870_vm2, %v843_v45  ;;  %v775_v59 = vmul.f32 %v4015_v48, %v4121_v52  ;;  %v4129_v60 = vpop.f32.mrb[10].mxu0  ;;  %v4134_v62 = vld [vmem:[#allocation2 + $0xe0] sm:$0xff] }
  0xfc   : > { %v1594_v55 = vld [vmem:[#allocation2 + $0x31] sm:$0xff]  ;;  %999 = vst.msk [vmem:[#allocation3 + $0x90] sm:$0xff] %vm870_vm2, %v4116_v47  ;;  %v816_v0 = vadd.f32 %v4024_v51, %v777_v49  ;;  %v778_v1 = vmul.f32 %v4129_v60, %v4015_v48  ;;  %v4139_v2 = vpop.f32.mrb[11].mxu0  ;;  %984 = vst.msk [vmem:[#allocation3 + $0x18] sm:$0xff] %vm870_vm2, %v4124_v57  ;;  %v1595_v12 = vld [vmem:[#allocation2 + $0x39] sm:$0xff] }
  0xfd   : > { %1660 = vrot.lane.b32.xlu0 %v1594_v55, %s3836_s18  ;;  %1469 = vrot.lane.b32.xlu1 %v1402_v44, %s3835_s17  ;;  %v814_v3 = vadd.f32 %v4024_v51, %v775_v59  ;;  %v776_v5 = vmul.f32 %v4015_v48, %v4139_v2  ;;  %1000 = vst.msk [vmem:[#allocation3 + $0x98] sm:$0xff] %vm870_vm2, %v4134_v62  ;;  %v4150_v8 = vld [vmem:[#allocation2 + $0xf8] sm:$0xff]  ;;  %v1016_v27 = vld [vmem:[#allocation2 + $0x21] sm:$0xff] }
  0xfe   : > { %v848_v6 = vmax.f32 %v816_v0, 0.0  ;;  %v817_v7 = vadd.f32 %v4024_v51, %v778_v1  ;;  %1002 = vst.msk [vmem:[#allocation3 + $0xa8] sm:$0xff] %vm870_vm2, %v4150_v8  ;;  %v1788_v19 = vld [vmem:[#allocation2 + $0x3a] sm:$0xff]  ;;  %v1787_v29 = vld [vmem:[#allocation2 + $0x32] sm:$0xff]  ;;  %v1209_v30 = vld [vmem:[#allocation2 + $0x22] sm:$0xff] }
  0xff   : > { %v4152_v9 = vld [vmem:[#allocation2 + $0x60] sm:$0xff]  ;;  %v846_v10 = vmax.f32 %v814_v3, 0.0  ;;  %v815_v11 = vadd.f32 %v4024_v51, %v776_v5  ;;  %v444_v36 = vld [vmem:[%s3926_s28 + $0xe8] sm:$0xff] }
 0x100   : > { %v4158_v13 = vld [vmem:[#allocation2 + $0x48] sm:$0xff]  ;;  %927 = vst.msk [vmem:[#allocation2 + $0x91] sm:$0xff] %vm870_vm2, %v848_v6  ;;  %v849_v14 = vmax.f32 %v817_v7, 0.0  ;;  %989 = vst.msk [vmem:[#allocation3 + $0x40] sm:$0xff] %vm870_vm2, %v4152_v9  ;;  %v2186_v26 = vld [vmem:[#allocation2 + $0xd9] sm:$0xff]  ;;  %v461_v38 = vpack.c.bf16 %v444_v36, %v443_v35 }
 0x101   : > { %2043 = vrot.lane.b32.xlu0 %v1401_v37, %s3837_s19  ;;  %1662 = vrot.lane.b32.xlu1 %v1595_v12, %s3836_s18  ;;  %v4164_v15 = vld [vmem:[#allocation2 + $0x68] sm:$0xff]  ;;  %925 = vst.msk [vmem:[#allocation2 + $0x79] sm:$0xff] %vm870_vm2, %v846_v10  ;;  %v847_v16 = vmax.f32 %v815_v11, 0.0  ;;  %987 = vst.msk [vmem:[#allocation3 + $0x30] sm:$0xff] %vm870_vm2, %v4158_v13  ;;  %v4217_v31 = vpop.f32.mrb[12].mxu0  ;;  %v1208_v33 = vld [vmem:[#allocation2 + $0x1a] sm:$0xff] }
 0x102   : > { %v4169_v17 = vld [vmem:[#allocation2 + $0x50] sm:$0xff]  ;;  %928 = vst.msk [vmem:[#allocation2 + $0x99] sm:$0xff] %vm870_vm2, %v849_v14  ;;  %990 = vst.msk [vmem:[#allocation3 + $0x48] sm:$0xff] %vm870_vm2, %v4164_v15  ;;  %v781_v32 = vmul.f32 %v4217_v31, %v4015_v48  ;;  %v4226_v39 = vpop.f32.mrb[13].mxu0  ;;  %3711 = vmatprep.mubr.msk.bf16.mxu1 %vm464_vm1, %v461_v38  ;;  %v4247_v59 = vld [vmem:[#allocation2 + $0xda] sm:$0xff] }
 0x103   : > { %926 = vst.msk [vmem:[#allocation2 + $0x81] sm:$0xff] %vm870_vm2, %v847_v16  ;;  %988 = vst.msk [vmem:[#allocation3 + $0x38] sm:$0xff] %vm870_vm2, %v4169_v17  ;;  %v779_v42 = vmul.f32 %v4015_v48, %v4226_v39  ;;  %v4235_v45 = vpop.f32.mrb[14].mxu0  ;;  %v2187_v3 = vld [vmem:[#allocation2 + $0xe1] sm:$0xff]  ;;  %v2368_v36 = vld [vmem:[#allocation2 + $0x52] sm:$0xff] }
 0x104   : > { %v820_v34 = vadd.f32 %v4024_v51, %v781_v32  ;;  %v782_v49 = vmul.f32 %v4235_v45, %v4015_v48  ;;  %v4260_v11 = vld [vmem:[#allocation2 + $0xe2] sm:$0xff] }
 0x105   : > { %2236 = vrot.lane.b32.xlu0 %v1594_v55, %s3838_s20  ;;  %1855 = vrot.lane.b32.xlu1 %v1788_v19, %s3839_s23  ;;  %v1791_v32 = vld [vmem:[#allocation2 + $0x62] sm:$0xff] }
 0x106   : > { %v852_v37 = vmax.f32 %v820_v34, 0.0  ;;  %v821_v1 = vadd.f32 %v4024_v51, %v782_v49  ;;  %v3819_v34 = vld [vmem:[%s5572_s4 + $0x20] ss:$0 sps:$4 sm:$0xff]  }
 0x107   : > { %v4179_v20 = vld [vmem:[#allocation2 + $0x90] sm:$0xff]  ;;  %v2693_v35 = vsel %vm2691_vm7, %v3819_v34, 0 }
 0x108   : > { %v4182_v22 = vld [vmem:[#allocation2 + $0x78] sm:$0xff]  ;;  %993 = vst.msk [vmem:[#allocation3 + $0x60] sm:$0xff] %vm870_vm2, %v4179_v20  ;;  %931 = vst.msk [vmem:[#allocation2 + $0xc1] sm:$0xff] %vm870_vm2, %v852_v37  ;;  %v853_v6 = vmax.f32 %v821_v1, 0.0 }
 0x109   : > { %1085 = vrot.lane.b32.xlu0 %v1594_v55, %s3833_s29  ;;  %2045 = vrot.lane.b32.xlu1 %v1402_v44, %s3837_s19  ;;  %v4187_v24 = vld [vmem:[#allocation2 + $0x98] sm:$0xff]  ;;  %991 = vst.msk [vmem:[#allocation3 + $0x50] sm:$0xff] %vm870_vm2, %v4182_v22  ;;  %v4243_v55 = vpop.f32.mrb[15].mxu0 }
 0x10a   : > { %v4191_v25 = vld [vmem:[#allocation2 + $0x80] sm:$0xff]  ;;  %994 = vst.msk [vmem:[#allocation3 + $0x68] sm:$0xff] %vm870_vm2, %v4187_v24  ;;  %932 = vst.msk [vmem:[#allocation2 + $0xc9] sm:$0xff] %vm870_vm2, %v853_v6 }
 0x10b   : > { %992 = vst.msk [vmem:[#allocation3 + $0x58] sm:$0xff] %vm870_vm2, %v4191_v25 }
 0x10d   : > { %1463 = vrot.lane.b32.xlu0 %v4101_v41, %s3835_s17  ;;  %2238 = vrot.lane.b32.xlu1 %v1595_v12, %s3838_s20  ;;  %v446_v41 = vld [vmem:[%s3926_s28 + $0xf8] sm:$0xff] }
 0x10f   : > { %v4256_v10 = vld [vmem:[#allocation2 + $0xc0] sm:$0xff] }
 0x110   : > { %997 = vst.msk [vmem:[#allocation3 + $0x80] sm:$0xff] %vm870_vm2, %v4256_v10 }
 0x111   : > { %1656 = vrot.lane.b32.xlu0 %v4099_v40, %s3836_s18  ;;  %2431 = vrot.lane.b32.xlu1 %v1788_v19, %s3840_s24  ;;  %v445_v40 = vld [vmem:[%s3926_s28 + $0xf0] sm:$0xff]  ;;  %v4271_v14 = vld [vmem:[#allocation2 + $0xc8] sm:$0xff]  ;;  %s5411_s28 = scalar_lea.vmem %s5580_s12, %s3624_s25 }
 0x112   : > { %v462_v44 = vpack.c.bf16 %v446_v41, %v445_v40  ;;  %998 = vst.msk [vmem:[#allocation3 + $0x88] sm:$0xff] %vm870_vm2, %v4271_v14  ;;  %v2367_v40 = vld [vmem:[#allocation2 + $0x4a] sm:$0xff] }
 0x114   : > { %3712 = vmatmul.mubr.msk.bf16.gmra.mrb[12].mxu1 %vm464_vm1, %v462_v44 }
 0x115   : > { %2071 = vrot.lane.b32.xlu0 %v4116_v47, %s3837_s19  ;;  %1087 = vrot.lane.b32.xlu1 %v1595_v12, %s3833_s29  ;;  %v818_v47 = vadd.f32 %v4024_v51, %v779_v42  ;;  %v1598_v12 = vld [vmem:[#allocation2 + $0x61] sm:$0xff] }
 0x117   : > { %v850_v0 = vmax.f32 %v818_v47, 0.0 }
 0x119   : > { %2264 = vrot.lane.b32.xlu0 %v2186_v26, %s3838_s20  ;;  %1280 = vrot.lane.b32.xlu1 %v1788_v19, %s3834_s30  ;;  %929 = vst.msk [vmem:[#allocation2 + $0xa9] sm:$0xff] %vm870_vm2, %v850_v0  ;;  %v1602_v0 = vld [vmem:[#allocation2 + $0x91] sm:$0xff] }
 0x11d   : > { %1113 = vrot.lane.b32.xlu0 %v2186_v26, %s3833_s29  ;;  %1083 = vrot.lane.b32.xlu1 %v1016_v27, %s3833_s29  ;;  %v1792_v26 = vld [vmem:[#allocation2 + $0x6a] sm:$0xff] }
 0x120   : > { %v4275_v16 = vld [vmem:[#allocation2 + $0xa8] sm:$0xff] }
 0x121   : > { %1853 = vrot.lane.b32.xlu0 %v1787_v29, %s3839_s23  ;;  %1276 = vrot.lane.b32.xlu1 %v1209_v30, %s3834_s30  ;;  %995 = vst.msk [vmem:[#allocation3 + $0x70] sm:$0xff] %vm870_vm2, %v4275_v16 }
 0x125   : > { %2429 = vrot.lane.b32.xlu0 %v1787_v29, %s3840_s24  ;;  %1465 = vrot.lane.b32.xlu1 %v4124_v57, %s3835_s17  ;;  %v780_v57 = vmul.f32 %v4015_v48, %v4243_v55 }
 0x127   : > { %v819_v5 = vadd.f32 %v4024_v51, %v780_v57 }
 0x129   : > { %1278 = vrot.lane.b32.xlu0 %v1787_v29, %s3834_s30  ;;  %1658 = vrot.lane.b32.xlu1 %v1016_v27, %s3836_s18  ;;  %v851_v7 = vmax.f32 %v819_v5, 0.0  ;;  %v2174_v27 = vld [vmem:[#allocation2 + $0x49] sm:$0xff]  ;;  %v3815_v29 = vld [vmem:[%s5572_s4] sm:$0xff]  }
 0x12a   : > { %3715 = vmatprep.subr.bf16.mxu1 %v3815_v29 }
 0x12b   : > { %930 = vst.msk [vmem:[#allocation2 + $0xb1] sm:$0xff] %vm870_vm2, %v851_v7  ;;  %3716 = vmatpush3.bf16.msra.mxu1 %v3815_v29  ;;  %v4375_v29 = vpop.f32.mrb[4].mxu1 }
 0x12c   : > { %5590 = vst [vmem:[#allocation4_spill] sm:$0xff] %v4375_v29 }
 0x12d   : > { %1274 = vrot.lane.b32.xlu0 %v1208_v33, %s3834_s30  ;;  %1851 = vrot.lane.b32.xlu1 %v1209_v30, %s3839_s23  ;;  %v3817_v30 = vld [vmem:[%s5572_s4 + $0x10] sm:$0xff]  }
 0x131   : > { %1849 = vrot.lane.b32.xlu0 %v1208_v33, %s3839_s23  ;;  %2073 = vrot.lane.b32.xlu1 %v4134_v62, %s3837_s19  ;;  %v2175_v33 = vld [vmem:[#allocation2 + $0x51] sm:$0xff] }
 0x132   : > { %v4277_v19 = vld [vmem:[#allocation2 + $0xb0] sm:$0xff] }
 0x133   : > { %996 = vst.msk [vmem:[#allocation3 + $0x78] sm:$0xff] %vm870_vm2, %v4277_v19 }
 0x135   : > { %2457 = vrot.lane.b32.xlu0 %v4247_v59, %s3840_s24  ;;  %2266 = vrot.lane.b32.xlu1 %v2187_v3, %s3838_s20 }
 0x139   : > { %1475 = vrot.lane.b32.xlu0 %v4152_v9, %s3835_s17  ;;  %2459 = vrot.lane.b32.xlu1 %v4260_v11, %s3840_s24 }
 0x13d   : > { %1668 = vrot.lane.b32.xlu0 %v1598_v12, %s3836_s18  ;;  %1115 = vrot.lane.b32.xlu1 %v2187_v3, %s3833_s29 }
 0x141   : > { %2051 = vrot.lane.b32.xlu0 %v4152_v9, %s3837_s19  ;;  %1477 = vrot.lane.b32.xlu1 %v4164_v15, %s3835_s17  ;;  %v1599_v9 = vld [vmem:[#allocation2 + $0x69] sm:$0xff] }
 0x145   : > { %2244 = vrot.lane.b32.xlu0 %v1598_v12, %s3838_s20  ;;  %1670 = vrot.lane.b32.xlu1 %v1599_v9, %s3836_s18 }
 0x149   : > { %1093 = vrot.lane.b32.xlu0 %v1598_v12, %s3833_s29  ;;  %1863 = vrot.lane.b32.xlu1 %v1792_v26, %s3839_s23  ;;  %v1603_v12 = vld [vmem:[#allocation2 + $0x99] sm:$0xff] }
 0x14d   : > { %2047 = vrot.lane.b32.xlu0 %v4158_v13, %s3837_s19  ;;  %2053 = vrot.lane.b32.xlu1 %v4164_v15, %s3837_s19  ;;  %v3816_v15 = vld [vmem:[%s5572_s4 + $0x8] sm:$0xff]  }
 0x14e   : > { %3717 = vmatprep.subr.bf16.mxu1 %v3816_v15 }
 0x14f   : > { %3718 = vmatpush3.bf16.msra.mxu1 %v3816_v15 }
 0x150   : > { %3719 = vmatprep.subr.bf16.mxu1 %v3817_v30 }
 0x151   : > { %2240 = vrot.lane.b32.xlu0 %v2174_v27, %s3838_s20  ;;  %2246 = vrot.lane.b32.xlu1 %v1599_v9, %s3838_s20 }
 0x153   : > { %3720 = vmatpush3.bf16.msra.mxu1 %v3817_v30  ;;  %v789_v30 = vmul.f32 %v4375_v29, %v4015_v48 }
 0x155   : > { %1089 = vrot.lane.b32.xlu0 %v2174_v27, %s3833_s29  ;;  %2439 = vrot.lane.b32.xlu1 %v1792_v26, %s3840_s24 }
 0x159   : > { %1471 = vrot.lane.b32.xlu0 %v4158_v13, %s3835_s17  ;;  %1095 = vrot.lane.b32.xlu1 %v1599_v9, %s3833_s29  ;;  %v3818_v13 = vld [vmem:[%s5572_s4 + $0x18] sm:$0xff]  }
 0x15a   : > { %3721 = vmatprep.subr.bf16.mxu1 %v3818_v13 }
 0x15b   : > { %3722 = vmatpush3.bf16.msra.mxu1 %v3818_v13 }
 0x15c   : > { %3795 = vmatprep.subr.msk.bf16.mxu1 %vm2691_vm7, %v3819_v34 }
 0x15d   : > { %1664 = vrot.lane.b32.xlu0 %v2174_v27, %s3836_s18  ;;  %1288 = vrot.lane.b32.xlu1 %v1792_v26, %s3834_s30 }
 0x15f   : > { %3724 = vmatpush3.bf16.msra.mxu1 %v2693_v35 }
 0x161   : > { %1861 = vrot.lane.b32.xlu0 %v1791_v32, %s3839_s23  ;;  %2049 = vrot.lane.b32.xlu1 %v4169_v17, %s3837_s19 }
 0x165   : > { %2437 = vrot.lane.b32.xlu0 %v1791_v32, %s3840_s24  ;;  %2242 = vrot.lane.b32.xlu1 %v2175_v33, %s3838_s20 }
 0x169   : > { %1286 = vrot.lane.b32.xlu0 %v1791_v32, %s3834_s30  ;;  %2435 = vrot.lane.b32.xlu1 %v2368_v36, %s3840_s24  ;;  %v4379_v32 = vpop.f32.mrb[5].mxu1 }
 0x16a   : > { %v4326_v37 = vpop.permute.xlu0 %1467  ;;  %5591 = vst [vmem:[#allocation5_spill] sm:$0xff] %v4379_v32  ;;  %v787_v13 = vmul.f32 %v4015_v48, %v4379_v32  ;;  %v4389_v34 = vpop.f32.mrb[6].mxu1 }
 0x16b   : > { %v1082_v38 = vpop.permute.xlu1 %1081  ;;  %5592 = vst [vmem:[#allocation6_spill] sm:$0xff] %v4389_v34 }
 0x16c   : > { %1176 = vst.msk [vmem:[#allocation3 + $0x10] sm:$0xff] %vm1173_vm5, %v1082_v38  ;;  %v790_v38 = vmul.f32 %v4389_v34, %v4015_v48  ;;  %v2182_v34 = vld [vmem:[#allocation2 + $0xa9] sm:$0xff] }
 0x16d   : > { %2433 = vrot.lane.b32.xlu0 %v2367_v40, %s3840_s24  ;;  %1091 = vrot.lane.b32.xlu1 %v2175_v33, %s3833_s29 }
 0x16f   : > { %v4331_v41 = vpop.permute.xlu0 %1660  ;;  %v4333_v42 = vpop.permute.xlu1 %1469 }
 0x171   : > { %1282 = vrot.lane.b32.xlu0 %v2367_v40, %s3834_s30  ;;  %1284 = vrot.lane.b32.xlu1 %v2368_v36, %s3834_s30 }
 0x173   : > { %v4337_v44 = vpop.permute.xlu0 %2043  ;;  %v4339_v47 = vpop.permute.xlu1 %1662 }
 0x175   : > { %1857 = vrot.lane.b32.xlu0 %v2367_v40, %s3839_s23  ;;  %1473 = vrot.lane.b32.xlu1 %v4169_v17, %s3835_s17 }
 0x177   : > { %v4344_v49 = vpop.permute.xlu0 %2236  ;;  %v4346_v57 = vpop.permute.xlu1 %1855 }
 0x179   : > { %1483 = vrot.lane.b32.xlu0 %v4179_v20, %s3835_s17  ;;  %1666 = vrot.lane.b32.xlu1 %v2175_v33, %s3836_s18  ;;  %v828_v33 = vadd.f32 %v4024_v51, %v789_v30 }
 0x17b   : > { %v1086_v1 = vpop.permute.xlu0 %1085  ;;  %v4352_v3 = vpop.permute.xlu1 %2045 }
 0x17c   : > { %1178 = vst.msk [vmem:[#allocation3 + $0x20] sm:$0xff] %vm1173_vm5, %v1086_v1  ;;  %v860_v1 = vmax.f32 %v828_v33, 0.0 }
 0x17d   : > { %1676 = vrot.lane.b32.xlu0 %v1602_v0, %s3836_s18  ;;  %1859 = vrot.lane.b32.xlu1 %v2368_v36, %s3839_s23  ;;  %v826_v36 = vadd.f32 %v4024_v51, %v787_v13 }
 0x17e   : > { %939 = vst.msk [vmem:[#allocation2 + $0x121] sm:$0xff] %vm870_vm2, %v860_v1 }
 0x17f   : > { %v1464_v17 = vpop.permute.xlu0 %1463  ;;  %v4357_v5 = vpop.permute.xlu1 %2238 }
 0x180   : > { %1560 = vst.msk [vmem:[#allocation3] sm:$0xff] %vm1559_vm8, %v1464_v17  ;;  %v4395_v17 = vpop.f32.mrb[7].mxu1 }
 0x181   : > { %2059 = vrot.lane.b32.xlu0 %v4179_v20, %s3837_s19  ;;  %1485 = vrot.lane.b32.xlu1 %v4187_v24, %s3835_s17  ;;  %v1796_v20 = vld [vmem:[#allocation2 + $0x9a] sm:$0xff]  ;;  %5593 = vst [vmem:[#allocation7_spill] sm:$0xff] %v4395_v17 }
 0x183   : > { %v1657_v6 = vpop.permute.xlu0 %1656  ;;  %v4364_v7 = vpop.permute.xlu1 %2431 }
 0x184   : > { %1753 = vst.msk [vmem:[#allocation3] sm:$0xff] %vm1752_vm9, %v1657_v6  ;;  %v829_v6 = vadd.f32 %v4024_v51, %v790_v38 }
 0x185   : > { %2252 = vrot.lane.b32.xlu0 %v1602_v0, %s3838_s20  ;;  %1678 = vrot.lane.b32.xlu1 %v1603_v12, %s3836_s18 }
 0x186   : > { %v861_v30 = vmax.f32 %v829_v6, 0.0 }
 0x187   : > { %v4368_v9 = vpop.permute.xlu0 %2071  ;;  %v1088_v26 = vpop.permute.xlu1 %1087 }
 0x188   : > { %1179 = vst.msk [vmem:[#allocation3 + $0x28] sm:$0xff] %vm1173_vm5, %v1088_v26  ;;  %v788_v26 = vmul.f32 %v4015_v48, %v4395_v17 }
 0x189   : > { %1101 = vrot.lane.b32.xlu0 %v1602_v0, %s3833_s29  ;;  %1871 = vrot.lane.b32.xlu1 %v1796_v20, %s3839_s23  ;;  %v2178_v0 = vld [vmem:[#allocation2 + $0x79] sm:$0xff]  ;;  %940 = vst.msk [vmem:[#allocation2 + $0x129] sm:$0xff] %vm870_vm2, %v861_v30 }
 0x18a   : > { %v827_v13 = vadd.f32 %v4024_v51, %v788_v26  ;;  %v2371_v26 = vld [vmem:[#allocation2 + $0x7a] sm:$0xff] }
 0x18b   : > { %v4373_v27 = vpop.permute.xlu0 %2264  ;;  %v1281_v15 = vpop.permute.xlu1 %1280 }
 0x18c   : > { %1372 = vst.msk [vmem:[#allocation3 + $0x28] sm:$0xff] %vm1366_vm6, %v1281_v15 }
 0x18d   : > { %2055 = vrot.lane.b32.xlu0 %v4182_v22, %s3837_s19  ;;  %2061 = vrot.lane.b32.xlu1 %v4187_v24, %s3837_s19  ;;  %v858_v24 = vmax.f32 %v826_v36, 0.0 }
 0x18f   : > { %v1114_v35 = vpop.permute.xlu0 %1113  ;;  %v1084_v40 = vpop.permute.xlu1 %1083  ;;  %937 = vst.msk [vmem:[#allocation2 + $0x109] sm:$0xff] %vm870_vm2, %v858_v24  ;;  %v2372_v24 = vld [vmem:[#allocation2 + $0x82] sm:$0xff] }
 0x190   : > { %1192 = vst.msk [vmem:[#allocation3 + $0x90] sm:$0xff] %vm1173_vm5, %v1114_v35  ;;  %1177 = vst.msk [vmem:[#allocation3 + $0x18] sm:$0xff] %vm1173_vm5, %v1084_v40  ;;  %v859_v35 = vmax.f32 %v827_v13, 0.0 }
 0x191   : > { %2248 = vrot.lane.b32.xlu0 %v2178_v0, %s3838_s20  ;;  %2254 = vrot.lane.b32.xlu1 %v1603_v12, %s3838_s20 }
 0x192   : > { %938 = vst.msk [vmem:[#allocation2 + $0x111] sm:$0xff] %vm870_vm2, %v859_v35 }
 0x193   : > { %v1854_v15 = vpop.permute.xlu0 %1853  ;;  %v1277_v33 = vpop.permute.xlu1 %1276 }
 0x194   : > { %1370 = vst.msk [vmem:[#allocation3 + $0x18] sm:$0xff] %vm1366_vm6, %v1277_v33 }
 0x195   : > { %1097 = vrot.lane.b32.xlu0 %v2178_v0, %s3833_s29  ;;  %1563 = vst.msk [vmem:[#allocation3 + $0x18] sm:$0xff] %vm1559_vm8, %v4333_v42  ;;  %2447 = vrot.lane.b32.xlu1 %v1796_v20, %s3840_s24 }
 0x196   : > { %1756 = vst.msk [vmem:[#allocation3 + $0x18] sm:$0xff] %vm1752_vm9, %v4339_v47  ;;  %v4421_v42 = vld [vmem:[#allocation2 + $0x108] sm:$0xff] }
 0x197   : > { %v2430_v36 = vpop.permute.xlu0 %2429  ;;  %v1466_v38 = vpop.permute.xlu1 %1465  ;;  %1949 = vst.msk [vmem:[#allocation3 + $0x18] sm:$0xff] %vm1945_vm10, %v4346_v57 }
 0x198   : > { %1561 = vst.msk [vmem:[#allocation3 + $0x8] sm:$0xff] %vm1559_vm8, %v1466_v38 }
 0x199   : > { %1479 = vrot.lane.b32.xlu0 %v4182_v22, %s3835_s17  ;;  %1103 = vrot.lane.b32.xlu1 %v1603_v12, %s3833_s29  ;;  %1003 = vst.msk [vmem:[#allocation3 + $0xb0] sm:$0xff] %vm870_vm2, %v4421_v42  ;;  %v1795_v12 = vld [vmem:[#allocation2 + $0x92] sm:$0xff] }
 0x19a   : > { %v4430_v1 = vld [vmem:[#allocation2 + $0x110] sm:$0xff] }
 0x19b   : > { %v1279_v40 = vpop.permute.xlu0 %1278  ;;  %v1659_v47 = vpop.permute.xlu1 %1658  ;;  %1004 = vst.msk [vmem:[#allocation3 + $0xb8] sm:$0xff] %vm870_vm2, %v4430_v1 }
 0x19c   : > { %1371 = vst.msk [vmem:[#allocation3 + $0x20] sm:$0xff] %vm1366_vm6, %v1279_v40 }
 0x19d   : > { %1754 = vst.msk [vmem:[#allocation3 + $0x8] sm:$0xff] %vm1752_vm9, %v1659_v47  ;;  %1672 = vrot.lane.b32.xlu0 %v2178_v0, %s3836_s18  ;;  %1296 = vrot.lane.b32.xlu1 %v1796_v20, %s3834_s30  ;;  %v4436_v0 = vld [vmem:[#allocation2 + $0x120] sm:$0xff] }
 0x19e   : > { %1005 = vst.msk [vmem:[#allocation3 + $0xc0] sm:$0xff] %vm870_vm2, %v4436_v0  ;;  %v1606_v47 = vld [vmem:[#allocation2 + $0xc1] sm:$0xff] }
 0x19f   : > { %v1275_v57 = vpop.permute.xlu0 %1274  ;;  %v1852_v22 = vpop.permute.xlu1 %1851 }
 0x1a0   : > { %1369 = vst.msk [vmem:[#allocation3 + $0x10] sm:$0xff] %vm1366_vm6, %v1275_v57 }
 0x1a1   : > { %1562 = vst.msk [vmem:[#allocation3 + $0x10] sm:$0xff] %vm1559_vm8, %v4326_v37  ;;  %1869 = vrot.lane.b32.xlu0 %v1795_v12, %s3839_s23  ;;  %2057 = vrot.lane.b32.xlu1 %v4191_v25, %s3837_s19  ;;  %v4446_v37 = vld [vmem:[#allocation2 + $0x128] sm:$0xff] }
 0x1a2   : > { %1947 = vst.msk [vmem:[#allocation3 + $0x8] sm:$0xff] %vm1945_vm10, %v1852_v22 }
 0x1a3   : > { %1755 = vst.msk [vmem:[#allocation3 + $0x10] sm:$0xff] %vm1752_vm9, %v4331_v41  ;;  %v1850_v20 = vpop.permute.xlu0 %1849  ;;  %v4458_v41 = vpop.permute.xlu1 %2073 }
 0x1a4   : > { %2141 = vst.msk [vmem:[#allocation3 + $0x8] sm:$0xff] %vm2139_vm11, %v4352_v3  ;;  %v2179_v3 = vld [vmem:[#allocation2 + $0x81] sm:$0xff] }
 0x1a5   : > { %2334 = vst.msk [vmem:[#allocation3 + $0x8] sm:$0xff] %vm2332_vm12, %v4357_v5  ;;  %2445 = vrot.lane.b32.xlu0 %v1795_v12, %s3840_s24  ;;  %2250 = vrot.lane.b32.xlu1 %v2179_v3, %s3838_s20 }
 0x1a6   : > { %1948 = vst.msk [vmem:[#allocation3 + $0x10] sm:$0xff] %vm1945_vm10, %v1854_v15  ;;  %1946 = vst.msk [vmem:[#allocation3] sm:$0xff] %vm1945_vm10, %v1850_v20 }
 0x1a7   : > { %1006 = vst.msk [vmem:[#allocation3 + $0xc8] sm:$0xff] %vm870_vm2, %v4446_v37  ;;  %v4467_v5 = vpop.permute.xlu0 %2457 }
 0x1a8   : > { %2527 = vst.msk [vmem:[#allocation3 + $0x8] sm:$0xff] %vm2525_vm13, %v4364_v7  ;;  %v4469_v7 = vpop.permute.xlu1 %2266 }
 0x1a9   : > { %2140 = vst.msk [vmem:[#allocation3] sm:$0xff] %vm2139_vm11, %v4337_v44  ;;  %1294 = vrot.lane.b32.xlu0 %v1795_v12, %s3834_s30  ;;  %2443 = vrot.lane.b32.xlu1 %v2372_v24, %s3840_s24 }
 0x1aa   : > { %2333 = vst.msk [vmem:[#allocation3] sm:$0xff] %vm2332_vm12, %v4344_v49 }
 0x1ab   : > { %2526 = vst.msk [vmem:[#allocation3] sm:$0xff] %vm2525_vm13, %v2430_v36  ;;  %v4473_v44 = vpop.permute.xlu0 %1475 }
 0x1ac   : > { %v4475_v6 = vpop.permute.xlu1 %2459 }
 0x1ad   : > { %2441 = vrot.lane.b32.xlu0 %v2371_v26, %s3840_s24  ;;  %1099 = vrot.lane.b32.xlu1 %v2179_v3, %s3833_s29 }
 0x1af   : > { %v2559_v15 = vld [vmem:[#allocation3 + $0x8] sm:$0xff]  ;;  %v4479_v30 = vpop.permute.xlu0 %1668 }
 0x1b0   : > { %v1116_v33 = vpop.permute.xlu1 %1115 }
 0x1b1   : > { %1193 = vst.msk [vmem:[#allocation3 + $0x98] sm:$0xff] %vm1173_vm5, %v1116_v33  ;;  %1290 = vrot.lane.b32.xlu0 %v2371_v26, %s3834_s30  ;;  %1292 = vrot.lane.b32.xlu1 %v2372_v24, %s3834_s30 }
 0x1b2   : > { %v2558_v49 = vld [vmem:[#allocation3] sm:$0xff] }
 0x1b3   : > { %v2590_v13 = vpack.c.bf16 %v2559_v15, %v2558_v49  ;;  %v4485_v35 = vpop.permute.xlu0 %2051 }
 0x1b4   : > { %v4487_v36 = vpop.permute.xlu1 %1477 }
 0x1b5   : > { %3725 = vmatprep.mubr.msk.bf16.mxu1 %vm2642_vm14, %v2590_v13  ;;  %1865 = vrot.lane.b32.xlu0 %v2371_v26, %s3839_s23  ;;  %v1607_v26 = vld [vmem:[#allocation2 + $0xc9] sm:$0xff]  ;;  %v4524_v13 = vpop.f32.mrb[8].mxu1 }
 0x1b6   : > { %1481 = vrot.lane.b32.xlu1 %v4191_v25, %s3835_s17  ;;  %5594 = vst [vmem:[#allocation8_spill] sm:$0xff] %v4524_v13 }
 0x1b7   : > { %v4492_v38 = vpop.permute.xlu0 %2244 }
 0x1b8   : > { %v4494_v40 = vpop.permute.xlu1 %1670 }
 0x1b9   : > { %1491 = vrot.lane.b32.xlu0 %v4256_v10, %s3835_s17 }
 0x1ba   : > { %1674 = vrot.lane.b32.xlu1 %v2179_v3, %s3836_s18 }
 0x1bb   : > { %v1094_v57 = vpop.permute.xlu0 %1093 }
 0x1bc   : > { %1182 = vst.msk [vmem:[#allocation3 + $0x40] sm:$0xff] %vm1173_vm5, %v1094_v57  ;;  %v4500_v22 = vpop.permute.xlu1 %1863  ;;  %v793_v57 = vmul.f32 %v4524_v13, %v4015_v48 }
 0x1bd   : > { %1684 = vrot.lane.b32.xlu0 %v1606_v47, %s3836_s18 }
 0x1be   : > { %1867 = vrot.lane.b32.xlu1 %v2372_v24, %s3839_s23 }
 0x1bf   : > { %v2048_v25 = vpop.permute.xlu0 %2047 }
 0x1c0   : > { %2142 = vst.msk [vmem:[#allocation3 + $0x10] sm:$0xff] %vm2139_vm11, %v2048_v25  ;;  %v4505_v12 = vpop.permute.xlu1 %2053  ;;  %v4529_v25 = vpop.f32.mrb[9].mxu1 }
 0x1c1   : > { %2067 = vrot.lane.b32.xlu0 %v4256_v10, %s3837_s19  ;;  %v4520_v10 = vld [vmem:[#allocation2 + $0xca] sm:$0xff]  ;;  %5595 = vst [vmem:[#allocation9_spill] sm:$0xff] %v4529_v25 }
 0x1c2   : > { %1493 = vrot.lane.b32.xlu1 %v4271_v14, %s3835_s17 }
 0x1c3   : > { %v2241_v20 = vpop.permute.xlu0 %2240 }
 0x1c4   : > { %2335 = vst.msk [vmem:[#allocation3 + $0x10] sm:$0xff] %vm2332_vm12, %v2241_v20  ;;  %v4512_v3 = vpop.permute.xlu1 %2246  ;;  %v832_v20 = vadd.f32 %v4024_v51, %v793_v57 }
 0x1c5   : > { %2260 = vrot.lane.b32.xlu0 %v1606_v47, %s3838_s20 }
 0x1c6   : > { %1686 = vrot.lane.b32.xlu1 %v1607_v26, %s3836_s18  ;;  %v864_v32 = vmax.f32 %v832_v20, 0.0 }
 0x1c7   : > { %v1090_v24 = vpop.permute.xlu0 %1089 }
 0x1c8   : > { %1180 = vst.msk [vmem:[#allocation3 + $0x30] sm:$0xff] %vm1173_vm5, %v1090_v24  ;;  %v4517_v49 = vpop.permute.xlu1 %2439  ;;  %v4539_v24 = vpop.f32.mrb[10].mxu1 }
 0x1c9   : > { %1109 = vrot.lane.b32.xlu0 %v1606_v47, %s3833_s29  ;;  %v791_v47 = vmul.f32 %v4015_v48, %v4529_v25  ;;  %5596 = vst [vmem:[#allocation10_spill] sm:$0xff] %v4539_v24  ;;  %v794_v29 = vmul.f32 %v4539_v24, %v4015_v48  ;;  %v4545_v17 = vpop.f32.mrb[11].mxu1  ;;  %943 = vst.msk [vmem:[#allocation2 + $0x151] sm:$0xff] %vm870_vm2, %v864_v32 }
 0x1ca   : > { %1879 = vrot.lane.b32.xlu1 %v4520_v10, %s3839_s23 }
 0x1cb   : > { %v1472_v15 = vpop.permute.xlu0 %1471  ;;  %v830_v13 = vadd.f32 %v4024_v51, %v791_v47  ;;  %v833_v57 = vadd.f32 %v4024_v51, %v794_v29  ;;  %v792_v47 = vmul.f32 %v4015_v48, %v4545_v17 }
 0x1cc   : > { %1564 = vst.msk [vmem:[#allocation3 + $0x20] sm:$0xff] %vm1559_vm8, %v1472_v15  ;;  %v1096_v33 = vpop.permute.xlu1 %1095 }
 0x1cd   : > { %1183 = vst.msk [vmem:[#allocation3 + $0x48] sm:$0xff] %vm1173_vm5, %v1096_v33  ;;  %2063 = vrot.lane.b32.xlu0 %v4275_v16, %s3837_s19  ;;  %v865_v20 = vmax.f32 %v833_v57, 0.0  ;;  %v831_v24 = vadd.f32 %v4024_v51, %v792_v47 }
 0x1ce   : > { %2069 = vrot.lane.b32.xlu1 %v4271_v14, %s3837_s19  ;;  %v862_v14 = vmax.f32 %v830_v13, 0.0 }
 0x1cf   : > { %v1665_v15 = vpop.permute.xlu0 %1664  ;;  %944 = vst.msk [vmem:[#allocation2 + $0x159] sm:$0xff] %vm870_vm2, %v865_v20  ;;  %v863_v29 = vmax.f32 %v831_v24, 0.0 }
 0x1d0   : > { %1757 = vst.msk [vmem:[#allocation3 + $0x20] sm:$0xff] %vm1752_vm9, %v1665_v15  ;;  %v1289_v33 = vpop.permute.xlu1 %1288  ;;  %v4580_v57 = vld [vmem:[#allocation2 + $0x150] sm:$0xff] }
 0x1d1   : > { %1376 = vst.msk [vmem:[#allocation3 + $0x48] sm:$0xff] %vm1366_vm6, %v1289_v33  ;;  %2256 = vrot.lane.b32.xlu0 %v2182_v34, %s3838_s20 }
 0x1d2   : > { %2262 = vrot.lane.b32.xlu1 %v1607_v26, %s3838_s20  ;;  %941 = vst.msk [vmem:[#allocation2 + $0x139] sm:$0xff] %vm870_vm2, %v862_v14  ;;  %942 = vst.msk [vmem:[#allocation2 + $0x141] sm:$0xff] %vm870_vm2, %v863_v29  ;;  %v2183_v14 = vld [vmem:[#allocation2 + $0xb1] sm:$0xff] }
 0x1d3   : > { %v1862_v15 = vpop.permute.xlu0 %1861  ;;  %1009 = vst.msk [vmem:[#allocation3 + $0xe0] sm:$0xff] %vm870_vm2, %v4580_v57  ;;  %v2376_v29 = vld [vmem:[#allocation2 + $0xb2] sm:$0xff] }
 0x1d4   : > { %v2050_v25 = vpop.permute.xlu1 %2049 }
 0x1d5   : > { %2143 = vst.msk [vmem:[#allocation3 + $0x18] sm:$0xff] %vm2139_vm11, %v2050_v25  ;;  %1105 = vrot.lane.b32.xlu0 %v2182_v34, %s3833_s29 }
 0x1d6   : > { %2455 = vrot.lane.b32.xlu1 %v4520_v10, %s3840_s24 }
 0x1d7   : > { %v2438_v48 = vpop.permute.xlu0 %2437 }
 0x1d8   : > { %v2243_v32 = vpop.permute.xlu1 %2242 }
 0x1d9   : > { %2336 = vst.msk [vmem:[#allocation3 + $0x18] sm:$0xff] %vm2332_vm12, %v2243_v32  ;;  %1487 = vrot.lane.b32.xlu0 %v4275_v16, %s3835_s17  ;;  %v4566_v51 = vld [vmem:[#allocation2 + $0x138] sm:$0xff]  ;;  %v4576_v33 = vld [vmem:[#allocation2 + $0x140] sm:$0xff] }
 0x1da   : > { %1111 = vrot.lane.b32.xlu1 %v1607_v26, %s3833_s29  ;;  %1007 = vst.msk [vmem:[#allocation3 + $0xd0] sm:$0xff] %vm870_vm2, %v4566_v51  ;;  %v1799_v26 = vld [vmem:[#allocation2 + $0xc2] sm:$0xff]  ;;  %1008 = vst.msk [vmem:[#allocation3 + $0xd8] sm:$0xff] %vm870_vm2, %v4576_v33 }
 0x1db   : > { %v1287_v13 = vpop.permute.xlu0 %1286 }
 0x1dc   : > { %1375 = vst.msk [vmem:[#allocation3 + $0x40] sm:$0xff] %vm1366_vm6, %v1287_v13  ;;  %v2436_v25 = vpop.permute.xlu1 %2435 }
 0x1dd   : > { %2529 = vst.msk [vmem:[#allocation3 + $0x18] sm:$0xff] %vm2525_vm13, %v2436_v25  ;;  %1680 = vrot.lane.b32.xlu0 %v2182_v34, %s3836_s18  ;;  %v4585_v34 = vld [vmem:[#allocation2 + $0x158] sm:$0xff] }
 0x1de   : > { %2065 = vrot.lane.b32.xlu1 %v4277_v19, %s3837_s19  ;;  %1010 = vst.msk [vmem:[#allocation3 + $0xe8] sm:$0xff] %vm870_vm2, %v4585_v34 }
 0x1df   : > { %v2434_v24 = vpop.permute.xlu0 %2433 }
 0x1e0   : > { %2528 = vst.msk [vmem:[#allocation3 + $0x10] sm:$0xff] %vm2525_vm13, %v2434_v24  ;;  %v1092_v16 = vpop.permute.xlu1 %1091 }
 0x1e1   : > { %1181 = vst.msk [vmem:[#allocation3 + $0x38] sm:$0xff] %vm1173_vm5, %v1092_v16  ;;  %1877 = vrot.lane.b32.xlu0 %v1799_v26, %s3839_s23 }
 0x1e2   : > { %2258 = vrot.lane.b32.xlu1 %v2183_v14, %s3838_s20 }
 0x1e3   : > { %v1283_v47 = vpop.permute.xlu0 %1282 }
 0x1e4   : > { %1373 = vst.msk [vmem:[#allocation3 + $0x30] sm:$0xff] %vm1366_vm6, %v1283_v47  ;;  %v1285_v20 = vpop.permute.xlu1 %1284  ;;  %v2561_v13 = vld [vmem:[#allocation3 + $0x18] sm:$0xff]  ;;  %v1415_v47 = vld [vmem:[#allocation2 + $0xd8] sm:$0xff] }
 0x1e5   : > { %1566 = vst.msk [vmem:[#allocation3 + $0x30] sm:$0xff] %vm1559_vm8, %v4473_v44  ;;  %2453 = vrot.lane.b32.xlu0 %v1799_v26, %s3840_s24 }
 0x1e6   : > { %1374 = vst.msk [vmem:[#allocation3 + $0x38] sm:$0xff] %vm1366_vm6, %v1285_v20  ;;  %2451 = vrot.lane.b32.xlu1 %v2376_v29, %s3840_s24 }
 0x1e7   : > { %1759 = vst.msk [vmem:[#allocation3 + $0x30] sm:$0xff] %vm1752_vm9, %v4479_v30  ;;  %v1858_v32 = vpop.permute.xlu0 %1857  ;;  %v2560_v44 = vld [vmem:[#allocation3 + $0x10] sm:$0xff]  ;;  %v2375_v30 = vld [vmem:[#allocation2 + $0xaa] sm:$0xff] }
 0x1e8   : > { %1567 = vst.msk [vmem:[#allocation3 + $0x38] sm:$0xff] %vm1559_vm8, %v4487_v36  ;;  %v1474_v25 = vpop.permute.xlu1 %1473  ;;  %v2591_v24 = vpack.c.bf16 %v2561_v13, %v2560_v44  ;;  %v4669_v13 = vld [vmem:[#allocation2 + $0xf1] sm:$0xff] }
 0x1e9   : > { %1760 = vst.msk [vmem:[#allocation3 + $0x38] sm:$0xff] %vm1752_vm9, %v4494_v40  ;;  %2449 = vrot.lane.b32.xlu0 %v2375_v30, %s3840_s24 }
 0x1ea   : > { %1952 = vst.msk [vmem:[#allocation3 + $0x30] sm:$0xff] %vm1945_vm10, %v1862_v15  ;;  %1953 = vst.msk [vmem:[#allocation3 + $0x38] sm:$0xff] %vm1945_vm10, %v4500_v22  ;;  %3726 = vmatmul.mubr.msk.bf16.vlgmr.msra.gmra.mrb[16].mxu1 %vm2642_vm14, %v2591_v24  ;;  %1107 = vrot.lane.b32.xlu1 %v2183_v14, %s3833_s29 }
 0x1eb   : > { %1950 = vst.msk [vmem:[#allocation3 + $0x20] sm:$0xff] %vm1945_vm10, %v1858_v32  ;;  %v4616_v36 = vpop.permute.xlu0 %1483  ;;  %v1608_v32 = vld [vmem:[#allocation2 + $0xd9] sm:$0xff] }
 0x1ec   : > { %2144 = vst.msk [vmem:[#allocation3 + $0x20] sm:$0xff] %vm2139_vm11, %v4485_v35  ;;  %v1667_v40 = vpop.permute.xlu1 %1666 }
 0x1ed   : > { %1565 = vst.msk [vmem:[#allocation3 + $0x28] sm:$0xff] %vm1559_vm8, %v1474_v25  ;;  %1298 = vrot.lane.b32.xlu0 %v2375_v30, %s3834_s30  ;;  %v3820_v25 = vld [vmem:[%s5570_s2] ss:$0 sm:$0xff] }
 0x1ee   : > { %2337 = vst.msk [vmem:[#allocation3 + $0x20] sm:$0xff] %vm2332_vm12, %v4492_v38  ;;  %1300 = vrot.lane.b32.xlu1 %v2376_v29, %s3834_s30 }
 0x1ef   : > { %2530 = vst.msk [vmem:[#allocation3 + $0x20] sm:$0xff] %vm2525_vm13, %v2438_v48  ;;  %v4621_v35 = vpop.permute.xlu0 %1676 }
 0x1f0   : > { %1758 = vst.msk [vmem:[#allocation3 + $0x28] sm:$0xff] %vm1752_vm9, %v1667_v40  ;;  %v1860_v22 = vpop.permute.xlu1 %1859 }
 0x1f1   : > { %1951 = vst.msk [vmem:[#allocation3 + $0x28] sm:$0xff] %vm1945_vm10, %v1860_v22  ;;  %1873 = vrot.lane.b32.xlu0 %v2375_v30, %s3839_s23 }
 0x1f2   : > { %2145 = vst.msk [vmem:[#allocation3 + $0x28] sm:$0xff] %vm2139_vm11, %v4505_v12  ;;  %1489 = vrot.lane.b32.xlu1 %v4277_v19, %s3835_s17 }
 0x1f3   : > { %2338 = vst.msk [vmem:[#allocation3 + $0x28] sm:$0xff] %vm2332_vm12, %v4512_v3  ;;  %v4631_v38 = vpop.permute.xlu0 %2059 }
 0x1f4   : > { %2531 = vst.msk [vmem:[#allocation3 + $0x28] sm:$0xff] %vm2525_vm13, %v4517_v49  ;;  %v4635_v15 = vpop.permute.xlu1 %1485 }
 0x1f5   : > { %1302 = vrot.lane.b32.xlu0 %v1799_v26, %s3834_s30 }
 0x1f6   : > { %1682 = vrot.lane.b32.xlu1 %v2183_v14, %s3836_s18  ;;  %v2562_v3 = vld [vmem:[#allocation3 + $0x20] sm:$0xff] }
 0x1f7   : > { %v4639_v48 = vpop.permute.xlu0 %2252 }
 0x1f8   : > { %v4641_v12 = vpop.permute.xlu1 %1678 }
 0x1f9   : > { %1306 = vrot.lane.b32.xlu0 %v4247_v59, %s3834_s30 }
 0x1fa   : > { %1875 = vrot.lane.b32.xlu1 %v2376_v29, %s3839_s23 }
 0x1fb   : > { %v1102_v19 = vpop.permute.xlu0 %1101  ;;  %v2563_v16 = vld [vmem:[#allocation3 + $0x28] sm:$0xff] }
 0x1fc   : > { %1186 = vst.msk [vmem:[#allocation3 + $0x60] sm:$0xff] %vm1173_vm5, %v1102_v19  ;;  %v4647_v49 = vpop.permute.xlu1 %1871  ;;  %v2592_v26 = vpack.c.bf16 %v2563_v16, %v2562_v3  ;;  %v1801_v19 = vld [vmem:[#allocation2 + $0xda] sm:$0xff] }
 0x1fd   : > { %1495 = vrot.lane.b32.xlu0 %v1415_v47, %s3835_s17  ;;  %v3821_v3 = vld [vmem:[%s5571_s3] ss:$0 sm:$0xff]  ;;  %v1609_v47 = vld [vmem:[#allocation2 + $0xe1] sm:$0xff] }
 0x1fe   : > { %3729 = vmatprep.mubr.msk.bf16.mxu1 %vm2642_vm14, %v2592_v26  ;;  %1304 = vrot.lane.b32.xlu1 %v4520_v10, %s3834_s30 }
 0x1ff   : > { %v2056_v14 = vpop.permute.xlu0 %2055 }
 0x200   : > { %2146 = vst.msk [vmem:[#allocation3 + $0x30] sm:$0xff] %vm2139_vm11, %v2056_v14  ;;  %v4654_v59 = vpop.permute.xlu1 %2061 }
 0x201   : > { %1499 = vrot.lane.b32.xlu0 %v4105_v43, %s3835_s17 }
 0x202   : > { %1308 = vrot.lane.b32.xlu1 %v4260_v11, %s3834_s30  ;;  %v4673_v11 = vpop.f32.mrb[12].mxu1 }
 0x203   : > { %v2249_v20 = vpop.permute.xlu0 %2248  ;;  %5597 = vst [vmem:[#allocation11_spill] sm:$0xff] %v4673_v11  ;;  %v4681_v30 = vpop.f32.mrb[13].mxu1 }
 0x204   : > { %2339 = vst.msk [vmem:[#allocation3 + $0x30] sm:$0xff] %vm2332_vm12, %v2249_v20  ;;  %v4661_v29 = vpop.permute.xlu1 %2254  ;;  %5598 = vst [vmem:[#allocation12_spill] sm:$0xff] %v4681_v30  ;;  %v795_v40 = vmul.f32 %v3820_v25, %v4681_v30  ;;  %v4691_v20 = vpop.f32.mrb[14].mxu1  ;;  %v4695_v30 = vld [vmem:[#allocation2 + $0xf2] sm:$0xff] }
 0x205   : > { %1688 = vrot.lane.b32.xlu0 %v1608_v32, %s3836_s18 }
 0x206   : > { %1497 = vrot.lane.b32.xlu1 %v4134_v62, %s3835_s17  ;;  %v797_v62 = vmul.f32 %v3820_v25, %v4673_v11  ;;  %v834_v26 = vadd.f32 %v3821_v3, %v795_v40  ;;  %v4703_v40 = vld [vmem:[#allocation2 + $0xf9] sm:$0xff] }
 0x207   : > { %v1098_v10 = vpop.permute.xlu0 %1097 }
 0x208   : > { %1184 = vst.msk [vmem:[#allocation3 + $0x50] sm:$0xff] %vm1173_vm5, %v1098_v10  ;;  %v4667_v44 = vpop.permute.xlu1 %2447  ;;  %v836_v16 = vadd.f32 %v3821_v3, %v797_v62  ;;  %v866_v10 = vmax.f32 %v834_v26, 0.0  ;;  %v4698_v62 = vpop.f32.mrb[15].mxu1 }
 0x209   : > { %1692 = vrot.lane.b32.xlu0 %v4669_v13, %s3836_s18 }
 0x20a   : > { %1501 = vrot.lane.b32.xlu1 %v4150_v8, %s3835_s17  ;;  %v868_v14 = vmax.f32 %v836_v16, 0.0  ;;  %945 = vst.msk [vmem:[#allocation2 + $0x169] sm:$0xff] %vm870_vm2, %v866_v10 }
 0x20b   : > { %v1480_v24 = vpop.permute.xlu0 %1479 }
 0x20c   : > { %1568 = vst.msk [vmem:[#allocation3 + $0x40] sm:$0xff] %vm1559_vm8, %v1480_v24  ;;  %v1104_v22 = vpop.permute.xlu1 %1103  ;;  %v798_v24 = vmul.f32 %v3820_v25, %v4691_v20 }
 0x20d   : > { %1187 = vst.msk [vmem:[#allocation3 + $0x68] sm:$0xff] %vm1173_vm5, %v1104_v22  ;;  %1881 = vrot.lane.b32.xlu0 %v1801_v19, %s3839_s23  ;;  %v796_v19 = vmul.f32 %v3820_v25, %v4698_v62 }
 0x20e   : > { %1690 = vrot.lane.b32.xlu1 %v1609_v47, %s3836_s18  ;;  %947 = vst.msk [vmem:[#allocation2 + $0x181] sm:$0xff] %vm870_vm2, %v868_v14  ;;  %v837_v22 = vadd.f32 %v3821_v3, %v798_v24 }
 0x20f   : > { %v1673_v32 = vpop.permute.xlu0 %1672  ;;  %v835_v26 = vadd.f32 %v3821_v3, %v796_v19  ;;  %v4718_v3 = vld [vmem:[#allocation2 + $0xfa] sm:$0xff] }
 0x210   : > { %1761 = vst.msk [vmem:[#allocation3 + $0x40] sm:$0xff] %vm1752_vm9, %v1673_v32  ;;  %v1297_v11 = vpop.permute.xlu1 %1296  ;;  %v869_v47 = vmax.f32 %v837_v22, 0.0 }
 0x211   : > { %1380 = vst.msk [vmem:[#allocation3 + $0x68] sm:$0xff] %vm1366_vm6, %v1297_v11  ;;  %1885 = vrot.lane.b32.xlu0 %v4695_v30, %s3839_s23  ;;  %v1802_v11 = vld [vmem:[#allocation2 + $0xe2] sm:$0xff]  ;;  %v867_v32 = vmax.f32 %v835_v26, 0.0 }
 0x212   : > { %1694 = vrot.lane.b32.xlu1 %v4703_v40, %s3836_s18  ;;  %948 = vst.msk [vmem:[#allocation2 + $0x189] sm:$0xff] %vm870_vm2, %v869_v47  ;;  %v4720_v24 = vld [vmem:[#allocation2 + $0x168] sm:$0xff] }
 0x213   : > { %v1870_v16 = vpop.permute.xlu0 %1869  ;;  %946 = vst.msk [vmem:[#allocation2 + $0x171] sm:$0xff] %vm870_vm2, %v867_v32  ;;  %1011 = vst.msk [vmem:[#allocation3 + $0xf0] sm:$0xff] %vm870_vm2, %v4720_v24  ;;  %v4733_v26 = vld [vmem:[#allocation2 + $0x109] sm:$0xff] }
 0x214   : > { %v2058_v14 = vpop.permute.xlu1 %2057 }
 0x215   : > { %2147 = vst.msk [vmem:[#allocation3 + $0x38] sm:$0xff] %vm2139_vm11, %v2058_v14  ;;  %2075 = vrot.lane.b32.xlu0 %v4105_v43, %s3837_s19 }
 0x216   : > { %1883 = vrot.lane.b32.xlu1 %v1802_v11, %s3839_s23 }
 0x217   : > { %v2446_v10 = vpop.permute.xlu0 %2445 }
 0x218   : > { %v2251_v25 = vpop.permute.xlu1 %2250 }
 0x219   : > { %2340 = vst.msk [vmem:[#allocation3 + $0x38] sm:$0xff] %vm2332_vm12, %v2251_v25  ;;  %2079 = vrot.lane.b32.xlu0 %v4421_v42, %s3837_s19 }
 0x21a   : > { %1887 = vrot.lane.b32.xlu1 %v4718_v3, %s3839_s23  ;;  %v4735_v14 = vld [vmem:[#allocation2 + $0x170] sm:$0xff] }
 0x21b   : > { %v1295_v43 = vpop.permute.xlu0 %1294  ;;  %1012 = vst.msk [vmem:[#allocation3 + $0xf8] sm:$0xff] %vm870_vm2, %v4735_v14 }
 0x21c   : > { %1379 = vst.msk [vmem:[#allocation3 + $0x60] sm:$0xff] %vm1366_vm6, %v1295_v43  ;;  %v2444_v22 = vpop.permute.xlu1 %2443 }
 0x21d   : > { %2533 = vst.msk [vmem:[#allocation3 + $0x38] sm:$0xff] %vm2525_vm13, %v2444_v22  ;;  %2268 = vrot.lane.b32.xlu0 %v4669_v13, %s3838_s20  ;;  %v2384_v22 = vld [vmem:[#allocation2 + $0x112] sm:$0xff] }
 0x21e   : > { %2077 = vrot.lane.b32.xlu1 %v4150_v8, %s3837_s19 }
 0x21f   : > { %v2442_v19 = vpop.permute.xlu0 %2441 }
 0x220   : > { %2532 = vst.msk [vmem:[#allocation3 + $0x30] sm:$0xff] %vm2525_vm13, %v2442_v19  ;;  %v1100_v47 = vpop.permute.xlu1 %1099 }
 0x221   : > { %1185 = vst.msk [vmem:[#allocation3 + $0x58] sm:$0xff] %vm1173_vm5, %v1100_v47  ;;  %2272 = vrot.lane.b32.xlu0 %v4733_v26, %s3838_s20 }
 0x222   : > { %2081 = vrot.lane.b32.xlu1 %v4430_v1, %s3837_s19 }
 0x223   : > { %v1291_v8 = vpop.permute.xlu0 %1290 }
 0x224   : > { %1377 = vst.msk [vmem:[#allocation3 + $0x50] sm:$0xff] %vm1366_vm6, %v1291_v8  ;;  %v1293_v11 = vpop.permute.xlu1 %1292  ;;  %v2565_v25 = vld [vmem:[#allocation3 + $0x38] sm:$0xff] }
 0x225   : > { %1570 = vst.msk [vmem:[#allocation3 + $0x50] sm:$0xff] %vm1559_vm8, %v4616_v36  ;;  %2461 = vrot.lane.b32.xlu0 %v4695_v30, %s3840_s24 }
 0x226   : > { %1378 = vst.msk [vmem:[#allocation3 + $0x58] sm:$0xff] %vm1366_vm6, %v1293_v11  ;;  %2270 = vrot.lane.b32.xlu1 %v4703_v40, %s3838_s20 }
 0x227   : > { %1763 = vst.msk [vmem:[#allocation3 + $0x50] sm:$0xff] %vm1752_vm9, %v4621_v35  ;;  %v1866_v36 = vpop.permute.xlu0 %1865  ;;  %v2564_v32 = vld [vmem:[#allocation3 + $0x30] sm:$0xff] }
 0x228   : > { %1571 = vst.msk [vmem:[#allocation3 + $0x58] sm:$0xff] %vm1559_vm8, %v4635_v15  ;;  %v1482_v35 = vpop.permute.xlu1 %1481  ;;  %v2593_v43 = vpack.c.bf16 %v2565_v25, %v2564_v32  ;;  %v2191_v15 = vld [vmem:[#allocation2 + $0x111] sm:$0xff] }
 0x229   : > { %1764 = vst.msk [vmem:[#allocation3 + $0x58] sm:$0xff] %vm1752_vm9, %v4641_v12  ;;  %1117 = vrot.lane.b32.xlu0 %v4669_v13, %s3833_s29 }
 0x22a   : > { %1956 = vst.msk [vmem:[#allocation3 + $0x50] sm:$0xff] %vm1945_vm10, %v1870_v16  ;;  %1957 = vst.msk [vmem:[#allocation3 + $0x58] sm:$0xff] %vm1945_vm10, %v4647_v49  ;;  %3730 = vmatmul.mubr.msk.bf16.gmra.mrb[20].mxu1 %vm2642_vm14, %v2593_v43  ;;  %2274 = vrot.lane.b32.xlu1 %v2191_v15, %s3838_s20  ;;  %v2383_v16 = vld [vmem:[#allocation2 + $0x10a] sm:$0xff] }
 0x22b   : > { %1954 = vst.msk [vmem:[#allocation3 + $0x40] sm:$0xff] %vm1945_vm10, %v1866_v36  ;;  %v4772_v12 = vpop.permute.xlu0 %1491 }
 0x22c   : > { %2148 = vst.msk [vmem:[#allocation3 + $0x40] sm:$0xff] %vm2139_vm11, %v4631_v38  ;;  %v1675_v49 = vpop.permute.xlu1 %1674 }
 0x22d   : > { %1569 = vst.msk [vmem:[#allocation3 + $0x48] sm:$0xff] %vm1559_vm8, %v1482_v35  ;;  %2465 = vrot.lane.b32.xlu0 %v2383_v16, %s3840_s24  ;;  %v4831_v35 = vld [vmem:[#allocation2 + $0x121] sm:$0xff] }
 0x22e   : > { %2341 = vst.msk [vmem:[#allocation3 + $0x40] sm:$0xff] %vm2332_vm12, %v4639_v48  ;;  %2463 = vrot.lane.b32.xlu1 %v4718_v3, %s3840_s24 }
 0x22f   : > { %2534 = vst.msk [vmem:[#allocation3 + $0x40] sm:$0xff] %vm2525_vm13, %v2446_v10  ;;  %v4778_v38 = vpop.permute.xlu0 %1684 }
 0x230   : > { %1762 = vst.msk [vmem:[#allocation3 + $0x48] sm:$0xff] %vm1752_vm9, %v1675_v49  ;;  %v1868_v48 = vpop.permute.xlu1 %1867 }
 0x231   : > { %1955 = vst.msk [vmem:[#allocation3 + $0x48] sm:$0xff] %vm1945_vm10, %v1868_v48  ;;  %1121 = vrot.lane.b32.xlu0 %v4733_v26, %s3833_s29 }
 0x232   : > { %2149 = vst.msk [vmem:[#allocation3 + $0x48] sm:$0xff] %vm2139_vm11, %v4654_v59  ;;  %1119 = vrot.lane.b32.xlu1 %v4703_v40, %s3833_s29 }
 0x233   : > { %2342 = vst.msk [vmem:[#allocation3 + $0x48] sm:$0xff] %vm2332_vm12, %v4661_v29  ;;  %v4789_v13 = vpop.permute.xlu0 %2067 }
 0x234   : > { %2535 = vst.msk [vmem:[#allocation3 + $0x48] sm:$0xff] %vm2525_vm13, %v4667_v44  ;;  %v4793_v10 = vpop.permute.xlu1 %1493 }
 0x235   : > { %1310 = vrot.lane.b32.xlu0 %v4695_v30, %s3834_s30 }
 0x236   : > { %2467 = vrot.lane.b32.xlu1 %v2384_v22, %s3840_s24  ;;  %v2566_v40 = vld [vmem:[#allocation3 + $0x40] sm:$0xff] }
 0x237   : > { %v4798_v59 = vpop.permute.xlu0 %2260 }
 0x238   : > { %v4800_v19 = vpop.permute.xlu1 %1686 }
 0x239   : > { %1314 = vrot.lane.b32.xlu0 %v2383_v16, %s3834_s30 }
 0x23a   : > { %1123 = vrot.lane.b32.xlu1 %v2191_v15, %s3833_s29 }
 0x23b   : > { %v1110_v29 = vpop.permute.xlu0 %1109  ;;  %v2567_v47 = vld [vmem:[#allocation3 + $0x48] sm:$0xff] }
 0x23c   : > { %1190 = vst.msk [vmem:[#allocation3 + $0x80] sm:$0xff] %vm1173_vm5, %v1110_v29  ;;  %v4805_v44 = vpop.permute.xlu1 %1879  ;;  %v2594_v8 = vpack.c.bf16 %v2567_v47, %v2566_v40  ;;  %v4844_v29 = vld [vmem:[#allocation2 + $0x122] sm:$0xff] }
 0x23d   : > { %1503 = vrot.lane.b32.xlu0 %v4421_v42, %s3835_s17  ;;  %v4849_v40 = vld [vmem:[#allocation2 + $0x129] sm:$0xff] }
 0x23e   : > { %3733 = vmatprep.mubr.msk.bf16.mxu1 %vm2642_vm14, %v2594_v8  ;;  %1312 = vrot.lane.b32.xlu1 %v4718_v3, %s3834_s30  ;;  %v2982_v3 = vld [vmem:[%s5575_s7] sm:$0xf] }
 0x23f   : > { %v2064_v30 = vpop.permute.xlu0 %2063  ;;  %3796 = vmatprep.subr.msk.bf16.mxu0 %vm2691_vm7, %v2982_v3  ;;  %v3032_v43 = vsel %vm2691_vm7, %v2982_v3, 0  ;;  %v4871_v3 = vld [vmem:[#allocation2 + $0x139] sm:$0xff] }
 0x240   : > { %2150 = vst.msk [vmem:[#allocation3 + $0x50] sm:$0xff] %vm2139_vm11, %v2064_v30  ;;  %v4813_v11 = vpop.permute.xlu1 %2069  ;;  %3758 = vmatpush3.bf16.msra.mxu0 %v3032_v43  ;;  %v4860_v30 = vld [vmem:[#allocation2 + $0x12a] sm:$0xff] }
 0x241   : > { %1507 = vrot.lane.b32.xlu0 %v4436_v0, %s3835_s17 }
 0x242   : > { %1316 = vrot.lane.b32.xlu1 %v2384_v22, %s3834_s30 }
 0x243   : > { %v2257_v36 = vpop.permute.xlu0 %2256 }
 0x244   : > { %2343 = vst.msk [vmem:[#allocation3 + $0x50] sm:$0xff] %vm2332_vm12, %v2257_v36  ;;  %v4819_v32 = vpop.permute.xlu1 %2262 }
 0x245   : > { %1696 = vrot.lane.b32.xlu0 %v4733_v26, %s3836_s18 }
 0x246   : > { %1505 = vrot.lane.b32.xlu1 %v4430_v1, %s3835_s17 }
 0x247   : > { %v1106_v42 = vpop.permute.xlu0 %1105 }
 0x248   : > { %1188 = vst.msk [vmem:[#allocation3 + $0x70] sm:$0xff] %vm1173_vm5, %v1106_v42  ;;  %v4829_v25 = vpop.permute.xlu1 %2455 }
 0x249   : > { %1700 = vrot.lane.b32.xlu0 %v4831_v35, %s3836_s18 }
 0x24a   : > { %1509 = vrot.lane.b32.xlu1 %v4446_v37, %s3835_s17 }
 0x24b   : > { %v1488_v1 = vpop.permute.xlu0 %1487 }
 0x24c   : > { %1572 = vst.msk [vmem:[#allocation3 + $0x60] sm:$0xff] %vm1559_vm8, %v1488_v1  ;;  %v1112_v26 = vpop.permute.xlu1 %1111 }
 0x24d   : > { %1191 = vst.msk [vmem:[#allocation3 + $0x88] sm:$0xff] %vm1173_vm5, %v1112_v26  ;;  %1889 = vrot.lane.b32.xlu0 %v2383_v16, %s3839_s23 }
 0x24e   : > { %1698 = vrot.lane.b32.xlu1 %v2191_v15, %s3836_s18 }
 0x24f   : > { %v1681_v49 = vpop.permute.xlu0 %1680 }
 0x250   : > { %1765 = vst.msk [vmem:[#allocation3 + $0x60] sm:$0xff] %vm1752_vm9, %v1681_v49  ;;  %v2066_v48 = vpop.permute.xlu1 %2065 }
 0x251   : > { %2151 = vst.msk [vmem:[#allocation3 + $0x58] sm:$0xff] %vm2139_vm11, %v2066_v48  ;;  %1893 = vrot.lane.b32.xlu0 %v4844_v29, %s3839_s23 }
 0x252   : > { %1702 = vrot.lane.b32.xlu1 %v4849_v40, %s3836_s18 }
 0x253   : > { %v1878_v47 = vpop.permute.xlu0 %1877 }
 0x254   : > { %v2259_v16 = vpop.permute.xlu1 %2258 }
 0x255   : > { %2344 = vst.msk [vmem:[#allocation3 + $0x58] sm:$0xff] %vm2332_vm12, %v2259_v16  ;;  %2083 = vrot.lane.b32.xlu0 %v4436_v0, %s3837_s19 }
 0x256   : > { %1891 = vrot.lane.b32.xlu1 %v2384_v22, %s3839_s23 }
 0x257   : > { %v2454_v15 = vpop.permute.xlu0 %2453 }
 0x258   : > { %v2452_v8 = vpop.permute.xlu1 %2451 }
 0x259   : > { %2537 = vst.msk [vmem:[#allocation3 + $0x58] sm:$0xff] %vm2525_vm13, %v2452_v8  ;;  %2087 = vrot.lane.b32.xlu0 %v4566_v51, %s3837_s19 }
 0x25a   : > { %1895 = vrot.lane.b32.xlu1 %v4860_v30, %s3839_s23 }
 0x25b   : > { %v2450_v36 = vpop.permute.xlu0 %2449 }
 0x25c   : > { %2536 = vst.msk [vmem:[#allocation3 + $0x50] sm:$0xff] %vm2525_vm13, %v2450_v36  ;;  %v1108_v42 = vpop.permute.xlu1 %1107 }
 0x25d   : > { %1189 = vst.msk [vmem:[#allocation3 + $0x78] sm:$0xff] %vm1173_vm5, %v1108_v42  ;;  %2276 = vrot.lane.b32.xlu0 %v4831_v35, %s3838_s20  ;;  %v1618_v42 = vld [vmem:[#allocation2 + $0x151] sm:$0xff] }
 0x25e   : > { %2085 = vrot.lane.b32.xlu1 %v4446_v37, %s3837_s19 }
 0x25f   : > { %v1299_v0 = vpop.permute.xlu0 %1298 }
 0x260   : > { %1381 = vst.msk [vmem:[#allocation3 + $0x70] sm:$0xff] %vm1366_vm6, %v1299_v0  ;;  %v1301_v22 = vpop.permute.xlu1 %1300  ;;  %v2569_v43 = vld [vmem:[#allocation3 + $0x58] sm:$0xff] }
 0x261   : > { %1574 = vst.msk [vmem:[#allocation3 + $0x70] sm:$0xff] %vm1559_vm8, %v4772_v12  ;;  %2280 = vrot.lane.b32.xlu0 %v4871_v3, %s3838_s20 }
 0x262   : > { %1382 = vst.msk [vmem:[#allocation3 + $0x78] sm:$0xff] %vm1366_vm6, %v1301_v22  ;;  %2089 = vrot.lane.b32.xlu1 %v4576_v33, %s3837_s19 }
 0x263   : > { %1767 = vst.msk [vmem:[#allocation3 + $0x70] sm:$0xff] %vm1752_vm9, %v4778_v38  ;;  %v1874_v37 = vpop.permute.xlu0 %1873  ;;  %v2568_v12 = vld [vmem:[#allocation3 + $0x50] sm:$0xff] }
 0x264   : > { %1575 = vst.msk [vmem:[#allocation3 + $0x78] sm:$0xff] %vm1559_vm8, %v4793_v10  ;;  %v1490_v38 = vpop.permute.xlu1 %1489  ;;  %v2595_v10 = vpack.c.bf16 %v2569_v43, %v2568_v12  ;;  %v1619_v12 = vld [vmem:[#allocation2 + $0x159] sm:$0xff] }
 0x265   : > { %1960 = vst.msk [vmem:[#allocation3 + $0x70] sm:$0xff] %vm1945_vm10, %v1878_v47  ;;  %1958 = vst.msk [vmem:[#allocation3 + $0x60] sm:$0xff] %vm1945_vm10, %v1874_v37  ;;  %2469 = vrot.lane.b32.xlu0 %v4844_v29, %s3840_s24  ;;  %v4983_v37 = vld [vmem:[#allocation2 + $0x152] sm:$0xff] }
 0x266   : > { %1768 = vst.msk [vmem:[#allocation3 + $0x78] sm:$0xff] %vm1752_vm9, %v4800_v19  ;;  %3734 = vmatmul.mubr.msk.bf16.gmra.mrb[24].mxu1 %vm2642_vm14, %v2595_v10  ;;  %2278 = vrot.lane.b32.xlu1 %v4849_v40, %s3838_s20 }
 0x267   : > { %2154 = vst.msk [vmem:[#allocation3 + $0x70] sm:$0xff] %vm2139_vm11, %v4368_v9  ;;  %2152 = vst.msk [vmem:[#allocation3 + $0x60] sm:$0xff] %vm2139_vm11, %v4789_v13  ;;  %v1303_v9 = vpop.permute.xlu0 %1302 }
 0x268   : > { %1961 = vst.msk [vmem:[#allocation3 + $0x78] sm:$0xff] %vm1945_vm10, %v4805_v44 }
 0x269   : > { %2347 = vst.msk [vmem:[#allocation3 + $0x70] sm:$0xff] %vm2332_vm12, %v4373_v27  ;;  %2345 = vst.msk [vmem:[#allocation3 + $0x60] sm:$0xff] %vm2332_vm12, %v4798_v59  ;;  %v1683_v27 = vpop.permute.xlu1 %1682  ;;  %1125 = vrot.lane.b32.xlu0 %v4831_v35, %s3833_s29 }
 0x26a   : > { %2155 = vst.msk [vmem:[#allocation3 + $0x78] sm:$0xff] %vm2139_vm11, %v4458_v41  ;;  %v4917_v41 = vld [vmem:[#allocation2 + $0x141] sm:$0xff] }
 0x26b   : > { %1573 = vst.msk [vmem:[#allocation3 + $0x68] sm:$0xff] %vm1559_vm8, %v1490_v38  ;;  %2282 = vrot.lane.b32.xlu1 %v4917_v41, %s3838_s20 }
 0x26c   : > { %2540 = vst.msk [vmem:[#allocation3 + $0x70] sm:$0xff] %vm2525_vm13, %v4467_v5  ;;  %2538 = vst.msk [vmem:[#allocation3 + $0x60] sm:$0xff] %vm2525_vm13, %v2454_v15  ;;  %v1307_v5 = vpop.permute.xlu0 %1306 }
 0x26d   : > { %2348 = vst.msk [vmem:[#allocation3 + $0x78] sm:$0xff] %vm2332_vm12, %v4469_v7  ;;  %v1876_v7 = vpop.permute.xlu1 %1875 }
 0x26e   : > { %2541 = vst.msk [vmem:[#allocation3 + $0x78] sm:$0xff] %vm2525_vm13, %v4475_v6  ;;  %v4922_v6 = vld [vmem:[#allocation2 + $0x13a] sm:$0xff] }
 0x26f   : > { %1383 = vst.msk [vmem:[#allocation3 + $0x80] sm:$0xff] %vm1366_vm6, %v1303_v9  ;;  %1385 = vst.msk [vmem:[#allocation3 + $0x90] sm:$0xff] %vm1366_vm6, %v1307_v5  ;;  %2473 = vrot.lane.b32.xlu0 %v4922_v6, %s3840_s24  ;;  %2471 = vrot.lane.b32.xlu1 %v4860_v30, %s3840_s24 }
 0x270   : > { %1766 = vst.msk [vmem:[#allocation3 + $0x68] sm:$0xff] %vm1752_vm9, %v1683_v27  ;;  %v1496_v13 = vpop.permute.xlu0 %1495  ;;  %v4998_v27 = vld [vmem:[#allocation2 + $0x15a] sm:$0xff] }
 0x271   : > { %1959 = vst.msk [vmem:[#allocation3 + $0x68] sm:$0xff] %vm1945_vm10, %v1876_v7  ;;  %v1305_v59 = vpop.permute.xlu1 %1304 }
 0x272   : > { %2153 = vst.msk [vmem:[#allocation3 + $0x68] sm:$0xff] %vm2139_vm11, %v4813_v11  ;;  %v2388_v11 = vld [vmem:[#allocation2 + $0x142] sm:$0xff] }
 0x273   : > { %2346 = vst.msk [vmem:[#allocation3 + $0x68] sm:$0xff] %vm2332_vm12, %v4819_v32  ;;  %1129 = vrot.lane.b32.xlu0 %v4871_v3, %s3833_s29  ;;  %1127 = vrot.lane.b32.xlu1 %v4849_v40, %s3833_s29  ;;  %v2572_v32 = vld [vmem:[#allocation3 + $0x70] sm:$0xff]  ;;  %v2570_v1 = vld [vmem:[#allocation3 + $0x60] sm:$0xff] }
 0x274   : > { %2539 = vst.msk [vmem:[#allocation3 + $0x68] sm:$0xff] %vm2525_vm13, %v4829_v25  ;;  %v1500_v19 = vpop.permute.xlu0 %1499 }
 0x275   : > { %1576 = vst.msk [vmem:[#allocation3 + $0x80] sm:$0xff] %vm1559_vm8, %v1496_v13  ;;  %1578 = vst.msk [vmem:[#allocation3 + $0x90] sm:$0xff] %vm1559_vm8, %v1500_v19  ;;  %v1309_v44 = vpop.permute.xlu1 %1308  ;;  %v2573_v25 = vld [vmem:[#allocation3 + $0x78] sm:$0xff] }
 0x276   : > { %1384 = vst.msk [vmem:[#allocation3 + $0x88] sm:$0xff] %vm1366_vm6, %v1305_v59  ;;  %1386 = vst.msk [vmem:[#allocation3 + $0x98] sm:$0xff] %vm1366_vm6, %v1309_v44  ;;  %v2597_v40 = vpack.c.bf16 %v2573_v25, %v2572_v32  ;;  %v5023_v32 = vld [vmem:[#allocation2 + $0x171] sm:$0xff] }
 0x277   : > { %1318 = vrot.lane.b32.xlu0 %v4844_v29, %s3834_s30  ;;  %2475 = vrot.lane.b32.xlu1 %v2388_v11, %s3840_s24 }
 0x278   : > { %v1689_v35 = vpop.permute.xlu0 %1688 }
 0x279   : > { %1769 = vst.msk [vmem:[#allocation3 + $0x80] sm:$0xff] %vm1752_vm9, %v1689_v35  ;;  %v1498_v49 = vpop.permute.xlu1 %1497 }
 0x27a   : > { %1577 = vst.msk [vmem:[#allocation3 + $0x88] sm:$0xff] %vm1559_vm8, %v1498_v49 }
 0x27b   : > { %v2571_v26 = vld [vmem:[#allocation3 + $0x68] sm:$0xff]  ;;  %1322 = vrot.lane.b32.xlu0 %v4922_v6, %s3834_s30  ;;  %1131 = vrot.lane.b32.xlu1 %v4917_v41, %s3833_s29 }
 0x27c   : > { %v2596_v48 = vpack.c.bf16 %v2571_v26, %v2570_v1  ;;  %v1693_v29 = vpop.permute.xlu0 %1692  ;;  %v5029_v26 = vld [vmem:[#allocation2 + $0x16a] sm:$0xff] }
 0x27d   : > { %1771 = vst.msk [vmem:[#allocation3 + $0x90] sm:$0xff] %vm1752_vm9, %v1693_v29  ;;  %v1502_v47 = vpop.permute.xlu1 %1501 }
 0x27e   : > { %3737 = vmatprep.mubr.msk.bf16.mxu1 %vm2642_vm14, %v2596_v48  ;;  %1579 = vst.msk [vmem:[#allocation3 + $0x98] sm:$0xff] %vm1559_vm8, %v1502_v47 }
 0x27f   : > { %3738 = vmatmul.mubr.msk.bf16.gmra.mrb[28].mxu1 %vm2642_vm14, %v2597_v40  ;;  %1511 = vrot.lane.b32.xlu0 %v4566_v51, %s3835_s17 }
 0x280   : > { %1320 = vrot.lane.b32.xlu1 %v4860_v30, %s3834_s30  ;;  %v1882_v16 = vpop.permute.xlu0 %1881 }
 0x281   : > { %1962 = vst.msk [vmem:[#allocation3 + $0x80] sm:$0xff] %vm1945_vm10, %v1882_v16  ;;  %v1691_v15 = vpop.permute.xlu1 %1690 }
 0x282   : > { %1770 = vst.msk [vmem:[#allocation3 + $0x88] sm:$0xff] %vm1752_vm9, %v1691_v15 }
 0x283   : > { %1515 = vrot.lane.b32.xlu0 %v4580_v57, %s3835_s17 }
 0x284   : > { %1324 = vrot.lane.b32.xlu1 %v2388_v11, %s3834_s30  ;;  %v1886_v8 = vpop.permute.xlu0 %1885 }
 0x285   : > { %1964 = vst.msk [vmem:[#allocation3 + $0x90] sm:$0xff] %vm1945_vm10, %v1886_v8  ;;  %v1695_v36 = vpop.permute.xlu1 %1694  ;;  %v5046_v8 = vld [vmem:[#allocation2 + $0x172] sm:$0xff] }
 0x286   : > { %1772 = vst.msk [vmem:[#allocation3 + $0x98] sm:$0xff] %vm1752_vm9, %v1695_v36 }
 0x287   : > { %1704 = vrot.lane.b32.xlu0 %v4871_v3, %s3836_s18 }
 0x288   : > { %1513 = vrot.lane.b32.xlu1 %v4576_v33, %s3835_s17  ;;  %v2076_v51 = vpop.permute.xlu0 %2075 }
 0x289   : > { %2156 = vst.msk [vmem:[#allocation3 + $0x80] sm:$0xff] %vm2139_vm11, %v2076_v51  ;;  %v1884_v30 = vpop.permute.xlu1 %1883 }
 0x28a   : > { %1963 = vst.msk [vmem:[#allocation3 + $0x88] sm:$0xff] %vm1945_vm10, %v1884_v30 }
 0x28b   : > { %1708 = vrot.lane.b32.xlu0 %v1618_v42, %s3836_s18 }
 0x28c   : > { %1517 = vrot.lane.b32.xlu1 %v4585_v34, %s3835_s17  ;;  %v2080_v0 = vpop.permute.xlu0 %2079 }
 0x28d   : > { %2158 = vst.msk [vmem:[#allocation3 + $0x90] sm:$0xff] %vm2139_vm11, %v2080_v0  ;;  %v1888_v22 = vpop.permute.xlu1 %1887 }
 0x28e   : > { %1965 = vst.msk [vmem:[#allocation3 + $0x98] sm:$0xff] %vm1945_vm10, %v1888_v22 }
 0x28f   : > { %1897 = vrot.lane.b32.xlu0 %v4922_v6, %s3839_s23  ;;  %v5008_v6 = vld [vmem:[#allocation2 + $0x169] sm:$0xff] }
 0x290   : > { %1706 = vrot.lane.b32.xlu1 %v4917_v41, %s3836_s18  ;;  %v2269_v33 = vpop.permute.xlu0 %2268 }
 0x291   : > { %2349 = vst.msk [vmem:[#allocation3 + $0x80] sm:$0xff] %vm2332_vm12, %v2269_v33  ;;  %v2078_v3 = vpop.permute.xlu1 %2077  ;;  %v5066_v33 = vld [vmem:[%s5574_s6] ss:$0 sm:$0xff] }
 0x292   : > { %2157 = vst.msk [vmem:[#allocation3 + $0x88] sm:$0xff] %vm2139_vm11, %v2078_v3 }
 0x293   : > { %1901 = vrot.lane.b32.xlu0 %v4983_v37, %s3839_s23 }
 0x294   : > { %1710 = vrot.lane.b32.xlu1 %v1619_v12, %s3836_s18  ;;  %v2273_v43 = vpop.permute.xlu0 %2272 }
 0x295   : > { %2351 = vst.msk [vmem:[#allocation3 + $0x90] sm:$0xff] %vm2332_vm12, %v2273_v43  ;;  %v2082_v38 = vpop.permute.xlu1 %2081 }
 0x296   : > { %2159 = vst.msk [vmem:[#allocation3 + $0x98] sm:$0xff] %vm2139_vm11, %v2082_v38 }
 0x297   : > { %2091 = vrot.lane.b32.xlu0 %v4580_v57, %s3837_s19 }
 0x298   : > { %1899 = vrot.lane.b32.xlu1 %v2388_v11, %s3839_s23  ;;  %v2462_v10 = vpop.permute.xlu0 %2461 }
 0x299   : > { %2542 = vst.msk [vmem:[#allocation3 + $0x80] sm:$0xff] %vm2525_vm13, %v2462_v10  ;;  %v2271_v9 = vpop.permute.xlu1 %2270 }
 0x29a   : > { %2350 = vst.msk [vmem:[#allocation3 + $0x88] sm:$0xff] %vm2332_vm12, %v2271_v9 }
 0x29b   : > { %2095 = vrot.lane.b32.xlu0 %v4720_v24, %s3837_s19 }
 0x29c   : > { %1903 = vrot.lane.b32.xlu1 %v4998_v27, %s3839_s23  ;;  %v1118_v41 = vpop.permute.xlu0 %1117 }
 0x29d   : > { %1194 = vst.msk [vmem:[#allocation3 + $0xa0] sm:$0xff] %vm1173_vm5, %v1118_v41  ;;  %v2275_v57 = vpop.permute.xlu1 %2274 }
 0x29e   : > { %2352 = vst.msk [vmem:[#allocation3 + $0x98] sm:$0xff] %vm2332_vm12, %v2275_v57 }
 0x29f   : > { %2284 = vrot.lane.b32.xlu0 %v1618_v42, %s3838_s20 }
 0x2a0   : > { %2093 = vrot.lane.b32.xlu1 %v4585_v34, %s3837_s19  ;;  %v2466_v5 = vpop.permute.xlu0 %2465  ;;  %v2574_v44 = vld [vmem:[#allocation3 + $0x80] sm:$0xff] }
 0x2a1   : > { %2544 = vst.msk [vmem:[#allocation3 + $0x90] sm:$0xff] %vm2525_vm13, %v2466_v5  ;;  %v2464_v7 = vpop.permute.xlu1 %2463  ;;  %v1429_v5 = vld [vmem:[#allocation2 + $0x180] sm:$0xff] }
 0x2a2   : > { %2543 = vst.msk [vmem:[#allocation3 + $0x88] sm:$0xff] %vm2525_vm13, %v2464_v7 }
 0x2a3   : > { %2288 = vrot.lane.b32.xlu0 %v5008_v6, %s3838_s20 }
 0x2a4   : > { %2097 = vrot.lane.b32.xlu1 %v4735_v14, %s3837_s19  ;;  %v1122_v13 = vpop.permute.xlu0 %1121 }
 0x2a5   : > { %1196 = vst.msk [vmem:[#allocation3 + $0xb0] sm:$0xff] %vm1173_vm5, %v1122_v13  ;;  %v1120_v59 = vpop.permute.xlu1 %1119 }
 0x2a6   : > { %1195 = vst.msk [vmem:[#allocation3 + $0xa8] sm:$0xff] %vm1173_vm5, %v1120_v59 }
 0x2a7   : > { %2477 = vrot.lane.b32.xlu0 %v4983_v37, %s3840_s24 }
 0x2a8   : > { %2286 = vrot.lane.b32.xlu1 %v1619_v12, %s3838_s20  ;;  %v1311_v34 = vpop.permute.xlu0 %1310  ;;  %v2576_v40 = vld [vmem:[#allocation3 + $0x90] sm:$0xff] }
 0x2a9   : > { %1387 = vst.msk [vmem:[#allocation3 + $0xa0] sm:$0xff] %vm1366_vm6, %v1311_v34  ;;  %v2468_v19 = vpop.permute.xlu1 %2467  ;;  %v2575_v11 = vld [vmem:[#allocation3 + $0x88] sm:$0xff] }
 0x2aa   : > { %2545 = vst.msk [vmem:[#allocation3 + $0x98] sm:$0xff] %vm2525_vm13, %v2468_v19  ;;  %v2598_v25 = vpack.c.bf16 %v2575_v11, %v2574_v44 }
 0x2ab   : > { %1133 = vrot.lane.b32.xlu0 %v1618_v42, %s3833_s29  ;;  %v5059_v42 = vld [vmem:[%s5573_s5] ss:$0 sm:$0xff] }
 0x2ac   : > { %2290 = vrot.lane.b32.xlu1 %v5023_v32, %s3838_s20  ;;  %v1315_v35 = vpop.permute.xlu0 %1314  ;;  %3741 = vmatprep.mubr.msk.bf16.mxu1 %vm2642_vm14, %v2598_v25 }
 0x2ad   : > { %1389 = vst.msk [vmem:[#allocation3 + $0xb0] sm:$0xff] %vm1366_vm6, %v1315_v35  ;;  %v1124_v1 = vpop.permute.xlu1 %1123 }
 0x2ae   : > { %1197 = vst.msk [vmem:[#allocation3 + $0xb8] sm:$0xff] %vm1173_vm5, %v1124_v1 }
 0x2af   : > { %2481 = vrot.lane.b32.xlu0 %v5029_v26, %s3840_s24 }
 0x2b0   : > { %2479 = vrot.lane.b32.xlu1 %v4998_v27, %s3840_s24  ;;  %v1504_v49 = vpop.permute.xlu0 %1503 }
 0x2b1   : > { %1580 = vst.msk [vmem:[#allocation3 + $0xa0] sm:$0xff] %vm1559_vm8, %v1504_v49  ;;  %v1313_v48 = vpop.permute.xlu1 %1312  ;;  %v2577_v29 = vld [vmem:[#allocation3 + $0x98] sm:$0xff] }
 0x2b2   : > { %1388 = vst.msk [vmem:[#allocation3 + $0xa8] sm:$0xff] %vm1366_vm6, %v1313_v48  ;;  %v2599_v47 = vpack.c.bf16 %v2577_v29, %v2576_v40  ;;  %v1622_v40 = vld [vmem:[#allocation2 + $0x181] sm:$0xff] }
 0x2b3   : > { %1137 = vrot.lane.b32.xlu0 %v5008_v6, %s3833_s29  ;;  %v1430_v29 = vld [vmem:[#allocation2 + $0x188] sm:$0xff] }
 0x2b4   : > { %1135 = vrot.lane.b32.xlu1 %v1619_v12, %s3833_s29  ;;  %v1508_v16 = vpop.permute.xlu0 %1507  ;;  %3742 = vmatmul.mubr.msk.bf16.gmra.mrb[32].mxu1 %vm2642_vm14, %v2599_v47 }
 0x2b5   : > { %1582 = vst.msk [vmem:[#allocation3 + $0xb0] sm:$0xff] %vm1559_vm8, %v1508_v16  ;;  %v1317_v15 = vpop.permute.xlu1 %1316 }
 0x2b6   : > { %1390 = vst.msk [vmem:[#allocation3 + $0xb8] sm:$0xff] %vm1366_vm6, %v1317_v15  ;;  %v1815_v15 = vld [vmem:[#allocation2 + $0x182] sm:$0xff] }
 0x2b7   : > { %1326 = vrot.lane.b32.xlu0 %v4983_v37, %s3834_s30 }
 0x2b8   : > { %2483 = vrot.lane.b32.xlu1 %v5046_v8, %s3840_s24  ;;  %v1697_v36 = vpop.permute.xlu0 %1696 }
 0x2b9   : > { %1773 = vst.msk [vmem:[#allocation3 + $0xa0] sm:$0xff] %vm1752_vm9, %v1697_v36  ;;  %v1506_v51 = vpop.permute.xlu1 %1505  ;;  %v1623_v36 = vld [vmem:[#allocation2 + $0x189] sm:$0xff] }
 0x2ba   : > { %1581 = vst.msk [vmem:[#allocation3 + $0xa8] sm:$0xff] %vm1559_vm8, %v1506_v51 }
 0x2bb   : > { %1330 = vrot.lane.b32.xlu0 %v5029_v26, %s3834_s30 }
 0x2bc   : > { %1139 = vrot.lane.b32.xlu1 %v5023_v32, %s3833_s29  ;;  %v1701_v30 = vpop.permute.xlu0 %1700 }
 0x2bd   : > { %1775 = vst.msk [vmem:[#allocation3 + $0xb0] sm:$0xff] %vm1752_vm9, %v1701_v30  ;;  %v1510_v0 = vpop.permute.xlu1 %1509  ;;  %v3727_v22 = vpop.f32.mrb[16].mxu1 }
 0x2be   : > { %1583 = vst.msk [vmem:[#allocation3 + $0xb8] sm:$0xff] %vm1559_vm8, %v1510_v0  ;;  %v2865_v3 = vmul.f32 %v3727_v22, %v5059_v42  ;;  %v2729_v37 = vpop.f32.mrb[17].mxu1  ;;  %v1816_v22 = vld [vmem:[#allocation2 + $0x18a] sm:$0xff] }
 0x2bf   : > { %1519 = vrot.lane.b32.xlu0 %v4720_v24, %s3835_s17  ;;  %v2863_v12 = vmul.f32 %v5059_v42, %v2729_v37  ;;  %v3728_v43 = vpop.f32.mrb[18].mxu1 }
 0x2c0   : > { %1328 = vrot.lane.b32.xlu1 %v4998_v27, %s3834_s30  ;;  %v1890_v38 = vpop.permute.xlu0 %1889  ;;  %v2904_v10 = vadd.f32 %v5066_v33, %v2865_v3  ;;  %v2866_v9 = vmul.f32 %v3728_v43, %v5059_v42  ;;  %v2732_v41 = vpop.f32.mrb[19].mxu1  ;;  %v2010_v43 = vld [vmem:[#allocation2 + $0x1a0] sm:$0xff] }
 0x2c1   : > { %1966 = vst.msk [vmem:[#allocation3 + $0xa0] sm:$0xff] %vm1945_vm10, %v1890_v38  ;;  %v1699_v57 = vpop.permute.xlu1 %1698  ;;  %v2902_v24 = vadd.f32 %v5066_v33, %v2863_v12  ;;  %v2864_v7 = vmul.f32 %v5059_v42, %v2732_v41  ;;  %v2395_v41 = vld [vmem:[#allocation2 + $0x19a] sm:$0xff] }
 0x2c2   : > { %1774 = vst.msk [vmem:[#allocation3 + $0xa8] sm:$0xff] %vm1752_vm9, %v1699_v57  ;;  %v2905_v27 = vadd.f32 %v5066_v33, %v2866_v9  ;;  %v2936_v34 = vmax.f32 %v2904_v10, 0.0 }
 0x2c3   : > { %1523 = vrot.lane.b32.xlu0 %v1429_v5, %s3835_s17  ;;  %v2903_v13 = vadd.f32 %v5066_v33, %v2864_v7  ;;  %v2934_v11 = vmax.f32 %v2902_v24, 0.0 }
 0x2c4   : > { %1332 = vrot.lane.b32.xlu1 %v5046_v8, %s3834_s30  ;;  %v1894_v59 = vpop.permute.xlu0 %1893  ;;  %v2937_v19 = vmax.f32 %v2905_v27, 0.0 }
 0x2c5   : > { %1968 = vst.msk [vmem:[#allocation3 + $0xb0] sm:$0xff] %vm1945_vm10, %v1894_v59  ;;  %v1703_v44 = vpop.permute.xlu1 %1702  ;;  %v2935_v25 = vmax.f32 %v2903_v13, 0.0  ;;  %v3577_v59 = vld [vmem:[%s5578_s10] ss:$0 sm:$0xff] }
 0x2c6   : > { %1776 = vst.msk [vmem:[#allocation3 + $0xb8] sm:$0xff] %vm1752_vm9, %v1703_v44  ;;  %v2967_v35 = vpack.c.bf16 %v2937_v19, %v2936_v34 }
 0x2c7   : > { %1712 = vrot.lane.b32.xlu0 %v5008_v6, %s3836_s18  ;;  %v2966_v1 = vpack.c.bf16 %v2935_v25, %v2934_v11  ;;  %v2396_v11 = vld [vmem:[#allocation2 + $0x1a2] sm:$0xff] }
 0x2c8   : > { %1521 = vrot.lane.b32.xlu1 %v4735_v14, %s3835_s17  ;;  %v2084_v49 = vpop.permute.xlu0 %2083 }
 0x2c9   : > { %2160 = vst.msk [vmem:[#allocation3 + $0xa0] sm:$0xff] %vm2139_vm11, %v2084_v49  ;;  %v1892_v48 = vpop.permute.xlu1 %1891  ;;  %3759 = vmatprep.mubr.msk.bf16.mxu0 %vm870_vm2, %v2966_v1 }
 0x2ca   : > { %1967 = vst.msk [vmem:[#allocation3 + $0xa8] sm:$0xff] %vm1945_vm10, %v1892_v48  ;;  %3760 = vmatmul.mubr.msk.bf16.vlgmr.msra.gmra.mrb[16].mxu0 %vm870_vm2, %v2967_v35 }
 0x2cb   : > { %1716 = vrot.lane.b32.xlu0 %v1622_v40, %s3836_s18 }
 0x2cc   : > { %1525 = vrot.lane.b32.xlu1 %v1430_v29, %s3835_s17  ;;  %v2088_v6 = vpop.permute.xlu0 %2087 }
 0x2cd   : > { %2162 = vst.msk [vmem:[#allocation3 + $0xb0] sm:$0xff] %vm2139_vm11, %v2088_v6  ;;  %v1896_v14 = vpop.permute.xlu1 %1895 }
 0x2ce   : > { %1969 = vst.msk [vmem:[#allocation3 + $0xb8] sm:$0xff] %vm1945_vm10, %v1896_v14 }
 0x2cf   : > { %1905 = vrot.lane.b32.xlu0 %v5029_v26, %s3839_s23 }
 0x2d0   : > { %1714 = vrot.lane.b32.xlu1 %v5023_v32, %s3836_s18  ;;  %v2277_v47 = vpop.permute.xlu0 %2276  ;;  %v2009_v32 = vld [vmem:[#allocation2 + $0x198] sm:$0xff] }
 0x2d1   : > { %2353 = vst.msk [vmem:[#allocation3 + $0xa0] sm:$0xff] %vm2332_vm12, %v2277_v47  ;;  %v2086_v16 = vpop.permute.xlu1 %2085 }
 0x2d2   : > { %2161 = vst.msk [vmem:[#allocation3 + $0xa8] sm:$0xff] %vm2139_vm11, %v2086_v16 }
 0x2d3   : > { %1909 = vrot.lane.b32.xlu0 %v1815_v15, %s3839_s23 }
 0x2d4   : > { %1718 = vrot.lane.b32.xlu1 %v1623_v36, %s3836_s18  ;;  %v2281_v51 = vpop.permute.xlu0 %2280 }
 0x2d5   : > { %2355 = vst.msk [vmem:[#allocation3 + $0xb0] sm:$0xff] %vm2332_vm12, %v2281_v51  ;;  %v2090_v30 = vpop.permute.xlu1 %2089 }
 0x2d6   : > { %2163 = vst.msk [vmem:[#allocation3 + $0xb8] sm:$0xff] %vm2139_vm11, %v2090_v30 }
 0x2d7   : > { %2099 = vrot.lane.b32.xlu0 %v1429_v5, %s3837_s19  ;;  %v2203_v5 = vld [vmem:[#allocation2 + $0x1a1] sm:$0xff] }
 0x2d8   : > { %1907 = vrot.lane.b32.xlu1 %v5046_v8, %s3839_s23  ;;  %v2470_v26 = vpop.permute.xlu0 %2469  ;;  %v2202_v8 = vld [vmem:[#allocation2 + $0x199] sm:$0xff] }
 0x2d9   : > { %2546 = vst.msk [vmem:[#allocation3 + $0xa0] sm:$0xff] %vm2525_vm13, %v2470_v26  ;;  %v2279_v0 = vpop.permute.xlu1 %2278 }
 0x2da   : > { %2354 = vst.msk [vmem:[#allocation3 + $0xa8] sm:$0xff] %vm2332_vm12, %v2279_v0 }
 0x2db   : > { %2103 = vrot.lane.b32.xlu0 %v2009_v32, %s3837_s19 }
 0x2dc   : > { %1911 = vrot.lane.b32.xlu1 %v1816_v22, %s3839_s23  ;;  %v1126_v3 = vpop.permute.xlu0 %1125 }
 0x2dd   : > { %1198 = vst.msk [vmem:[#allocation3 + $0xc0] sm:$0xff] %vm1173_vm5, %v1126_v3  ;;  %v2283_v37 = vpop.permute.xlu1 %2282 }
 0x2de   : > { %2356 = vst.msk [vmem:[#allocation3 + $0xb8] sm:$0xff] %vm2332_vm12, %v2283_v37 }
 0x2df   : > { %2292 = vrot.lane.b32.xlu0 %v1622_v40, %s3838_s20  ;;  %v3578_v40 = vld [vmem:[%s5579_s11] ss:$0 sm:$0xff] }
 0x2e0   : > { %2101 = vrot.lane.b32.xlu1 %v1430_v29, %s3837_s19  ;;  %v2578_v7 = vld [vmem:[#allocation3 + $0xa0] sm:$0xff] }
 0x2e1   : > { %v2474_v12 = vpop.permute.xlu0 %2473  ;;  %v2472_v38 = vpop.permute.xlu1 %2471 }
 0x2e2   : > { %2548 = vst.msk [vmem:[#allocation3 + $0xb0] sm:$0xff] %vm2525_vm13, %v2474_v12  ;;  %2547 = vst.msk [vmem:[#allocation3 + $0xa8] sm:$0xff] %vm2525_vm13, %v2472_v38 }
 0x2e3   : > { %2296 = vrot.lane.b32.xlu0 %v2202_v8, %s3838_s20 }
 0x2e4   : > { %2105 = vrot.lane.b32.xlu1 %v2010_v43, %s3837_s19 }
 0x2e5   : > { %v1130_v10 = vpop.permute.xlu0 %1129  ;;  %v1128_v9 = vpop.permute.xlu1 %1127 }
 0x2e6   : > { %1200 = vst.msk [vmem:[#allocation3 + $0xd0] sm:$0xff] %vm1173_vm5, %v1130_v10  ;;  %1199 = vst.msk [vmem:[#allocation3 + $0xc8] sm:$0xff] %vm1173_vm5, %v1128_v9 }
 0x2e7   : > { %2485 = vrot.lane.b32.xlu0 %v1815_v15, %s3840_s24 }
 0x2e8   : > { %2294 = vrot.lane.b32.xlu1 %v1623_v36, %s3838_s20 }
 0x2e9   : > { %v1319_v57 = vpop.permute.xlu0 %1318  ;;  %v2476_v24 = vpop.permute.xlu1 %2475  ;;  %v2579_v27 = vld [vmem:[#allocation3 + $0xa8] sm:$0xff]  ;;  %v2580_v35 = vld [vmem:[#allocation3 + $0xb0] sm:$0xff] }
 0x2ea   : > { %1391 = vst.msk [vmem:[#allocation3 + $0xc0] sm:$0xff] %vm1366_vm6, %v1319_v57  ;;  %v2600_v13 = vpack.c.bf16 %v2579_v27, %v2578_v7 }
 0x2eb   : > { %2549 = vst.msk [vmem:[#allocation3 + $0xb8] sm:$0xff] %vm2525_vm13, %v2476_v24  ;;  %2489 = vrot.lane.b32.xlu0 %v2395_v41, %s3840_s24 }
 0x2ec   : > { %2298 = vrot.lane.b32.xlu1 %v2203_v5, %s3838_s20  ;;  %3745 = vmatprep.mubr.msk.bf16.mxu1 %vm2642_vm14, %v2600_v13 }
 0x2ed   : > { %v1323_v34 = vpop.permute.xlu0 %1322  ;;  %v1132_v19 = vpop.permute.xlu1 %1131 }
 0x2ee   : > { %1393 = vst.msk [vmem:[#allocation3 + $0xd0] sm:$0xff] %vm1366_vm6, %v1323_v34 }
 0x2ef   : > { %1201 = vst.msk [vmem:[#allocation3 + $0xd8] sm:$0xff] %vm1173_vm5, %v1132_v19  ;;  %684 = vrot.lane.b32.xlu0 %v3577_v59, %s3833_s29 }
 0x2f0   : > { %2487 = vrot.lane.b32.xlu1 %v1816_v22, %s3840_s24 }
 0x2f1   : > { %v1512_v44 = vpop.permute.xlu0 %1511 }
 0x2f2   : > { %1584 = vst.msk [vmem:[#allocation3 + $0xc0] sm:$0xff] %vm1559_vm8, %v1512_v44  ;;  %v1321_v25 = vpop.permute.xlu1 %1320  ;;  %v2581_v1 = vld [vmem:[#allocation3 + $0xb8] sm:$0xff] }
 0x2f3   : > { %1392 = vst.msk [vmem:[#allocation3 + $0xc8] sm:$0xff] %vm1366_vm6, %v1321_v25  ;;  %v2601_v49 = vpack.c.bf16 %v2581_v1, %v2580_v35 }
 0x2f4   : > { %2491 = vrot.lane.b32.xlu1 %v2396_v11, %s3840_s24 }
 0x2f5   : > { %v1516_v48 = vpop.permute.xlu0 %1515  ;;  %3746 = vmatmul.mubr.msk.bf16.gmra.mrb[36].mxu1 %vm2642_vm14, %v2601_v49 }
 0x2f6   : > { %1586 = vst.msk [vmem:[#allocation3 + $0xd0] sm:$0xff] %vm1559_vm8, %v1516_v48  ;;  %v1325_v29 = vpop.permute.xlu1 %1324 }
 0x2f7   : > { %1394 = vst.msk [vmem:[#allocation3 + $0xd8] sm:$0xff] %vm1366_vm6, %v1325_v29 }
 0x2f8   : > { %725 = vrot.lane.b32.xlu1 %v3578_v40, %s3833_s29  ;;  %s3841_s29 = smov 120  }
 0x2f9   : > { %v1705_v6 = vpop.permute.xlu0 %1704 }
 0x2fa   : > { %1777 = vst.msk [vmem:[#allocation3 + $0xc0] sm:$0xff] %vm1752_vm9, %v1705_v6  ;;  %v1514_v14 = vpop.permute.xlu1 %1513 }
 0x2fb   : > { %1585 = vst.msk [vmem:[#allocation3 + $0xc8] sm:$0xff] %vm1559_vm8, %v1514_v14 }
 0x2fd   : > { %v1709_v47 = vpop.permute.xlu0 %1708  ;;  %v3731_v15 = vpop.f32.mrb[20].mxu1 }
 0x2fe   : > { %1779 = vst.msk [vmem:[#allocation3 + $0xd0] sm:$0xff] %vm1752_vm9, %v1709_v47  ;;  %v1518_v16 = vpop.permute.xlu1 %1517  ;;  %v2869_v36 = vmul.f32 %v3731_v15, %v5059_v42  ;;  %v2745_v51 = vpop.f32.mrb[21].mxu1 }
 0x2ff   : > { %1587 = vst.msk [vmem:[#allocation3 + $0xd8] sm:$0xff] %vm1559_vm8, %v1518_v16  ;;  %v2867_v30 = vmul.f32 %v5059_v42, %v2745_v51  ;;  %v3732_v32 = vpop.f32.mrb[22].mxu1 }
 0x300   : > { %v2908_v0 = vadd.f32 %v5066_v33, %v2869_v36  ;;  %v2870_v22 = vmul.f32 %v3732_v32, %v5059_v42  ;;  %v2748_v3 = vpop.f32.mrb[23].mxu1 }
 0x301   : > { %v1898_v26 = vpop.permute.xlu0 %1897  ;;  %v2906_v8 = vadd.f32 %v5066_v33, %v2867_v30  ;;  %v2868_v12 = vmul.f32 %v5059_v42, %v2748_v3 }
 0x302   : > { %1970 = vst.msk [vmem:[#allocation3 + $0xc0] sm:$0xff] %vm1945_vm10, %v1898_v26  ;;  %v1707_v37 = vpop.permute.xlu1 %1706  ;;  %v2909_v43 = vadd.f32 %v5066_v33, %v2870_v22  ;;  %v2940_v9 = vmax.f32 %v2908_v0, 0.0 }
 0x303   : > { %1778 = vst.msk [vmem:[#allocation3 + $0xc8] sm:$0xff] %vm1752_vm9, %v1707_v37  ;;  %v2907_v38 = vadd.f32 %v5066_v33, %v2868_v12  ;;  %v2938_v5 = vmax.f32 %v2906_v8, 0.0 }
 0x304   : > { %v2941_v41 = vmax.f32 %v2909_v43, 0.0 }
 0x305   : > { %v1902_v10 = vpop.permute.xlu0 %1901  ;;  %v2939_v24 = vmax.f32 %v2907_v38, 0.0 }
 0x306   : > { %1972 = vst.msk [vmem:[#allocation3 + $0xd0] sm:$0xff] %vm1945_vm10, %v1902_v10  ;;  %v1711_v57 = vpop.permute.xlu1 %1710  ;;  %v2969_v7 = vpack.c.bf16 %v2941_v41, %v2940_v9 }
 0x307   : > { %1780 = vst.msk [vmem:[#allocation3 + $0xd8] sm:$0xff] %vm1752_vm9, %v1711_v57  ;;  %v2968_v27 = vpack.c.bf16 %v2939_v24, %v2938_v5 }
 0x309   : > { %v2092_v13 = vpop.permute.xlu0 %2091  ;;  %3763 = vmatprep.mubr.msk.bf16.mxu0 %vm870_vm2, %v2968_v27 }
 0x30a   : > { %2164 = vst.msk [vmem:[#allocation3 + $0xc0] sm:$0xff] %vm2139_vm11, %v2092_v13  ;;  %v1900_v59 = vpop.permute.xlu1 %1899  ;;  %3764 = vmatmul.mubr.msk.bf16.gmra.mrb[20].mxu0 %vm870_vm2, %v2969_v7 }
 0x30b   : > { %1971 = vst.msk [vmem:[#allocation3 + $0xc8] sm:$0xff] %vm1945_vm10, %v1900_v59 }
 0x30d   : > { %v2096_v34 = vpop.permute.xlu0 %2095 }
 0x30e   : > { %2166 = vst.msk [vmem:[#allocation3 + $0xd0] sm:$0xff] %vm2139_vm11, %v2096_v34  ;;  %v1904_v19 = vpop.permute.xlu1 %1903 }
 0x30f   : > { %1973 = vst.msk [vmem:[#allocation3 + $0xd8] sm:$0xff] %vm1945_vm10, %v1904_v19 }
 0x311   : > { %v2285_v44 = vpop.permute.xlu0 %2284 }
 0x312   : > { %2357 = vst.msk [vmem:[#allocation3 + $0xc0] sm:$0xff] %vm2332_vm12, %v2285_v44  ;;  %v2094_v11 = vpop.permute.xlu1 %2093 }
 0x313   : > { %2165 = vst.msk [vmem:[#allocation3 + $0xc8] sm:$0xff] %vm2139_vm11, %v2094_v11 }
 0x315   : > { %v2289_v25 = vpop.permute.xlu0 %2288 }
 0x316   : > { %2359 = vst.msk [vmem:[#allocation3 + $0xd0] sm:$0xff] %vm2332_vm12, %v2289_v25  ;;  %v2098_v35 = vpop.permute.xlu1 %2097 }
 0x317   : > { %2167 = vst.msk [vmem:[#allocation3 + $0xd8] sm:$0xff] %vm2139_vm11, %v2098_v35 }
 0x319   : > { %v2478_v1 = vpop.permute.xlu0 %2477 }
 0x31a   : > { %2550 = vst.msk [vmem:[#allocation3 + $0xc0] sm:$0xff] %vm2525_vm13, %v2478_v1  ;;  %v2287_v49 = vpop.permute.xlu1 %2286 }
 0x31b   : > { %2358 = vst.msk [vmem:[#allocation3 + $0xc8] sm:$0xff] %vm2332_vm12, %v2287_v49 }
 0x31d   : > { %v1134_v48 = vpop.permute.xlu0 %1133 }
 0x31e   : > { %1202 = vst.msk [vmem:[#allocation3 + $0xe0] sm:$0xff] %vm1173_vm5, %v1134_v48  ;;  %v2291_v40 = vpop.permute.xlu1 %2290 }
 0x31f   : > { %2360 = vst.msk [vmem:[#allocation3 + $0xd8] sm:$0xff] %vm2332_vm12, %v2291_v40 }
 0x321   : > { %v2482_v29 = vpop.permute.xlu0 %2481  ;;  %v2582_v36 = vld [vmem:[#allocation3 + $0xc0] sm:$0xff] }
 0x322   : > { %2552 = vst.msk [vmem:[#allocation3 + $0xd0] sm:$0xff] %vm2525_vm13, %v2482_v29  ;;  %v2480_v6 = vpop.permute.xlu1 %2479 }
 0x323   : > { %2551 = vst.msk [vmem:[#allocation3 + $0xc8] sm:$0xff] %vm2525_vm13, %v2480_v6 }
 0x325   : > { %v1138_v14 = vpop.permute.xlu0 %1137 }
 0x326   : > { %1204 = vst.msk [vmem:[#allocation3 + $0xf0] sm:$0xff] %vm1173_vm5, %v1138_v14  ;;  %v1136_v47 = vpop.permute.xlu1 %1135 }
 0x327   : > { %1203 = vst.msk [vmem:[#allocation3 + $0xe8] sm:$0xff] %vm1173_vm5, %v1136_v47 }
 0x329   : > { %v1327_v16 = vpop.permute.xlu0 %1326  ;;  %v2584_v3 = vld [vmem:[#allocation3 + $0xd0] sm:$0xff] }
 0x32a   : > { %1395 = vst.msk [vmem:[#allocation3 + $0xe0] sm:$0xff] %vm1366_vm6, %v1327_v16  ;;  %v2484_v15 = vpop.permute.xlu1 %2483  ;;  %v2583_v51 = vld [vmem:[#allocation3 + $0xc8] sm:$0xff] }
 0x32b   : > { %2553 = vst.msk [vmem:[#allocation3 + $0xd8] sm:$0xff] %vm2525_vm13, %v2484_v15  ;;  %v2602_v30 = vpack.c.bf16 %v2583_v51, %v2582_v36 }
 0x32d   : > { %v1331_v32 = vpop.permute.xlu0 %1330  ;;  %3749 = vmatprep.mubr.msk.bf16.mxu1 %vm2642_vm14, %v2602_v30 }
 0x32e   : > { %1397 = vst.msk [vmem:[#allocation3 + $0xf0] sm:$0xff] %vm1366_vm6, %v1331_v32  ;;  %v1140_v26 = vpop.permute.xlu1 %1139 }
 0x32f   : > { %1205 = vst.msk [vmem:[#allocation3 + $0xf8] sm:$0xff] %vm1173_vm5, %v1140_v26 }
 0x331   : > { %v1520_v0 = vpop.permute.xlu0 %1519 }
 0x332   : > { %1588 = vst.msk [vmem:[#allocation3 + $0xe0] sm:$0xff] %vm1559_vm8, %v1520_v0  ;;  %v1329_v22 = vpop.permute.xlu1 %1328  ;;  %v2585_v37 = vld [vmem:[#allocation3 + $0xd8] sm:$0xff] }
 0x333   : > { %1396 = vst.msk [vmem:[#allocation3 + $0xe8] sm:$0xff] %vm1366_vm6, %v1329_v22  ;;  %v2603_v8 = vpack.c.bf16 %v2585_v37, %v2584_v3 }
 0x335   : > { %v1524_v12 = vpop.permute.xlu0 %1523  ;;  %3750 = vmatmul.mubr.msk.bf16.gmra.mrb[40].mxu1 %vm2642_vm14, %v2603_v8 }
 0x336   : > { %1590 = vst.msk [vmem:[#allocation3 + $0xf0] sm:$0xff] %vm1559_vm8, %v1524_v12  ;;  %v1333_v43 = vpop.permute.xlu1 %1332 }
 0x337   : > { %1398 = vst.msk [vmem:[#allocation3 + $0xf8] sm:$0xff] %vm1366_vm6, %v1333_v43 }
 0x339   : > { %v1713_v38 = vpop.permute.xlu0 %1712  ;;  %v3735_v9 = vpop.f32.mrb[24].mxu1 }
 0x33a   : > { %1781 = vst.msk [vmem:[#allocation3 + $0xe0] sm:$0xff] %vm1752_vm9, %v1713_v38  ;;  %v1522_v10 = vpop.permute.xlu1 %1521  ;;  %v2873_v41 = vmul.f32 %v3735_v9, %v5059_v42  ;;  %v2761_v57 = vpop.f32.mrb[25].mxu1 }
 0x33b   : > { %1589 = vst.msk [vmem:[#allocation3 + $0xe8] sm:$0xff] %vm1559_vm8, %v1522_v10  ;;  %v2871_v5 = vmul.f32 %v5059_v42, %v2761_v57  ;;  %v3736_v24 = vpop.f32.mrb[26].mxu1 }
 0x33c   : > { %v2912_v27 = vadd.f32 %v5066_v33, %v2873_v41  ;;  %v2874_v13 = vmul.f32 %v3736_v24, %v5059_v42  ;;  %v2764_v59 = vpop.f32.mrb[27].mxu1 }
 0x33d   : > { %v1717_v7 = vpop.permute.xlu0 %1716  ;;  %v2910_v19 = vadd.f32 %v5066_v33, %v2871_v5  ;;  %v2872_v44 = vmul.f32 %v5059_v42, %v2764_v59 }
 0x33e   : > { %1783 = vst.msk [vmem:[#allocation3 + $0xf0] sm:$0xff] %vm1752_vm9, %v1717_v7  ;;  %v1526_v34 = vpop.permute.xlu1 %1525  ;;  %v2913_v11 = vadd.f32 %v5066_v33, %v2874_v13  ;;  %v2944_v1 = vmax.f32 %v2912_v27, 0.0 }
 0x33f   : > { %1591 = vst.msk [vmem:[#allocation3 + $0xf8] sm:$0xff] %vm1559_vm8, %v1526_v34  ;;  %v2911_v25 = vadd.f32 %v5066_v33, %v2872_v44  ;;  %v2942_v40 = vmax.f32 %v2910_v19, 0.0 }
 0x340   : > { %v2945_v49 = vmax.f32 %v2913_v11, 0.0 }
 0x341   : > { %v1906_v35 = vpop.permute.xlu0 %1905  ;;  %v2943_v29 = vmax.f32 %v2911_v25, 0.0 }
 0x342   : > { %1974 = vst.msk [vmem:[#allocation3 + $0xe0] sm:$0xff] %vm1945_vm10, %v1906_v35  ;;  %v1715_v48 = vpop.permute.xlu1 %1714  ;;  %v2971_v6 = vpack.c.bf16 %v2945_v49, %v2944_v1 }
 0x343   : > { %1782 = vst.msk [vmem:[#allocation3 + $0xe8] sm:$0xff] %vm1752_vm9, %v1715_v48  ;;  %v2970_v14 = vpack.c.bf16 %v2943_v29, %v2942_v40 }
 0x345   : > { %v1910_v47 = vpop.permute.xlu0 %1909  ;;  %3767 = vmatprep.mubr.msk.bf16.mxu0 %vm870_vm2, %v2970_v14 }
 0x346   : > { %1976 = vst.msk [vmem:[#allocation3 + $0xf0] sm:$0xff] %vm1945_vm10, %v1910_v47  ;;  %v1719_v16 = vpop.permute.xlu1 %1718  ;;  %3768 = vmatmul.mubr.msk.bf16.gmra.mrb[24].mxu0 %vm870_vm2, %v2971_v6 }
 0x347   : > { %1784 = vst.msk [vmem:[#allocation3 + $0xf8] sm:$0xff] %vm1752_vm9, %v1719_v16 }
 0x349   : > { %v2100_v15 = vpop.permute.xlu0 %2099 }
 0x34a   : > { %2168 = vst.msk [vmem:[#allocation3 + $0xe0] sm:$0xff] %vm2139_vm11, %v2100_v15  ;;  %v1908_v36 = vpop.permute.xlu1 %1907 }
 0x34b   : > { %1975 = vst.msk [vmem:[#allocation3 + $0xe8] sm:$0xff] %vm1945_vm10, %v1908_v36 }
 0x34d   : > { %v2104_v51 = vpop.permute.xlu0 %2103 }
 0x34e   : > { %2170 = vst.msk [vmem:[#allocation3 + $0xf0] sm:$0xff] %vm2139_vm11, %v2104_v51  ;;  %v1912_v30 = vpop.permute.xlu1 %1911 }
 0x34f   : > { %1977 = vst.msk [vmem:[#allocation3 + $0xf8] sm:$0xff] %vm1945_vm10, %v1912_v30 }
 0x351   : > { %v2293_v0 = vpop.permute.xlu0 %2292 }
 0x352   : > { %v3739_v32 = vpop.f32.mrb[28].mxu1  ;;  %2361 = vst.msk [vmem:[#allocation3 + $0xe0] sm:$0xff] %vm2332_vm12, %v2293_v0  ;;  %v2102_v37 = vpop.permute.xlu1 %2101 }
 0x353   : > { %v2877_v26 = vmul.f32 %v3739_v32, %v5059_v42  ;;  %v2777_v22 = vpop.f32.mrb[29].mxu1  ;;  %2169 = vst.msk [vmem:[#allocation3 + $0xe8] sm:$0xff] %vm2139_vm11, %v2102_v37 }
 0x354   : > { %v2875_v3 = vmul.f32 %v5059_v42, %v2777_v22  ;;  %v3740_v8 = vpop.f32.mrb[30].mxu1 }
 0x355   : > { %v2916_v12 = vadd.f32 %v5066_v33, %v2877_v26  ;;  %v2878_v43 = vmul.f32 %v3740_v8, %v5059_v42  ;;  %v2780_v38 = vpop.f32.mrb[31].mxu1  ;;  %v2297_v57 = vpop.permute.xlu0 %2296 }
 0x356   : > { %v2914_v10 = vadd.f32 %v5066_v33, %v2875_v3  ;;  %v2876_v9 = vmul.f32 %v5059_v42, %v2780_v38  ;;  %2363 = vst.msk [vmem:[#allocation3 + $0xf0] sm:$0xff] %vm2332_vm12, %v2297_v57  ;;  %v2106_v24 = vpop.permute.xlu1 %2105 }
 0x357   : > { %v2917_v41 = vadd.f32 %v5066_v33, %v2878_v43  ;;  %v2948_v7 = vmax.f32 %v2916_v12, 0.0  ;;  %2171 = vst.msk [vmem:[#allocation3 + $0xf8] sm:$0xff] %vm2139_vm11, %v2106_v24 }
 0x358   : > { %v2915_v5 = vadd.f32 %v5066_v33, %v2876_v9  ;;  %v2946_v13 = vmax.f32 %v2914_v10, 0.0 }
 0x359   : > { %v2949_v27 = vmax.f32 %v2917_v41, 0.0  ;;  %v2486_v19 = vpop.permute.xlu0 %2485 }
 0x35a   : > { %v2947_v59 = vmax.f32 %v2915_v5, 0.0  ;;  %2554 = vst.msk [vmem:[#allocation3 + $0xe0] sm:$0xff] %vm2525_vm13, %v2486_v19  ;;  %v2295_v11 = vpop.permute.xlu1 %2294 }
 0x35b   : > { %v2973_v34 = vpack.c.bf16 %v2949_v27, %v2948_v7  ;;  %2362 = vst.msk [vmem:[#allocation3 + $0xe8] sm:$0xff] %vm2332_vm12, %v2295_v11 }
 0x35c   : > { %v2972_v44 = vpack.c.bf16 %v2947_v59, %v2946_v13 }
 0x35d   : > { %v2490_v25 = vpop.permute.xlu0 %2489 }
 0x35e   : > { %3771 = vmatprep.mubr.msk.bf16.mxu0 %vm870_vm2, %v2972_v44  ;;  %2556 = vst.msk [vmem:[#allocation3 + $0xf0] sm:$0xff] %vm2525_vm13, %v2490_v25  ;;  %v2299_v35 = vpop.permute.xlu1 %2298 }
 0x35f   : > { %3772 = vmatmul.mubr.msk.bf16.gmra.mrb[28].mxu0 %vm870_vm2, %v2973_v34  ;;  %2364 = vst.msk [vmem:[#allocation3 + $0xf8] sm:$0xff] %vm2332_vm12, %v2299_v35 }
 0x361   : > { %v5235_v49 = vpop.permute.xlu0 %684  ;;  %v2586_v14 = vld [vmem:[#allocation3 + $0xe0] sm:$0xff] }
 0x362   : > { %v2488_v1 = vpop.permute.xlu1 %2487  ;;  %v688_v40 = vmul.f32 %v5235_v49, %v4043_v61  ;;  %v687_v29 = vmul.f32 %v5235_v49, %v4028_v53  ;;  %v690_v61 = vmul.f32 %v4034_v56, %v5235_v49  ;;  %v689_v53 = vmul.f32 %v4019_v50, %v5235_v49 }
 0x363   : > { %2555 = vst.msk [vmem:[#allocation3 + $0xe8] sm:$0xff] %vm2525_vm13, %v2488_v1  ;;  %v692_v22 = vmul.f32 %v5235_v49, %v4087_v28  ;;  %v691_v56 = vmul.f32 %v5235_v49, %v4073_v21  ;;  %v694_v37 = vmul.f32 %v4079_v23, %v5235_v49  ;;  %v693_v8 = vmul.f32 %v4067_v18, %v5235_v49 }
 0x364   : > { %v696_v12 = vmul.f32 %v5235_v49, %v4139_v2  ;;  %v695_v43 = vmul.f32 %v5235_v49, %v4121_v52  ;;  %v698_v18 = vmul.f32 %v4129_v60, %v5235_v49  ;;  %v697_v10 = vmul.f32 %v4110_v46, %v5235_v49 }
 0x365   : > { %v2588_v51 = vld [vmem:[#allocation3 + $0xf0] sm:$0xff]  ;;  %v700_v52 = vmul.f32 %v5235_v49, %v4243_v55  ;;  %v699_v41 = vmul.f32 %v5235_v49, %v4226_v39  ;;  %v702_v46 = vmul.f32 %v4235_v45, %v5235_v49  ;;  %v701_v5 = vmul.f32 %v4217_v31, %v5235_v49 }
 0x366   : > { %v2492_v48 = vpop.permute.xlu1 %2491  ;;  %v704_v13 = vmul.f32 %v5235_v49, %v4055_v4  ;;  %v703_v45 = vmul.f32 %v5235_v49, %v4038_v58  ;;  %v706_v58 = vmul.f32 %v4047_v63, %v5235_v49 }
 0x367   : > { %2557 = vst.msk [vmem:[#allocation3 + $0xf8] sm:$0xff] %vm2525_vm13, %v2492_v48  ;;  %v705_v48 = vmul.f32 %v4030_v54, %v5235_v49 }
 0x36a   : > { %v5242_v6 = vpop.permute.xlu1 %725  ;;  %v2587_v47 = vld [vmem:[#allocation3 + $0xe8] sm:$0xff] }
 0x36b   : > { %v729_v16 = vadd.f32 %v5242_v6, %v688_v40  ;;  %v728_v15 = vadd.f32 %v5242_v6, %v687_v29  ;;  %v2604_v36 = vpack.c.bf16 %v2587_v47, %v2586_v14  ;;  %v731_v32 = vadd.f32 %v5242_v6, %v690_v61  ;;  %v5599_v61 = vld [vmem:[#allocation7_spill] sm:$0xff] }
 0x36c   : > { %v730_v26 = vadd.f32 %v5242_v6, %v689_v53  ;;  %v733_v50 = vadd.f32 %v5242_v6, %v692_v22  ;;  %v732_v3 = vadd.f32 %v5242_v6, %v691_v56  ;;  %v735_v28 = vadd.f32 %v5242_v6, %v694_v37  ;;  %v5600_v53 = vld [vmem:[#allocation5_spill] sm:$0xff]  ;;  %v5602_v56 = vld [vmem:[#allocation4_spill] sm:$0xff] }
 0x36d   : > { %3307 = vrot.lane.b32.xlu1 %v729_v16, %s3841_s29  ;;  %3305 = vrot.lane.b32.xlu0 %v728_v15, %s3841_s29  ;;  %v734_v21 = vadd.f32 %v5242_v6, %v693_v8  ;;  %v737_v38 = vadd.f32 %v5242_v6, %v696_v12  ;;  %v736_v23 = vadd.f32 %v5242_v6, %v695_v43 }
 0x36e   : > { %3753 = vmatprep.mubr.msk.bf16.mxu1 %vm2642_vm14, %v2604_v36  ;;  %v2589_v30 = vld [vmem:[#allocation3 + $0xf8] sm:$0xff]  ;;  %v739_v9 = vadd.f32 %v5242_v6, %v698_v18  ;;  %v738_v2 = vadd.f32 %v5242_v6, %v697_v10  ;;  %v741_v57 = vadd.f32 %v5242_v6, %v700_v52  ;;  %v740_v60 = vadd.f32 %v5242_v6, %v699_v41  ;;  %v5605_v18 = vld [vmem:[#allocation8_spill] sm:$0xff] }
 0x36f   : > { %v2605_v0 = vpack.c.bf16 %v2589_v30, %v2588_v51  ;;  %v743_v24 = vadd.f32 %v5242_v6, %v702_v46  ;;  %v742_v55 = vadd.f32 %v5242_v6, %v701_v5  ;;  %v745_v11 = vadd.f32 %v5242_v6, %v704_v13 }
 0x370   : > { %v744_v25 = vadd.f32 %v5242_v6, %v703_v45  ;;  %v747_v47 = vadd.f32 %v5242_v6, %v706_v58  ;;  %v746_v16 = vadd.f32 %v5242_v6, %v705_v48  ;;  %v708_v63 = vmul.f32 %v5235_v49, %v5599_v61 }
 0x371   : > { %3311 = vrot.lane.b32.xlu1 %v731_v32, %s3841_s29  ;;  %3309 = vrot.lane.b32.xlu0 %v730_v26, %s3841_s29  ;;  %v707_v54 = vmul.f32 %v5235_v49, %v5600_v53  ;;  %v712_v8 = vmul.f32 %v5235_v49, %v4545_v17  ;;  %v713_v10 = vmul.f32 %v5605_v18, %v5235_v49 }
 0x372   : > { %3754 = vmatmul.mubr.msk.bf16.gmra.mrb[44].mxu1 %vm2642_vm14, %v2605_v0  ;;  %v749_v32 = vadd.f32 %v5242_v6, %v708_v63  ;;  %v5601_v0 = vld [vmem:[#allocation6_spill] sm:$0xff] }
 0x373   : > { %v748_v26 = vadd.f32 %v5242_v6, %v707_v54  ;;  %v710_v22 = vmul.f32 %v5601_v0, %v5235_v49  ;;  %v753_v12 = vadd.f32 %v5242_v6, %v712_v8 }
 0x375   : > { %3315 = vrot.lane.b32.xlu1 %v733_v50, %s3841_s29  ;;  %3313 = vrot.lane.b32.xlu0 %v732_v3, %s3841_s29  ;;  %v709_v50 = vmul.f32 %v5602_v56, %v5235_v49  ;;  %v751_v3 = vadd.f32 %v5242_v6, %v710_v22 }
 0x377   : > { %v750_v37 = vadd.f32 %v5242_v6, %v709_v50 }
 0x379   : > { %3319 = vrot.lane.b32.xlu1 %v735_v28, %s3841_s29  ;;  %3317 = vrot.lane.b32.xlu0 %v734_v21, %s3841_s29  ;;  %v5603_v28 = vld [vmem:[#allocation9_spill] sm:$0xff] }
 0x37a   : > { %v711_v21 = vmul.f32 %v5235_v49, %v5603_v28 }
 0x37c   : > { %v752_v43 = vadd.f32 %v5242_v6, %v711_v21 }
 0x37d   : > { %3323 = vrot.lane.b32.xlu1 %v737_v38, %s3841_s29  ;;  %3321 = vrot.lane.b32.xlu0 %v736_v23, %s3841_s29  ;;  %v5604_v38 = vld [vmem:[#allocation10_spill] sm:$0xff] }
 0x37e   : > { %v714_v23 = vmul.f32 %v5604_v38, %v5235_v49 }
 0x380   : > { %v755_v17 = vadd.f32 %v5242_v6, %v714_v23 }
 0x381   : > { %3327 = vrot.lane.b32.xlu1 %v739_v9, %s3841_s29  ;;  %3325 = vrot.lane.b32.xlu0 %v738_v2, %s3841_s29  ;;  %v754_v2 = vadd.f32 %v5242_v6, %v713_v10 }
 0x385   : > { %3331 = vrot.lane.b32.xlu1 %v741_v57, %s3841_s29  ;;  %3329 = vrot.lane.b32.xlu0 %v740_v60, %s3841_s29  ;;  %v716_v57 = vmul.f32 %v5235_v49, %v4698_v62  ;;  %v5606_v60 = vld [vmem:[#allocation12_spill] sm:$0xff] }
 0x386   : > { %v715_v46 = vmul.f32 %v5235_v49, %v5606_v60 }
 0x387   : > { %v3743_v7 = vpop.f32.mrb[32].mxu1 }
 0x388   : > { %v2881_v39 = vmul.f32 %v3743_v7, %v5059_v42  ;;  %v2793_v27 = vpop.f32.mrb[33].mxu1  ;;  %v718_v7 = vmul.f32 %v4691_v20, %v5235_v49 }
 0x389   : > { %3335 = vrot.lane.b32.xlu1 %v743_v24, %s3841_s29  ;;  %3333 = vrot.lane.b32.xlu0 %v742_v55, %s3841_s29  ;;  %v2879_v31 = vmul.f32 %v5059_v42, %v2793_v27  ;;  %v3744_v59 = vpop.f32.mrb[34].mxu1  ;;  %v757_v24 = vadd.f32 %v5242_v6, %v716_v57  ;;  %v756_v55 = vadd.f32 %v5242_v6, %v715_v46 }
 0x38a   : > { %v2920_v34 = vadd.f32 %v5066_v33, %v2881_v39  ;;  %v2882_v19 = vmul.f32 %v3744_v59, %v5059_v42  ;;  %v2796_v44 = vpop.f32.mrb[35].mxu1  ;;  %v5607_v39 = vld [vmem:[#allocation11_spill] sm:$0xff]  ;;  %v759_v62 = vadd.f32 %v5242_v6, %v718_v7 }
 0x38b   : > { %v2918_v35 = vadd.f32 %v5066_v33, %v2879_v31  ;;  %v2880_v1 = vmul.f32 %v5059_v42, %v2796_v44  ;;  %v717_v27 = vmul.f32 %v5607_v39, %v5235_v49 }
 0x38c   : > { %v2921_v4 = vadd.f32 %v5066_v33, %v2882_v19  ;;  %v2952_v29 = vmax.f32 %v2920_v34, 0.0 }
 0x38d   : > { %3339 = vrot.lane.b32.xlu1 %v745_v11, %s3841_s29  ;;  %3337 = vrot.lane.b32.xlu0 %v744_v25, %s3841_s29  ;;  %v2919_v40 = vadd.f32 %v5066_v33, %v2880_v1  ;;  %v2950_v15 = vmax.f32 %v2918_v35, 0.0  ;;  %v758_v13 = vadd.f32 %v5242_v6, %v717_v27 }
 0x38e   : > { %v2953_v14 = vmax.f32 %v2921_v4, 0.0 }
 0x38f   : > { %v2951_v36 = vmax.f32 %v2919_v40, 0.0 }
 0x390   : > { %v2975_v51 = vpack.c.bf16 %v2953_v14, %v2952_v29  ;;  %v5393_v14 = vld [vmem:[%s5576_s8] ss:$0 sm:$0xff] }
 0x391   : > { %3343 = vrot.lane.b32.xlu1 %v747_v47, %s3841_s29  ;;  %3341 = vrot.lane.b32.xlu0 %v746_v16, %s3841_s29  ;;  %v2974_v30 = vpack.c.bf16 %v2951_v36, %v2950_v15  ;;  %v5400_v47 = vld [vmem:[%s5577_s9] ss:$0 sm:$0xff] }
 0x393   : > { %3775 = vmatprep.mubr.msk.bf16.mxu0 %vm870_vm2, %v2974_v30 }
 0x394   : > { %3776 = vmatmul.mubr.msk.bf16.gmra.mrb[32].mxu0 %vm870_vm2, %v2975_v51 }
 0x395   : > { %3347 = vrot.lane.b32.xlu1 %v749_v32, %s3841_s29  ;;  %3345 = vrot.lane.b32.xlu0 %v748_v26, %s3841_s29 }
 0x399   : > { %3351 = vrot.lane.b32.xlu1 %v751_v3, %s3841_s29  ;;  %3349 = vrot.lane.b32.xlu0 %v750_v37, %s3841_s29 }
 0x39d   : > { %3355 = vrot.lane.b32.xlu1 %v753_v12, %s3841_s29  ;;  %3353 = vrot.lane.b32.xlu0 %v752_v43, %s3841_s29  ;;  %v3761_v9 = vpop.f32.mrb[16].mxu0 }
 0x39e   : > { %v3068_v52 = vpop.f32.mrb[17].mxu0  ;;  %v3204_v36 = vmul.f32 %v3761_v9, %v5393_v14 }
 0x39f   : > { %v3762_v41 = vpop.f32.mrb[18].mxu0 }
 0x3a0   : > { %v3071_v5 = vpop.f32.mrb[19].mxu0  ;;  %v3205_v16 = vmul.f32 %v3762_v41, %v5393_v14  ;;  %v3243_v28 = vadd.f32 %v5400_v47, %v3204_v36 }
 0x3a1   : > { %3359 = vrot.lane.b32.xlu1 %v755_v17, %s3841_s29  ;;  %3357 = vrot.lane.b32.xlu0 %v754_v2, %s3841_s29 }
 0x3a2   : > { %v3244_v56 = vadd.f32 %v5400_v47, %v3205_v16 }
 0x3a5   : > { %3363 = vrot.lane.b32.xlu1 %v757_v24, %s3841_s29  ;;  %3361 = vrot.lane.b32.xlu0 %v756_v55, %s3841_s29 }
 0x3a9   : > { %3367 = vrot.lane.b32.xlu1 %v759_v62, %s3841_s29  ;;  %3365 = vrot.lane.b32.xlu0 %v758_v13, %s3841_s29 }
 0x3c8   : > { %v3747_v45 = vpop.f32.mrb[36].mxu1 }
 0x3c9   : > { %v2885_v31 = vmul.f32 %v3747_v45, %v5059_v42  ;;  %v2809_v59 = vpop.f32.mrb[37].mxu1 }
 0x3ca   : > { %v2883_v34 = vmul.f32 %v5059_v42, %v2809_v59  ;;  %v3748_v19 = vpop.f32.mrb[38].mxu1 }
 0x3cb   : > { %v2924_v20 = vadd.f32 %v5066_v33, %v2885_v31  ;;  %v2886_v44 = vmul.f32 %v3748_v19, %v5059_v42  ;;  %v2812_v49 = vpop.f32.mrb[39].mxu1  ;;  %v5442_v31 = vld [vmem:[%s5573_s5] ss:$0 sm:$0xff] }
 0x3cc   : > { %v2922_v11 = vadd.f32 %v5066_v33, %v2883_v34  ;;  %v2884_v6 = vmul.f32 %v5059_v42, %v2812_v49  ;;  %v3203_v42 = vmul.f32 %v5393_v14, %v3071_v5 }
 0x3cd   : > { %v2925_v25 = vadd.f32 %v5066_v33, %v2886_v44  ;;  %v2956_v1 = vmax.f32 %v2924_v20, 0.0  ;;  %v5449_v44 = vld [vmem:[%s5574_s6] ss:$0 sm:$0xff] }
 0x3ce   : > { %v2923_v35 = vadd.f32 %v5066_v33, %v2884_v6  ;;  %v2954_v58 = vmax.f32 %v2922_v11, 0.0  ;;  %v3202_v33 = vmul.f32 %v5393_v14, %v3068_v52  ;;  %v3242_v15 = vadd.f32 %v5400_v47, %v3203_v42 }
 0x3cf   : > { %v2957_v4 = vmax.f32 %v2925_v25, 0.0 }
 0x3d0   : > { %v2955_v48 = vmax.f32 %v2923_v35, 0.0  ;;  %v3241_v63 = vadd.f32 %v5400_v47, %v3202_v33 }
 0x3d1   : > { %v2977_v40 = vpack.c.bf16 %v2957_v4, %v2956_v1 }
 0x3d2   : > { %v2976_v29 = vpack.c.bf16 %v2955_v48, %v2954_v58 }
 0x3d4   : > { %3779 = vmatprep.mubr.msk.bf16.mxu0 %vm870_vm2, %v2976_v29 }
 0x3d5   : > { %3780 = vmatmul.mubr.msk.bf16.gmra.mrb[36].mxu0 %vm870_vm2, %v2977_v40 }
 0x3dd   : > { %v3765_v51 = vpop.f32.mrb[20].mxu0 }
 0x3de   : > { %v3084_v30 = vpop.f32.mrb[21].mxu0  ;;  %v3208_v10 = vmul.f32 %v3765_v51, %v5393_v14 }
 0x3df   : > { %v3308_v61 = vpop.permute.xlu1 %3307  ;;  %v3306_v54 = vpop.permute.xlu0 %3305  ;;  %v3206_v3 = vmul.f32 %v5393_v14, %v3084_v30 }
 0x3e0   : > { %v3402_v53 = vadd.f32 %v3308_v61, %v3242_v15  ;;  %v3401_v32 = vadd.f32 %v3306_v54, %v3241_v63  ;;  %v3766_v26 = vpop.f32.mrb[22].mxu0  ;;  %v3247_v55 = vadd.f32 %v5400_v47, %v3208_v10 }
 0x3e1   : > { %v3087_v22 = vpop.f32.mrb[23].mxu0  ;;  %v3209_v23 = vmul.f32 %v3766_v26, %v5393_v14  ;;  %v3245_v2 = vadd.f32 %v5400_v47, %v3206_v3 }
 0x3e2   : > { %v3434_v0 = vmax.f32 %v3402_v53, 0.0  ;;  %v3433_v50 = vmax.f32 %v3401_v32, 0.0  ;;  %v3207_v37 = vmul.f32 %v5393_v14, %v3087_v22 }
 0x3e3   : > { %v3312_v8 = vpop.permute.xlu1 %3311  ;;  %v3310_v12 = vpop.permute.xlu0 %3309  ;;  %v3248_v46 = vadd.f32 %v5400_v47, %v3209_v23 }
 0x3e4   : > { %3466 = vst.msk [vmem:[%s5411_s28 + $0x8] sm:$0xff] %vm870_vm2, %v3434_v0  ;;  %v3404_v21 = vadd.f32 %v3312_v8, %v3244_v56  ;;  %3465 = vst.msk [vmem:[%s5411_s28] sm:$0xff] %vm870_vm2, %v3433_v50  ;;  %v3403_v43 = vadd.f32 %v3310_v12, %v3243_v28  ;;  %v3246_v38 = vadd.f32 %v5400_v47, %v3207_v37 }
 0x3e6   : > { %v3436_v18 = vmax.f32 %v3404_v21, 0.0  ;;  %v3435_v9 = vmax.f32 %v3403_v43, 0.0 }
 0x3e7   : > { %v3316_v17 = vpop.permute.xlu1 %3315  ;;  %v3314_v41 = vpop.permute.xlu0 %3313 }
 0x3e8   : > { %3468 = vst.msk [vmem:[%s5411_s28 + $0x18] sm:$0xff] %vm870_vm2, %v3436_v18  ;;  %v3406_v52 = vadd.f32 %v3316_v17, %v3246_v38  ;;  %3467 = vst.msk [vmem:[%s5411_s28 + $0x10] sm:$0xff] %vm870_vm2, %v3435_v9  ;;  %v3405_v57 = vadd.f32 %v3314_v41, %v3245_v2 }
 0x3ea   : > { %v3438_v60 = vmax.f32 %v3406_v52, 0.0  ;;  %v3437_v5 = vmax.f32 %v3405_v57, 0.0 }
 0x3eb   : > { %v3320_v24 = vpop.permute.xlu1 %3319  ;;  %v3318_v39 = vpop.permute.xlu0 %3317 }
 0x3ec   : > { %3470 = vst.msk [vmem:[%s5411_s28 + $0x28] sm:$0xff] %vm870_vm2, %v3438_v60  ;;  %v3408_v7 = vadd.f32 %v3320_v24, %v3248_v46  ;;  %3469 = vst.msk [vmem:[%s5411_s28 + $0x20] sm:$0xff] %vm870_vm2, %v3437_v5  ;;  %v3407_v27 = vadd.f32 %v3318_v39, %v3247_v55 }
 0x3ee   : > { %v3440_v62 = vmax.f32 %v3408_v7, 0.0  ;;  %v3439_v13 = vmax.f32 %v3407_v27, 0.0 }
 0x3ef   : > { %v3322_v16 = vpop.permute.xlu0 %3321  ;;  %v3324_v15 = vpop.permute.xlu1 %3323 }
 0x3f0   : > { %3472 = vst.msk [vmem:[%s5411_s28 + $0x38] sm:$0xff] %vm870_vm2, %v3440_v62  ;;  %3471 = vst.msk [vmem:[%s5411_s28 + $0x30] sm:$0xff] %vm870_vm2, %v3439_v13 }
 0x3f3   : > { %v3326_v26 = vpop.permute.xlu0 %3325  ;;  %v3328_v3 = vpop.permute.xlu1 %3327 }
 0x3f7   : > { %v3330_v18 = vpop.permute.xlu0 %3329  ;;  %v3332_v10 = vpop.permute.xlu1 %3331 }
 0x3fb   : > { %v3334_v5 = vpop.permute.xlu0 %3333  ;;  %v3336_v27 = vpop.permute.xlu1 %3335 }
 0x408   : > { %v3751_v45 = vpop.f32.mrb[40].mxu1 }
 0x409   : > { %v2889_v59 = vmul.f32 %v5442_v31, %v3751_v45  ;;  %v2825_v34 = vpop.f32.mrb[41].mxu1 }
 0x40a   : > { %v2887_v19 = vmul.f32 %v5442_v31, %v2825_v34  ;;  %v3752_v20 = vpop.f32.mrb[42].mxu1 }
 0x40b   : > { %v2928_v49 = vadd.f32 %v5449_v44, %v2889_v59  ;;  %v2890_v11 = vmul.f32 %v5442_v31, %v3752_v20  ;;  %v2828_v6 = vpop.f32.mrb[43].mxu1 }
 0x40c   : > { %v2926_v25 = vadd.f32 %v5449_v44, %v2887_v19  ;;  %v2888_v35 = vmul.f32 %v5442_v31, %v2828_v6 }
 0x40d   : > { %v2929_v1 = vadd.f32 %v5449_v44, %v2890_v11  ;;  %v2960_v58 = vmax.f32 %v2928_v49, 0.0 }
 0x40e   : > { %v2927_v4 = vadd.f32 %v5449_v44, %v2888_v35  ;;  %v2958_v40 = vmax.f32 %v2926_v25, 0.0 }
 0x40f   : > { %v2961_v48 = vmax.f32 %v2929_v1, 0.0 }
 0x410   : > { %v2959_v29 = vmax.f32 %v2927_v4, 0.0 }
 0x411   : > { %v2979_v42 = vpack.c.bf16 %v2961_v48, %v2960_v58 }
 0x412   : > { %v2978_v33 = vpack.c.bf16 %v2959_v29, %v2958_v40 }
 0x414   : > { %3783 = vmatprep.mubr.msk.bf16.mxu0 %vm870_vm2, %v2978_v33 }
 0x415   : > { %3784 = vmatmul.mubr.msk.bf16.gmra.mrb[40].mxu0 %vm870_vm2, %v2979_v42 }
 0x419   : > { %v3769_v36 = vpop.f32.mrb[24].mxu0 }
 0x41a   : > { %v3212_v51 = vmul.f32 %v3769_v36, %v5393_v14  ;;  %v3100_v61 = vpop.f32.mrb[25].mxu0 }
 0x41b   : > { %v3210_v63 = vmul.f32 %v5393_v14, %v3100_v61  ;;  %v3770_v53 = vpop.f32.mrb[26].mxu0 }
 0x41c   : > { %v3251_v54 = vadd.f32 %v5400_v47, %v3212_v51  ;;  %v3213_v30 = vmul.f32 %v3770_v53, %v5393_v14  ;;  %v3103_v32 = vpop.f32.mrb[27].mxu0  ;;  %v3338_v53 = vpop.permute.xlu0 %3337 }
 0x41d   : > { %v3249_v0 = vadd.f32 %v5400_v47, %v3210_v63  ;;  %v3211_v22 = vmul.f32 %v5393_v14, %v3103_v32 }
 0x41e   : > { %v3411_v56 = vadd.f32 %v3326_v26, %v3251_v54  ;;  %v3252_v50 = vadd.f32 %v5400_v47, %v3213_v30  ;;  %v3340_v54 = vpop.permute.xlu1 %3339 }
 0x41f   : > { %v3409_v37 = vadd.f32 %v3322_v16, %v3249_v0  ;;  %v3250_v8 = vadd.f32 %v5400_v47, %v3211_v22 }
 0x420   : > { %v3443_v28 = vmax.f32 %v3411_v56, 0.0  ;;  %v3412_v21 = vadd.f32 %v3328_v3, %v3252_v50  ;;  %v3342_v50 = vpop.permute.xlu0 %3341 }
 0x421   : > { %v3441_v12 = vmax.f32 %v3409_v37, 0.0  ;;  %v3410_v43 = vadd.f32 %v3324_v15, %v3250_v8 }
 0x422   : > { %3475 = vst.msk [vmem:[%s5411_s28 + $0x50] sm:$0xff] %vm870_vm2, %v3443_v28  ;;  %v3444_v38 = vmax.f32 %v3412_v21, 0.0  ;;  %v3344_v21 = vpop.permute.xlu1 %3343 }
 0x423   : > { %3473 = vst.msk [vmem:[%s5411_s28 + $0x40] sm:$0xff] %vm870_vm2, %v3441_v12  ;;  %v3442_v23 = vmax.f32 %v3410_v43, 0.0 }
 0x424   : > { %3476 = vst.msk [vmem:[%s5411_s28 + $0x58] sm:$0xff] %vm870_vm2, %v3444_v38 }
 0x425   : > { %3474 = vst.msk [vmem:[%s5411_s28 + $0x48] sm:$0xff] %vm870_vm2, %v3442_v23 }
 0x432   : > { %v3773_v9 = vpop.f32.mrb[28].mxu0 }
 0x433   : > { %v3216_v17 = vmul.f32 %v3773_v9, %v5393_v14  ;;  %v3116_v2 = vpop.f32.mrb[29].mxu0 }
 0x434   : > { %v3214_v52 = vmul.f32 %v5393_v14, %v3116_v2  ;;  %v3774_v41 = vpop.f32.mrb[30].mxu0  ;;  %v3346_v2 = vpop.permute.xlu0 %3345 }
 0x435   : > { %v3255_v57 = vadd.f32 %v5400_v47, %v3216_v17  ;;  %v3217_v60 = vmul.f32 %v3774_v41, %v5393_v14  ;;  %v3119_v46 = vpop.f32.mrb[31].mxu0 }
 0x436   : > { %v3253_v24 = vadd.f32 %v5400_v47, %v3214_v52  ;;  %v3215_v55 = vmul.f32 %v5393_v14, %v3119_v46  ;;  %v3348_v52 = vpop.permute.xlu1 %3347 }
 0x437   : > { %v3415_v7 = vadd.f32 %v3334_v5, %v3255_v57  ;;  %v3256_v39 = vadd.f32 %v5400_v47, %v3217_v60 }
 0x438   : > { %v3413_v62 = vadd.f32 %v3330_v18, %v3253_v24  ;;  %v3254_v13 = vadd.f32 %v5400_v47, %v3215_v55 }
 0x439   : > { %v3447_v45 = vmax.f32 %v3415_v7, 0.0  ;;  %v3416_v59 = vadd.f32 %v3336_v27, %v3256_v39  ;;  %v3350_v39 = vpop.permute.xlu0 %3349 }
 0x43a   : > { %v3445_v34 = vmax.f32 %v3413_v62, 0.0  ;;  %v3414_v19 = vadd.f32 %v3332_v10, %v3254_v13 }
 0x43b   : > { %3479 = vst.msk [vmem:[%s5411_s28 + $0x70] sm:$0xff] %vm870_vm2, %v3447_v45  ;;  %v3448_v20 = vmax.f32 %v3416_v59, 0.0  ;;  %v3352_v59 = vpop.permute.xlu1 %3351 }
 0x43c   : > { %3477 = vst.msk [vmem:[%s5411_s28 + $0x60] sm:$0xff] %vm870_vm2, %v3445_v34  ;;  %v3446_v49 = vmax.f32 %v3414_v19, 0.0 }
 0x43d   : > { %3480 = vst.msk [vmem:[%s5411_s28 + $0x78] sm:$0xff] %vm870_vm2, %v3448_v20 }
 0x43e   : > { %3478 = vst.msk [vmem:[%s5411_s28 + $0x68] sm:$0xff] %vm870_vm2, %v3446_v49 }
 0x445   : > { %v3755_v11 = vpop.f32.mrb[44].mxu1 }
 0x446   : > { %v2893_v6 = vmul.f32 %v5442_v31, %v3755_v11  ;;  %v2841_v25 = vpop.f32.mrb[45].mxu1 }
 0x447   : > { %v2891_v35 = vmul.f32 %v5442_v31, %v2841_v25  ;;  %v3756_v1 = vpop.f32.mrb[46].mxu1 }
 0x448   : > { %v2932_v4 = vadd.f32 %v5449_v44, %v2893_v6  ;;  %v2894_v58 = vmul.f32 %v5442_v31, %v3756_v1  ;;  %v2844_v48 = vpop.f32.mrb[47].mxu1  ;;  %v3354_v1 = vpop.permute.xlu0 %3353 }
 0x449   : > { %v2930_v40 = vadd.f32 %v5449_v44, %v2891_v35  ;;  %v2892_v29 = vmul.f32 %v5442_v31, %v2844_v48 }
 0x44a   : > { %v2933_v42 = vadd.f32 %v5449_v44, %v2894_v58  ;;  %v2964_v16 = vmax.f32 %v2932_v4, 0.0  ;;  %v3356_v4 = vpop.permute.xlu1 %3355 }
 0x44b   : > { %v2931_v33 = vadd.f32 %v5449_v44, %v2892_v29  ;;  %v2962_v36 = vmax.f32 %v2930_v40, 0.0 }
 0x44c   : > { %v2965_v15 = vmax.f32 %v2933_v42, 0.0 }
 0x44d   : > { %v2963_v51 = vmax.f32 %v2931_v33, 0.0 }
 0x44e   : > { %v2981_v61 = vpack.c.bf16 %v2965_v15, %v2964_v16 }
 0x44f   : > { %v2980_v63 = vpack.c.bf16 %v2963_v51, %v2962_v36  ;;  %v3358_v36 = vpop.permute.xlu0 %3357 }
 0x451   : > { %3787 = vmatprep.mubr.msk.bf16.mxu0 %vm870_vm2, %v2980_v63 }
 0x452   : > { %3788 = vmatmul.mubr.msk.bf16.gmra.mrb[44].mxu0 %vm870_vm2, %v2981_v61 }
 0x467   : > { %v3777_v30 = vpop.f32.mrb[32].mxu0 }
 0x468   : > { %v3220_v32 = vmul.f32 %v3777_v30, %v5393_v14  ;;  %v3132_v31 = vpop.f32.mrb[33].mxu0 }
 0x469   : > { %v3218_v26 = vmul.f32 %v5393_v14, %v3132_v31  ;;  %v3778_v0 = vpop.f32.mrb[34].mxu0 }
 0x46a   : > { %v3259_v44 = vadd.f32 %v5400_v47, %v3220_v32  ;;  %v3221_v22 = vmul.f32 %v3778_v0, %v5393_v14  ;;  %v3135_v56 = vpop.f32.mrb[35].mxu0 }
 0x46b   : > { %v3257_v3 = vadd.f32 %v5400_v47, %v3218_v26  ;;  %v3219_v37 = vmul.f32 %v5393_v14, %v3135_v56 }
 0x46c   : > { %v3419_v8 = vadd.f32 %v3342_v50, %v3259_v44  ;;  %v3260_v28 = vadd.f32 %v5400_v47, %v3221_v22  ;;  %v3362_v50 = vpop.permute.xlu0 %3361 }
 0x46d   : > { %v3417_v12 = vadd.f32 %v3338_v53, %v3257_v3  ;;  %v3258_v43 = vadd.f32 %v5400_v47, %v3219_v37 }
 0x46e   : > { %v3451_v38 = vmax.f32 %v3419_v8, 0.0  ;;  %v3420_v23 = vadd.f32 %v3344_v21, %v3260_v28 }
 0x46f   : > { %v3449_v18 = vmax.f32 %v3417_v12, 0.0  ;;  %v3418_v10 = vadd.f32 %v3340_v54, %v3258_v43  ;;  %v3360_v54 = vpop.permute.xlu1 %3359 }
 0x470   : > { %3483 = vst.msk [vmem:[%s5411_s28 + $0x90] sm:$0xff] %vm870_vm2, %v3451_v38  ;;  %v3452_v9 = vmax.f32 %v3420_v23, 0.0 }
 0x471   : > { %3481 = vst.msk [vmem:[%s5411_s28 + $0x80] sm:$0xff] %vm870_vm2, %v3449_v18  ;;  %v3450_v17 = vmax.f32 %v3418_v10, 0.0  ;;  %v3366_v18 = vpop.permute.xlu0 %3365 }
 0x472   : > { %3484 = vst.msk [vmem:[%s5411_s28 + $0x98] sm:$0xff] %vm870_vm2, %v3452_v9 }
 0x473   : > { %3482 = vst.msk [vmem:[%s5411_s28 + $0x88] sm:$0xff] %vm870_vm2, %v3450_v17  ;;  %v3364_v3 = vpop.permute.xlu1 %3363 }
 0x4a8   : > { %v3781_v41 = vpop.f32.mrb[36].mxu0 }
 0x4a9   : > { %v3224_v57 = vmul.f32 %v3781_v41, %v5393_v14  ;;  %v3148_v60 = vpop.f32.mrb[37].mxu0 }
 0x4aa   : > { %v3222_v46 = vmul.f32 %v5393_v14, %v3148_v60  ;;  %v3782_v5 = vpop.f32.mrb[38].mxu0 }
 0x4ab   : > { %v3263_v24 = vadd.f32 %v5400_v47, %v3224_v57  ;;  %v3225_v55 = vmul.f32 %v3782_v5, %v5393_v14  ;;  %v3151_v7 = vpop.f32.mrb[39].mxu0 }
 0x4ac   : > { %v3261_v27 = vadd.f32 %v5400_v47, %v3222_v46  ;;  %v3223_v62 = vmul.f32 %v5393_v14, %v3151_v7 }
 0x4ad   : > { %v3423_v13 = vadd.f32 %v3350_v39, %v3263_v24  ;;  %v3264_v45 = vadd.f32 %v5400_v47, %v3225_v55 }
 0x4ae   : > { %v3421_v34 = vadd.f32 %v3346_v2, %v3261_v27  ;;  %v3262_v19 = vadd.f32 %v5400_v47, %v3223_v62 }
 0x4af   : > { %v3455_v20 = vmax.f32 %v3423_v13, 0.0  ;;  %v3424_v49 = vadd.f32 %v3352_v59, %v3264_v45 }
 0x4b0   : > { %v3453_v11 = vmax.f32 %v3421_v34, 0.0  ;;  %v3422_v6 = vadd.f32 %v3348_v52, %v3262_v19  ;;  %v3368_v52 = vpop.permute.xlu1 %3367 }
 0x4b1   : > { %3487 = vst.msk [vmem:[%s5411_s28 + $0xb0] sm:$0xff] %vm870_vm2, %v3455_v20  ;;  %v3456_v25 = vmax.f32 %v3424_v49, 0.0 }
 0x4b2   : > { %3485 = vst.msk [vmem:[%s5411_s28 + $0xa0] sm:$0xff] %vm870_vm2, %v3453_v11  ;;  %v3454_v35 = vmax.f32 %v3422_v6, 0.0 }
 0x4b3   : > { %3488 = vst.msk [vmem:[%s5411_s28 + $0xb8] sm:$0xff] %vm870_vm2, %v3456_v25 }
 0x4b4   : > { %3486 = vst.msk [vmem:[%s5411_s28 + $0xa8] sm:$0xff] %vm870_vm2, %v3454_v35 }
 0x4e8   : > { %v3785_v58 = vpop.f32.mrb[40].mxu0 }
 0x4e9   : > { %v3228_v48 = vmul.f32 %v3785_v58, %v5393_v14  ;;  %v3164_v40 = vpop.f32.mrb[41].mxu0 }
 0x4ea   : > { %v3226_v29 = vmul.f32 %v5393_v14, %v3164_v40  ;;  %v3786_v42 = vpop.f32.mrb[42].mxu0 }
 0x4eb   : > { %v3267_v33 = vadd.f32 %v5400_v47, %v3228_v48  ;;  %v3229_v16 = vmul.f32 %v3786_v42, %v5393_v14  ;;  %v3167_v15 = vpop.f32.mrb[43].mxu0 }
 0x4ec   : > { %v3265_v51 = vadd.f32 %v5400_v47, %v3226_v29  ;;  %v3227_v61 = vmul.f32 %v5393_v14, %v3167_v15 }
 0x4ed   : > { %v3427_v63 = vadd.f32 %v3358_v36, %v3267_v33  ;;  %v3268_v53 = vadd.f32 %v5400_v47, %v3229_v16 }
 0x4ee   : > { %v3425_v30 = vadd.f32 %v3354_v1, %v3265_v51  ;;  %v3266_v32 = vadd.f32 %v5400_v47, %v3227_v61 }
 0x4ef   : > { %v3459_v31 = vmax.f32 %v3427_v63, 0.0  ;;  %v3428_v26 = vadd.f32 %v3360_v54, %v3268_v53 }
 0x4f0   : > { %v3457_v0 = vmax.f32 %v3425_v30, 0.0  ;;  %v3426_v44 = vadd.f32 %v3356_v4, %v3266_v32 }
 0x4f1   : > { %3491 = vst.msk [vmem:[%s5411_s28 + $0xd0] sm:$0xff] %vm870_vm2, %v3459_v31  ;;  %v3460_v22 = vmax.f32 %v3428_v26, 0.0 }
 0x4f2   : > { %3489 = vst.msk [vmem:[%s5411_s28 + $0xc0] sm:$0xff] %vm870_vm2, %v3457_v0  ;;  %v3458_v56 = vmax.f32 %v3426_v44, 0.0 }
 0x4f3   : > { %3492 = vst.msk [vmem:[%s5411_s28 + $0xd8] sm:$0xff] %vm870_vm2, %v3460_v22 }
 0x4f4   : > { %3490 = vst.msk [vmem:[%s5411_s28 + $0xc8] sm:$0xff] %vm870_vm2, %v3458_v56 }
 0x525   : > { %v3789_v37 = vpop.f32.mrb[44].mxu0 }
 0x526   : > { %v3232_v8 = vmul.f32 %v3789_v37, %v5393_v14  ;;  %v3180_v28 = vpop.f32.mrb[45].mxu0 }
 0x527   : > { %v3230_v21 = vmul.f32 %v5393_v14, %v3180_v28  ;;  %v3790_v12 = vpop.f32.mrb[46].mxu0 }
 0x528   : > { %v3271_v43 = vadd.f32 %v5400_v47, %v3232_v8  ;;  %v3233_v38 = vmul.f32 %v3790_v12, %v5393_v14  ;;  %v3183_v23 = vpop.f32.mrb[47].mxu0 }
 0x529   : > { %v3269_v10 = vadd.f32 %v5400_v47, %v3230_v21  ;;  %v3231_v9 = vmul.f32 %v5393_v14, %v3183_v23 }
 0x52a   : > { %v3431_v17 = vadd.f32 %v3366_v18, %v3271_v43  ;;  %v3272_v2 = vadd.f32 %v5400_v47, %v3233_v38 }
 0x52b   : > { %v3429_v41 = vadd.f32 %v3362_v50, %v3269_v10  ;;  %v3270_v57 = vadd.f32 %v5400_v47, %v3231_v9 }
 0x52c   : > { %v3463_v60 = vmax.f32 %v3431_v17, 0.0  ;;  %v3432_v46 = vadd.f32 %v3368_v52, %v3272_v2 }
 0x52d   : > { %v3461_v5 = vmax.f32 %v3429_v41, 0.0  ;;  %v3430_v24 = vadd.f32 %v3364_v3, %v3270_v57 }
 0x52e   : > { %3495 = vst.msk [vmem:[%s5411_s28 + $0xf0] sm:$0xff] %vm870_vm2, %v3463_v60  ;;  %v3464_v55 = vmax.f32 %v3432_v46, 0.0 }
 0x52f   : > { %3493 = vst.msk [vmem:[%s5411_s28 + $0xe0] sm:$0xff] %vm870_vm2, %v3461_v5  ;;  %v3462_v7 = vmax.f32 %v3430_v24, 0.0 }
 0x530   : > { %3496 = vst.msk [vmem:[%s5411_s28 + $0xf8] sm:$0xff] %vm870_vm2, %v3464_v55 }
 0x531   : > { %3494 = vst.msk [vmem:[%s5411_s28 + $0xe8] sm:$0xff] %vm870_vm2, %v3462_v7 }
 0x532 PF: > { %s22_s21 = sadd.s32 1, %s3830_s21  }
 0x533   : > { %p19_p4 = scmp.ge.s32.totalorder %s22_s21, 4  }
 0x535   :  { %21 = sbr.rel (!%p19_p4) target bundleno = 1 (0x1), region = 101 }

</bundles_post_ra>
